<compile_context>
chip_gen: v7x
topology: tpu7x:2x2x1
jax: 0.10.0
libtpu: 0.0.40
codegen_flags: <defaults>
</compile_context>

<pallas_src>
import math
import functools

import jax
import jax.numpy as jnp
from jax import lax
from jax.experimental import pallas as pl
from jax.experimental.pallas import tpu as pltpu


def _cross_attn_kernel(hid_ref, k_ref, v_ref, mask_ref, wq_ref, bq_ref,
                       wo_ref, bo_ref, out_ref,
                       q_sc, m_sc, l_sc, acc_sc, ctx_sc,
                       *, scale, n_heads, head_dim, compute_dtype, recip_approx):
    si = pl.program_id(1)                        # S-page index ("arbitrary" axis)
    H, D = n_heads, head_dim
    cdt = compute_dtype

    @pl.when(si == 0)
    def _init():
        # Fused q-projection: one [T,E] x [E,E] MXU matmul (contraction over the
        # full embed dim).  Bias and 1/sqrt(D) are folded into q here (T*E work)
        # instead of into the [T,S] score matrix.
        q = jnp.dot(hid_ref[0].astype(cdt), wq_ref[...],
                    preferred_element_type=jnp.float32)
        q = (q + bq_ref[...]) * scale
        # TODO(synk): a single pltpu.einshape("t(hd)->htd") relayout would replace
        # these H lane-slice extracts for large H*D; kept slice-based for robust
        # lowering (runs only once per batch row, at si == 0).
        for h in range(H):                       # static unroll: split heads by lane slice
            q_sc[h] = q[:, h * D:(h + 1) * D].astype(cdt)
        m_sc[...] = jnp.full_like(m_sc, -jnp.inf)
        l_sc[...] = jnp.zeros_like(l_sc)
        acc_sc[...] = jnp.zeros_like(acc_sc)

    # --- hot loop (runs for every S page): no masking / iota work here --------
    q = q_sc[...]                                # [H, T, D]  (compute dtype)
    k = k_ref[0]                                 # [H, bs, D] (compute dtype)
    v = v_ref[0]                                 # [H, bs, D] (compute dtype)

    # scores [H, T, bs]: head-batched MXU matmul, f32 accumulate.
    s = lax.dot_general(q, k, (((2,), (2,)), ((0,), (0,))),
                        preferred_element_type=jnp.float32)
    s = s + mask_ref[0]                          # compact [1, bs] additive mask (padded cols carry -1e9)

    # Online (flash-style) softmax across S pages; stats / accumulator stay f32.
    m_prev = m_sc[...]
    m_new = jnp.maximum(m_prev, jnp.max(s, axis=-1, keepdims=True))
    alpha = jnp.exp(m_prev - m_new)
    p = jnp.exp(s - m_new)
    l_sc[...] = alpha * l_sc[...] + jnp.sum(p, axis=-1, keepdims=True)
    acc_sc[...] = alpha * acc_sc[...] + lax.dot_general(
        p.astype(cdt), v, (((2,), (1,)), ((0,), (0,))),
        preferred_element_type=jnp.float32)
    m_sc[...] = m_new

    @pl.when(si == pl.num_programs(1) - 1)
    def _finalize():
        inv_l = pl.reciprocal(l_sc[...], approx=recip_approx)    # [H, T, 1]
        ctx = acc_sc[...] * inv_l                                # [H, T, D] f32
        # Merge heads into lane slices of a [T, E] staging buffer, then ONE fused
        # [T,E] x [E,E] output-projection matmul (full E contraction on the MXU),
        # instead of H small K=D matmuls summed on the VALU.
        for h in range(H):                                       # static unroll, once per batch row
            ctx_sc[:, h * D:(h + 1) * D] = ctx[h].astype(cdt)
        out = jnp.dot(ctx_sc[...], wo_ref[...],
                      preferred_element_type=jnp.float32) + bo_ref[...]
        out_ref[...] = out[None].astype(out_ref.dtype)


def _round_down_mult(x, m):
    return (x // m) * m


def _pick_block_s_and_vmem(S, T, E, H, D, hid_bytes, out_bytes, cdt_bytes,
                           requested_block_s):
    """Chip-aware S-page width + vmem limit (resident weights + 2x KV pages + scratch)."""
    try:
        vmem_cap = int(pltpu.get_tpu_info().vmem_capacity_bytes)
    except Exception:
        vmem_cap = 64 * 1024 * 1024          # conservative (v7x-sized) fallback
    # Leave headroom for Mosaic-internal scratch / semaphores / alignment.
    budget = max(int(vmem_cap * 0.75), 16 * 1024 * 1024)

    # Resident, block_s-independent VMEM.  Weights are counted double-buffered so
    # the budget stays valid even if pl.Buffered(1) is unavailable.
    weights = 2 * (2 * E * E * cdt_bytes)                     # Wq + Wo
    biases = 2 * (2 * E * 4)
    hidden_blk = 2 * (T * E * hid_bytes)
    out_blk = 2 * (T * E * out_bytes)
    scratch = (H * T * D * cdt_bytes                          # q (per head)
               + 2 * H * T * 4                                # m, l
               + H * T * D * 4                                # running ctx
               + T * E * cdt_bytes)                           # merged ctx staging
    fixed = weights + biases + hidden_blk + out_blk + scratch

    # Per-S-column streamed cost: K + V pages (double-buffered) + compact f32 mask.
    per_col = 2 * (2 * H * D * cdt_bytes) + 2 * 4

    s_full = pl.cdiv(S, 128) * 128
    bs = _round_down_mult(max(budget - fixed, 0) // per_col, 128)
    bs = max(128, min(bs, s_full))
    if requested_block_s is not None:
        bs = min(bs, max(128, _round_down_mult(int(requested_block_s), 128)))
        bs = min(bs, s_full)

    need = fixed + per_col * bs + (4 << 20)
    vmem_limit = int(min(vmem_cap, max(budget, need)))
    return bs, vmem_limit


def seq2seq_cross_attention(hidden_states, key_value_states, past_key_value,
                            attention_mask, wq_t, bq, wo_t, bo,
                            *, compute_dtype=jnp.bfloat16, block_s=None):
    """Mirrors Seq2SeqCrossAttention.forward (cross-attention branch).

    Returns (attn_output, None, past_key_value), like the PyTorch module.
    `key_value_states` only selects the cross-attention path.
    """
    # TODO(synk): the surrounding Seq2SeqDecoderLayer pieces (pre/post layer norms,
    # self_attn, ff_layer) are abstract (raise NotImplementedError) in the reference
    # module, so only the concrete cross-attention sublayer is kernelized here.
    assert key_value_states is not None          # cross-attention path of the module
    key_states, value_states = past_key_value

    B, T, E = hidden_states.shape
    _, H, S, D = key_states.shape
    assert H * D == E
    scale = 1.0 / math.sqrt(D)

    cdt_bytes = jnp.dtype(compute_dtype).itemsize
    hid_bytes = jnp.dtype(hidden_states.dtype).itemsize
    bs, vmem_limit = _pick_block_s_and_vmem(
        S, T, E, H, D, hid_bytes, hid_bytes, cdt_bytes, block_s)
    ns = pl.cdiv(S, bs)
    s_pad = ns * bs

    # Compact additive mask [B,1,S]: broadcast over heads/queries in-register inside
    # the kernel instead of materializing [B,H,T,S] f32 in HBM.  Clamp to >= -1e9 so
    # a fully-masked page cannot drive the online-softmax alpha to NaN (-inf inputs).
    mask = jnp.broadcast_to(attention_mask, (B, 1, 1, S)).reshape(B, 1, S)
    mask = jnp.maximum(mask.astype(jnp.float32), jnp.float32(-1e9))

    # MXU operands in compute_dtype (bf16 by default); biases stay f32.
    k_cd = key_states.astype(compute_dtype)
    v_cd = value_states.astype(compute_dtype)

    # Host-side padding of the (static) KV cache + mask to a multiple of block_s:
    # removes all ragged-page iota/where work from the per-page hot loop.
    if s_pad != S:
        pad = s_pad - S
        k_cd = jnp.pad(k_cd, ((0, 0), (0, 0), (0, pad), (0, 0)))
        v_cd = jnp.pad(v_cd, ((0, 0), (0, 0), (0, pad), (0, 0)))
        mask = jnp.pad(mask, ((0, 0), (0, 0), (0, pad)), constant_values=-1e9)

    wq_cd = wq_t.astype(compute_dtype)
    wo_cd = wo_t.astype(compute_dtype)
    bq_2d = bq.reshape(1, E).astype(jnp.float32)
    bo_2d = bo.reshape(1, E).astype(jnp.float32)

    kernel = functools.partial(
        _cross_attn_kernel, scale=scale, n_heads=H, head_dim=D,
        compute_dtype=compute_dtype,
        recip_approx=(jnp.dtype(compute_dtype) != jnp.dtype(jnp.float32)))

    def build(single_buffer_weights):
        # Weights / biases have constant block indices -> DMA'd once and VMEM-resident;
        # single-buffering them halves their footprint (matters on v7x's 64 MiB VMEM).
        wkw = dict(pipeline_mode=pl.Buffered(1)) if single_buffer_weights else {}
        # TODO(synk): for very large E (>= 4096) on v7x, stage Wo from HBM
        # (memory_space=pl.ANY + make_async_copy) behind the last S pages instead of
        # keeping it VMEM-resident for the whole grid.
        in_specs = [
            pl.BlockSpec((1, T, E), lambda b, s: (b, 0, 0)),              # hidden (resident over S)
            pl.BlockSpec((1, H, bs, D), lambda b, s: (b, 0, s, 0)),       # K page (double-buffered)
            pl.BlockSpec((1, H, bs, D), lambda b, s: (b, 0, s, 0)),       # V page (double-buffered)
            pl.BlockSpec((1, 1, bs), lambda b, s: (b, 0, s)),             # compact mask page
            pl.BlockSpec((E, E), lambda b, s: (0, 0), **wkw),             # Wq.T
            pl.BlockSpec((1, E), lambda b, s: (0, 0), **wkw),             # bq
            pl.BlockSpec((E, E), lambda b, s: (0, 0), **wkw),             # Wo.T
            pl.BlockSpec((1, E), lambda b, s: (0, 0), **wkw),             # bo
        ]
        return pl.pallas_call(
            kernel,
            out_shape=jax.ShapeDtypeStruct((B, T, E), hidden_states.dtype),
            grid_spec=pltpu.PrefetchScalarGridSpec(
                num_scalar_prefetch=0,
                grid=(B, ns),                                             # batch parallel, S reduction
                in_specs=in_specs,
                out_specs=pl.BlockSpec((1, T, E), lambda b, s: (b, 0, 0)),  # lane-dense (E-wide)
                scratch_shapes=[
                    pltpu.VMEM((H, T, D), compute_dtype),                 # q, split per head
                    pltpu.VMEM((H, T, 1), jnp.float32),                   # running max
                    pltpu.VMEM((H, T, 1), jnp.float32),                   # running denom
                    pltpu.VMEM((H, T, D), jnp.float32),                   # running context
                    pltpu.VMEM((T, E), compute_dtype),                    # merged ctx staging
                ],
            ),
            compiler_params=pltpu.CompilerParams(
                # TODO(synk): on v7x (2 TCs), add a parallel head-group grid axis when
                # B == 1 so the second TensorCore is not idle during decode.
                dimension_semantics=("parallel", "arbitrary"),
                vmem_limit_bytes=vmem_limit,
            ),
        )

    args = (hidden_states, k_cd, v_cd, mask, wq_cd, bq_2d, wo_cd, bo_2d)
    try:
        attn_output = build(True)(*args)
    except Exception:
        # pl.Buffered(1) on constant-index blocks not accepted by this jax/libtpu:
        # fall back to default double-buffering (already accounted in the VMEM budget).
        attn_output = build(False)(*args)

    return attn_output, None, past_key_value


def _reference(hidden, key_states, value_states, attention_mask, wq_t, bq, wo_t, bo):
    B, T, E = hidden.shape
    _, H, S, D = key_states.shape
    with jax.default_matmul_precision("highest"):
        q = hidden @ wq_t + bq                                       # q_proj
        q = q.reshape(B, T, H, D).transpose(0, 2, 1, 3)              # [B,H,T,D]
        scores = jnp.einsum('bhtd,bhsd->bhts', q, key_states) / math.sqrt(D)
        scores = scores + jnp.broadcast_to(attention_mask, (B, H, T, S))
        attn = jax.nn.softmax(scores, axis=-1)
        ctx = jnp.einsum('bhts,bhsd->bhtd', attn, value_states)
        ctx = ctx.transpose(0, 2, 1, 3).reshape(B, T, E)             # merge heads
        return ctx @ wo_t + bo                                       # out_proj


if __name__ == "__main__":
    # S deliberately NOT a multiple of 128 to exercise the host-side KV/mask padding.
    B, T, S, E, H = 2, 8, 200, 32, 4
    D = E // H

    key = jax.random.PRNGKey(0)
    ks = jax.random.split(key, 8)
    hidden = jax.random.normal(ks[0], (B, T, E), jnp.float32)
    key_value_states = jax.random.normal(ks[1], (B, S, E), jnp.float32)  # only gates cross-attn path
    k_cache = jax.random.normal(ks[2], (B, H, S, D), jnp.float32)
    v_cache = jax.random.normal(ks[3], (B, H, S, D), jnp.float32)
    wq_t = jax.random.normal(ks[4], (E, E), jnp.float32) * 0.1
    bq = jax.random.normal(ks[5], (E,), jnp.float32) * 0.1
    wo_t = jax.random.normal(ks[6], (E, E), jnp.float32) * 0.1
    bo = jax.random.normal(ks[7], (E,), jnp.float32) * 0.1

    # additive mask [B,1,1,S]: second batch element masks the last 64 source tokens
    valid_len = jnp.array([S, S - 64])
    col = jnp.arange(S)[None, None, None, :]
    attention_mask = jnp.where(
        col < valid_len[:, None, None, None], 0.0, -1e9).astype(jnp.float32)

    # bf16 MXU operands, forced 128-wide S pages (2 pages -> exercises the
    # online-softmax accumulation across S blocks plus the padded last page).
    out_bf16, _, _ = seq2seq_cross_attention(
        hidden, key_value_states, (k_cache, v_cache), attention_mask,
        wq_t, bq, wo_t, bo, compute_dtype=jnp.bfloat16, block_s=128)
    out_bf16 = jax.block_until_ready(out_bf16)

    # f32 compute path, auto (chip-derived) S page -> single padded page here.
    out_f32, _, _ = seq2seq_cross_attention(
        hidden, key_value_states, (k_cache, v_cache), attention_mask,
        wq_t, bq, wo_t, bo, compute_dtype=jnp.float32)
    out_f32 = jax.block_until_ready(out_f32)

    def _r(x):  # bf16-round, to mirror what the bf16 kernel feeds the MXU
        return x.astype(jnp.bfloat16).astype(jnp.float32)

    ref_f32 = _reference(hidden, k_cache, v_cache, attention_mask, wq_t, bq, wo_t, bo)
    ref_b16 = _reference(_r(hidden), _r(k_cache), _r(v_cache), attention_mask,
                         _r(wq_t), bq, _r(wo_t), bo)

    assert jnp.allclose(out_f32.astype(jnp.float32), ref_f32,
                        atol=2e-2, rtol=2e-2), "f32 path mismatch vs. reference"
    assert jnp.allclose(out_bf16.astype(jnp.float32), ref_b16,
                        atol=5e-2, rtol=5e-2), "bf16 path mismatch vs. reference"

    print("KERNEL_OK")
</pallas_src>

<mosaic_0001>
module attributes {stable_mosaic.version = 11 : i64} {
  func.func @_cross_attn_kernel(%arg0: i32, %arg1: i32, %arg2: memref<1x8x32xf32, #tpu.memory_space<vmem>>, %arg3: memref<1x4x128x8xbf16, #tpu.memory_space<vmem>>, %arg4: memref<1x4x128x8xbf16, #tpu.memory_space<vmem>>, %arg5: memref<1x1x128xf32, #tpu.memory_space<vmem>>, %arg6: memref<32x32xbf16, #tpu.memory_space<vmem>>, %arg7: memref<1x32xf32, #tpu.memory_space<vmem>>, %arg8: memref<32x32xbf16, #tpu.memory_space<vmem>>, %arg9: memref<1x32xf32, #tpu.memory_space<vmem>>, %arg10: memref<1x8x32xf32, #tpu.memory_space<vmem>>, %arg11: memref<4x8x8xbf16, #tpu.memory_space<vmem>>, %arg12: memref<4x8x1xf32, #tpu.memory_space<vmem>>, %arg13: memref<4x8x1xf32, #tpu.memory_space<vmem>>, %arg14: memref<4x8x8xf32, #tpu.memory_space<vmem>>, %arg15: memref<8x32xbf16, #tpu.memory_space<vmem>>) attributes {dimension_semantics = [#tpu.dimension_semantics<parallel>, #tpu.dimension_semantics<arbitrary>], iteration_bounds = array<i64: 2, 2>, scalar_prefetch = 0 : i64, scratch_operands = 5 : i64, tpu.core_type = #tpu.core_type<tc>, window_params = [{transform_indices = @transform_0, window_bounds = array<i64: 1, 8, 32>}, {transform_indices = @transform_1, window_bounds = array<i64: 1, 4, 128, 8>}, {transform_indices = @transform_2, window_bounds = array<i64: 1, 4, 128, 8>}, {transform_indices = @transform_3, window_bounds = array<i64: 1, 1, 128>}, {pipeline_mode = #tpu.pipeline_mode<synchronous>, transform_indices = @transform_4, window_bounds = array<i64: 32, 32>}, {pipeline_mode = #tpu.pipeline_mode<synchronous>, transform_indices = @transform_5, window_bounds = array<i64: 1, 32>}, {pipeline_mode = #tpu.pipeline_mode<synchronous>, transform_indices = @transform_6, window_bounds = array<i64: 32, 32>}, {pipeline_mode = #tpu.pipeline_mode<synchronous>, transform_indices = @transform_7, window_bounds = array<i64: 1, 32>}, {transform_indices = @transform_8, window_bounds = array<i64: 1, 8, 32>}]} {
    %c0_i32 = arith.constant 0 : i32
    %0 = arith.cmpi eq, %arg1, %c0_i32 : i32
    %1 = arith.extui %0 : i1 to i32
    %c0_i32_0 = arith.constant 0 : i32
    %2 = arith.cmpi ne, %1, %c0_i32_0 : i32
    scf.if %2 {
      %c0_36 = arith.constant 0 : index
      %c0_37 = arith.constant 0 : index
      %c0_38 = arith.constant 0 : index
      %40 = vector.load %arg2[%c0_36, %c0_37, %c0_38] : memref<1x8x32xf32, #tpu.memory_space<vmem>>, vector<1x8x32xf32>
      %41 = vector.shape_cast %40 : vector<1x8x32xf32> to vector<8x32xf32>
      %42 = arith.truncf %41 : vector<8x32xf32> to vector<8x32xbf16>
      %c0_39 = arith.constant 0 : index
      %c0_40 = arith.constant 0 : index
      %43 = vector.load %arg6[%c0_39, %c0_40] : memref<32x32xbf16, #tpu.memory_space<vmem>>, vector<32x32xbf16>
      %cst_41 = arith.constant dense<0.000000e+00> : vector<8x32xf32>
      %44 = tpu.matmul %42, %43, %cst_41 {dimension_numbers = #tpu.dot_dimension_numbers<[1], [0], [0], [1], [0, 0, 1, 1], [], []>} : vector<8x32xbf16>, vector<32x32xbf16>, vector<8x32xf32> -> vector<8x32xf32>
      %c0_42 = arith.constant 0 : index
      %c0_43 = arith.constant 0 : index
      %45 = vector.load %arg7[%c0_42, %c0_43] : memref<1x32xf32, #tpu.memory_space<vmem>>, vector<1x32xf32>
      %46 = vector.broadcast %45 : vector<1x32xf32> to vector<8x32xf32>
      %47 = arith.addf %44, %46 : vector<8x32xf32>
      %cst_44 = arith.constant 0.353553385 : f32
      %48 = vector.broadcast %cst_44 : f32 to vector<8x32xf32>
      %49 = arith.mulf %47, %48 : vector<8x32xf32>
      %50 = vector.extract_strided_slice %49 {offsets = [0, 0], sizes = [8, 8], strides = [1, 1]} : vector<8x32xf32> to vector<8x8xf32>
      %51 = arith.truncf %50 : vector<8x8xf32> to vector<8x8xbf16>
      %c0_45 = arith.constant 0 : index
      %c0_46 = arith.constant 0 : index
      %c0_47 = arith.constant 0 : index
      %52 = vector.load %arg11[%c0_45, %c0_46, %c0_47] : memref<4x8x8xbf16, #tpu.memory_space<vmem>>, vector<1x8x8xbf16>
      %53 = vector.shape_cast %52 : vector<1x8x8xbf16> to vector<8x8xbf16>
      %54 = vector.shape_cast %51 : vector<8x8xbf16> to vector<1x8x8xbf16>
      tpu.vector_store %arg11[%c0_45, %c0_46, %c0_47], %54 {strides = array<i32>} : memref<4x8x8xbf16, #tpu.memory_space<vmem>>, vector<1x8x8xbf16>,
      %55 = vector.extract_strided_slice %49 {offsets = [0, 8], sizes = [8, 8], strides = [1, 1]} : vector<8x32xf32> to vector<8x8xf32>
      %56 = arith.truncf %55 : vector<8x8xf32> to vector<8x8xbf16>
      %c1 = arith.constant 1 : index
      %c0_48 = arith.constant 0 : index
      %c0_49 = arith.constant 0 : index
      %57 = vector.load %arg11[%c1, %c0_48, %c0_49] : memref<4x8x8xbf16, #tpu.memory_space<vmem>>, vector<1x8x8xbf16>
      %58 = vector.shape_cast %57 : vector<1x8x8xbf16> to vector<8x8xbf16>
      %59 = vector.shape_cast %56 : vector<8x8xbf16> to vector<1x8x8xbf16>
      tpu.vector_store %arg11[%c1, %c0_48, %c0_49], %59 {strides = array<i32>} : memref<4x8x8xbf16, #tpu.memory_space<vmem>>, vector<1x8x8xbf16>,
      %60 = vector.extract_strided_slice %49 {offsets = [0, 16], sizes = [8, 8], strides = [1, 1]} : vector<8x32xf32> to vector<8x8xf32>
      %61 = arith.truncf %60 : vector<8x8xf32> to vector<8x8xbf16>
      %c2 = arith.constant 2 : index
      %c0_50 = arith.constant 0 : index
      %c0_51 = arith.constant 0 : index
      %62 = vector.load %arg11[%c2, %c0_50, %c0_51] : memref<4x8x8xbf16, #tpu.memory_space<vmem>>, vector<1x8x8xbf16>
      %63 = vector.shape_cast %62 : vector<1x8x8xbf16> to vector<8x8xbf16>
      %64 = vector.shape_cast %61 : vector<8x8xbf16> to vector<1x8x8xbf16>
      tpu.vector_store %arg11[%c2, %c0_50, %c0_51], %64 {strides = array<i32>} : memref<4x8x8xbf16, #tpu.memory_space<vmem>>, vector<1x8x8xbf16>,
      %65 = vector.extract_strided_slice %49 {offsets = [0, 24], sizes = [8, 8], strides = [1, 1]} : vector<8x32xf32> to vector<8x8xf32>
      %66 = arith.truncf %65 : vector<8x8xf32> to vector<8x8xbf16>
      %c3 = arith.constant 3 : index
      %c0_52 = arith.constant 0 : index
      %c0_53 = arith.constant 0 : index
      %67 = vector.load %arg11[%c3, %c0_52, %c0_53] : memref<4x8x8xbf16, #tpu.memory_space<vmem>>, vector<1x8x8xbf16>
      %68 = vector.shape_cast %67 : vector<1x8x8xbf16> to vector<8x8xbf16>
      %69 = vector.shape_cast %66 : vector<8x8xbf16> to vector<1x8x8xbf16>
      tpu.vector_store %arg11[%c3, %c0_52, %c0_53], %69 {strides = array<i32>} : memref<4x8x8xbf16, #tpu.memory_space<vmem>>, vector<1x8x8xbf16>,
      %cst_54 = arith.constant 0xFF800000 : f32
      %70 = vector.broadcast %cst_54 : f32 to vector<4x8x1xf32>
      %c0_55 = arith.constant 0 : index
      %c0_56 = arith.constant 0 : index
      %c0_57 = arith.constant 0 : index
      %71 = vector.load %arg12[%c0_55, %c0_56, %c0_57] : memref<4x8x1xf32, #tpu.memory_space<vmem>>, vector<4x8x1xf32>
      tpu.vector_store %arg12[%c0_55, %c0_56, %c0_57], %70 {strides = array<i32>} : memref<4x8x1xf32, #tpu.memory_space<vmem>>, vector<4x8x1xf32>,
      %cst_58 = arith.constant 0.000000e+00 : f32
      %72 = vector.broadcast %cst_58 : f32 to vector<4x8x1xf32>
      %c0_59 = arith.constant 0 : index
      %c0_60 = arith.constant 0 : index
      %c0_61 = arith.constant 0 : index
      %73 = vector.load %arg13[%c0_59, %c0_60, %c0_61] : memref<4x8x1xf32, #tpu.memory_space<vmem>>, vector<4x8x1xf32>
      tpu.vector_store %arg13[%c0_59, %c0_60, %c0_61], %72 {strides = array<i32>} : memref<4x8x1xf32, #tpu.memory_space<vmem>>, vector<4x8x1xf32>,
      %cst_62 = arith.constant 0.000000e+00 : f32
      %74 = vector.broadcast %cst_62 : f32 to vector<4x8x8xf32>
      %c0_63 = arith.constant 0 : index
      %c0_64 = arith.constant 0 : index
      %c0_65 = arith.constant 0 : index
      %75 = vector.load %arg14[%c0_63, %c0_64, %c0_65] : memref<4x8x8xf32, #tpu.memory_space<vmem>>, vector<4x8x8xf32>
      tpu.vector_store %arg14[%c0_63, %c0_64, %c0_65], %74 {strides = array<i32>} : memref<4x8x8xf32, #tpu.memory_space<vmem>>, vector<4x8x8xf32>,
    } else {
    }
    %c0 = arith.constant 0 : index
    %c0_1 = arith.constant 0 : index
    %c0_2 = arith.constant 0 : index
    %3 = vector.load %arg11[%c0, %c0_1, %c0_2] : memref<4x8x8xbf16, #tpu.memory_space<vmem>>, vector<4x8x8xbf16>
    %c0_3 = arith.constant 0 : index
    %c0_4 = arith.constant 0 : index
    %c0_5 = arith.constant 0 : index
    %c0_6 = arith.constant 0 : index
    %4 = vector.load %arg3[%c0_3, %c0_4, %c0_5, %c0_6] : memref<1x4x128x8xbf16, #tpu.memory_space<vmem>>, vector<1x4x128x8xbf16>
    %5 = vector.shape_cast %4 : vector<1x4x128x8xbf16> to vector<4x128x8xbf16>
    %c0_7 = arith.constant 0 : index
    %c0_8 = arith.constant 0 : index
    %c0_9 = arith.constant 0 : index
    %c0_10 = arith.constant 0 : index
    %6 = vector.load %arg4[%c0_7, %c0_8, %c0_9, %c0_10] : memref<1x4x128x8xbf16, #tpu.memory_space<vmem>>, vector<1x4x128x8xbf16>
    %7 = vector.shape_cast %6 : vector<1x4x128x8xbf16> to vector<4x128x8xbf16>
    %cst = arith.constant dense<0.000000e+00> : vector<4x8x128xf32>
    %8 = tpu.matmul %3, %5, %cst {dimension_numbers = #tpu.dot_dimension_numbers<[2], [2], [1], [1], [0, 0, 0, 1, 1, 1], [0], [0]>} : vector<4x8x8xbf16>, vector<4x128x8xbf16>, vector<4x8x128xf32> -> vector<4x8x128xf32>
    %c0_11 = arith.constant 0 : index
    %c0_12 = arith.constant 0 : index
    %c0_13 = arith.constant 0 : index
    %9 = vector.load %arg5[%c0_11, %c0_12, %c0_13] : memref<1x1x128xf32, #tpu.memory_space<vmem>>, vector<1x1x128xf32>
    %10 = vector.shape_cast %9 : vector<1x1x128xf32> to vector<1x128xf32>
    %11 = vector.shape_cast %10 : vector<1x128xf32> to vector<1x1x128xf32>
    %12 = vector.broadcast %11 : vector<1x1x128xf32> to vector<4x8x128xf32>
    %13 = arith.addf %8, %12 : vector<4x8x128xf32>
    %c0_14 = arith.constant 0 : index
    %c0_15 = arith.constant 0 : index
    %c0_16 = arith.constant 0 : index
    %14 = vector.load %arg12[%c0_14, %c0_15, %c0_16] : memref<4x8x1xf32, #tpu.memory_space<vmem>>, vector<4x8x1xf32>
    %cst_17 = arith.constant dense<0xFF800000> : vector<4x8xf32>
    %15 = vector.multi_reduction <maximumf>, %13, %cst_17 [2] : vector<4x8x128xf32> to vector<4x8xf32>
    %16 = vector.shape_cast %15 : vector<4x8xf32> to vector<4x8x1xf32>
    %17 = arith.maximumf %14, %16 : vector<4x8x1xf32>
    %18 = arith.subf %14, %17 : vector<4x8x1xf32>
    %19 = math.exp %18 : vector<4x8x1xf32>
    %20 = vector.broadcast %17 : vector<4x8x1xf32> to vector<4x8x128xf32>
    %21 = arith.subf %13, %20 : vector<4x8x128xf32>
    %22 = math.exp %21 : vector<4x8x128xf32>
    %c0_18 = arith.constant 0 : index
    %c0_19 = arith.constant 0 : index
    %c0_20 = arith.constant 0 : index
    %23 = vector.load %arg13[%c0_18, %c0_19, %c0_20] : memref<4x8x1xf32, #tpu.memory_space<vmem>>, vector<4x8x1xf32>
    %24 = arith.mulf %19, %23 : vector<4x8x1xf32>
    %cst_21 = arith.constant dense<0.000000e+00> : vector<4x8xf32>
    %25 = vector.multi_reduction <add>, %22, %cst_21 [2] : vector<4x8x128xf32> to vector<4x8xf32>
    %26 = vector.shape_cast %25 : vector<4x8xf32> to vector<4x8x1xf32>
    %27 = arith.addf %24, %26 : vector<4x8x1xf32>
    %c0_22 = arith.constant 0 : index
    %c0_23 = arith.constant 0 : index
    %c0_24 = arith.constant 0 : index
    %28 = vector.load %arg13[%c0_22, %c0_23, %c0_24] : memref<4x8x1xf32, #tpu.memory_space<vmem>>, vector<4x8x1xf32>
    tpu.vector_store %arg13[%c0_22, %c0_23, %c0_24], %27 {strides = array<i32>} : memref<4x8x1xf32, #tpu.memory_space<vmem>>, vector<4x8x1xf32>,
    %c0_25 = arith.constant 0 : index
    %c0_26 = arith.constant 0 : index
    %c0_27 = arith.constant 0 : index
    %29 = vector.load %arg14[%c0_25, %c0_26, %c0_27] : memref<4x8x8xf32, #tpu.memory_space<vmem>>, vector<4x8x8xf32>
    %30 = vector.broadcast %19 : vector<4x8x1xf32> to vector<4x8x8xf32>
    %31 = arith.mulf %30, %29 : vector<4x8x8xf32>
    %32 = arith.truncf %22 : vector<4x8x128xf32> to vector<4x8x128xbf16>
    %cst_28 = arith.constant dense<0.000000e+00> : vector<4x8x8xf32>
    %33 = tpu.matmul %32, %7, %cst_28 {dimension_numbers = #tpu.dot_dimension_numbers<[2], [1], [1], [2], [0, 0, 0, 1, 1, 2], [0], [0]>} : vector<4x8x128xbf16>, vector<4x128x8xbf16>, vector<4x8x8xf32> -> vector<4x8x8xf32>
    %34 = arith.addf %31, %33 : vector<4x8x8xf32>
    %c0_29 = arith.constant 0 : index
    %c0_30 = arith.constant 0 : index
    %c0_31 = arith.constant 0 : index
    %35 = vector.load %arg14[%c0_29, %c0_30, %c0_31] : memref<4x8x8xf32, #tpu.memory_space<vmem>>, vector<4x8x8xf32>
    tpu.vector_store %arg14[%c0_29, %c0_30, %c0_31], %34 {strides = array<i32>} : memref<4x8x8xf32, #tpu.memory_space<vmem>>, vector<4x8x8xf32>,
    %c0_32 = arith.constant 0 : index
    %c0_33 = arith.constant 0 : index
    %c0_34 = arith.constant 0 : index
    %36 = vector.load %arg12[%c0_32, %c0_33, %c0_34] : memref<4x8x1xf32, #tpu.memory_space<vmem>>, vector<4x8x1xf32>
    tpu.vector_store %arg12[%c0_32, %c0_33, %c0_34], %17 {strides = array<i32>} : memref<4x8x1xf32, #tpu.memory_space<vmem>>, vector<4x8x1xf32>,
    %c1_i32 = arith.constant 1 : i32
    %37 = arith.cmpi eq, %arg1, %c1_i32 : i32
    %38 = arith.extui %37 : i1 to i32
    %c0_i32_35 = arith.constant 0 : i32
    %39 = arith.cmpi ne, %38, %c0_i32_35 : i32
    scf.if %39 {
      %c0_36 = arith.constant 0 : index
      %c0_37 = arith.constant 0 : index
      %c0_38 = arith.constant 0 : index
      %40 = vector.load %arg13[%c0_36, %c0_37, %c0_38] : memref<4x8x1xf32, #tpu.memory_space<vmem>>, vector<4x8x1xf32>
      %41 = tpu.reciprocal %40 {approx = true} : vector<4x8x1xf32> -> vector<4x8x1xf32>
      %c0_39 = arith.constant 0 : index
      %c0_40 = arith.constant 0 : index
      %c0_41 = arith.constant 0 : index
      %42 = vector.load %arg14[%c0_39, %c0_40, %c0_41] : memref<4x8x8xf32, #tpu.memory_space<vmem>>, vector<4x8x8xf32>
      %43 = vector.broadcast %41 : vector<4x8x1xf32> to vector<4x8x8xf32>
      %44 = arith.mulf %42, %43 : vector<4x8x8xf32>
      %45 = vector.extract_strided_slice %44 {offsets = [0, 0, 0], sizes = [1, 8, 8], strides = [1, 1, 1]} : vector<4x8x8xf32> to vector<1x8x8xf32>
      %46 = vector.shape_cast %45 : vector<1x8x8xf32> to vector<8x8xf32>
      %47 = arith.truncf %46 : vector<8x8xf32> to vector<8x8xbf16>
      %c0_42 = arith.constant 0 : index
      %c0_43 = arith.constant 0 : index
      %48 = vector.load %arg15[%c0_42, %c0_43] : memref<8x32xbf16, #tpu.memory_space<vmem>>, vector<8x8xbf16>
      tpu.vector_store %arg15[%c0_42, %c0_43], %47 {strides = array<i32>} : memref<8x32xbf16, #tpu.memory_space<vmem>>, vector<8x8xbf16>,
      %49 = vector.extract_strided_slice %44 {offsets = [1, 0, 0], sizes = [1, 8, 8], strides = [1, 1, 1]} : vector<4x8x8xf32> to vector<1x8x8xf32>
      %50 = vector.shape_cast %49 : vector<1x8x8xf32> to vector<8x8xf32>
      %51 = arith.truncf %50 : vector<8x8xf32> to vector<8x8xbf16>
      %c0_44 = arith.constant 0 : index
      %c8 = arith.constant 8 : index
      %52 = vector.load %arg15[%c0_44, %c8] : memref<8x32xbf16, #tpu.memory_space<vmem>>, vector<8x8xbf16>
      tpu.vector_store %arg15[%c0_44, %c8], %51 {strides = array<i32>} : memref<8x32xbf16, #tpu.memory_space<vmem>>, vector<8x8xbf16>,
      %53 = vector.extract_strided_slice %44 {offsets = [2, 0, 0], sizes = [1, 8, 8], strides = [1, 1, 1]} : vector<4x8x8xf32> to vector<1x8x8xf32>
      %54 = vector.shape_cast %53 : vector<1x8x8xf32> to vector<8x8xf32>
      %55 = arith.truncf %54 : vector<8x8xf32> to vector<8x8xbf16>
      %c0_45 = arith.constant 0 : index
      %c16 = arith.constant 16 : index
      %56 = vector.load %arg15[%c0_45, %c16] : memref<8x32xbf16, #tpu.memory_space<vmem>>, vector<8x8xbf16>
      tpu.vector_store %arg15[%c0_45, %c16], %55 {strides = array<i32>} : memref<8x32xbf16, #tpu.memory_space<vmem>>, vector<8x8xbf16>,
      %57 = vector.extract_strided_slice %44 {offsets = [3, 0, 0], sizes = [1, 8, 8], strides = [1, 1, 1]} : vector<4x8x8xf32> to vector<1x8x8xf32>
      %58 = vector.shape_cast %57 : vector<1x8x8xf32> to vector<8x8xf32>
      %59 = arith.truncf %58 : vector<8x8xf32> to vector<8x8xbf16>
      %c0_46 = arith.constant 0 : index
      %c24 = arith.constant 24 : index
      %60 = vector.load %arg15[%c0_46, %c24] : memref<8x32xbf16, #tpu.memory_space<vmem>>, vector<8x8xbf16>
      tpu.vector_store %arg15[%c0_46, %c24], %59 {strides = array<i32>} : memref<8x32xbf16, #tpu.memory_space<vmem>>, vector<8x8xbf16>,
      %c0_47 = arith.constant 0 : index
      %c0_48 = arith.constant 0 : index
      %61 = vector.load %arg15[%c0_47, %c0_48] : memref<8x32xbf16, #tpu.memory_space<vmem>>, vector<8x32xbf16>
      %c0_49 = arith.constant 0 : index
      %c0_50 = arith.constant 0 : index
      %62 = vector.load %arg8[%c0_49, %c0_50] : memref<32x32xbf16, #tpu.memory_space<vmem>>, vector<32x32xbf16>
      %cst_51 = arith.constant dense<0.000000e+00> : vector<8x32xf32>
      %63 = tpu.matmul %61, %62, %cst_51 {dimension_numbers = #tpu.dot_dimension_numbers<[1], [0], [0], [1], [0, 0, 1, 1], [], []>} : vector<8x32xbf16>, vector<32x32xbf16>, vector<8x32xf32> -> vector<8x32xf32>
      %c0_52 = arith.constant 0 : index
      %c0_53 = arith.constant 0 : index
      %64 = vector.load %arg9[%c0_52, %c0_53] : memref<1x32xf32, #tpu.memory_space<vmem>>, vector<1x32xf32>
      %65 = vector.broadcast %64 : vector<1x32xf32> to vector<8x32xf32>
      %66 = arith.addf %63, %65 : vector<8x32xf32>
      %67 = vector.shape_cast %66 : vector<8x32xf32> to vector<1x8x32xf32>
      %c0_54 = arith.constant 0 : index
      %c0_55 = arith.constant 0 : index
      %c0_56 = arith.constant 0 : index
      %68 = vector.load %arg10[%c0_54, %c0_55, %c0_56] : memref<1x8x32xf32, #tpu.memory_space<vmem>>, vector<1x8x32xf32>
      tpu.vector_store %arg10[%c0_54, %c0_55, %c0_56], %67 {strides = array<i32>} : memref<1x8x32xf32, #tpu.memory_space<vmem>>, vector<1x8x32xf32>,
    } else {
    }
    return
  }
  func.func @transform_0(%arg0: i32, %arg1: i32) -> (i32, i32, i32) {
    %c0_i32 = arith.constant 0 : i32
    %c0_i32_0 = arith.constant 0 : i32
    %c0_i32_1 = arith.constant 0 : i32
    return %arg0, %c0_i32, %c0_i32_0 : i32, i32, i32
  }
  func.func @transform_1(%arg0: i32, %arg1: i32) -> (i32, i32, i32, i32) {
    %c0_i32 = arith.constant 0 : i32
    %c0_i32_0 = arith.constant 0 : i32
    %c0_i32_1 = arith.constant 0 : i32
    return %arg0, %c0_i32, %arg1, %c0_i32_0 : i32, i32, i32, i32
  }
  func.func @transform_2(%arg0: i32, %arg1: i32) -> (i32, i32, i32, i32) {
    %c0_i32 = arith.constant 0 : i32
    %c0_i32_0 = arith.constant 0 : i32
    %c0_i32_1 = arith.constant 0 : i32
    return %arg0, %c0_i32, %arg1, %c0_i32_0 : i32, i32, i32, i32
  }
  func.func @transform_3(%arg0: i32, %arg1: i32) -> (i32, i32, i32) {
    %c0_i32 = arith.constant 0 : i32
    %c0_i32_0 = arith.constant 0 : i32
    return %arg0, %c0_i32, %arg1 : i32, i32, i32
  }
  func.func @transform_4(%arg0: i32, %arg1: i32) -> (i32, i32) {
    %c0_i32 = arith.constant 0 : i32
    %c0_i32_0 = arith.constant 0 : i32
    %c0_i32_1 = arith.constant 0 : i32
    return %c0_i32, %c0_i32_0 : i32, i32
  }
  func.func @transform_5(%arg0: i32, %arg1: i32) -> (i32, i32) {
    %c0_i32 = arith.constant 0 : i32
    %c0_i32_0 = arith.constant 0 : i32
    %c0_i32_1 = arith.constant 0 : i32
    return %c0_i32, %c0_i32_0 : i32, i32
  }
  func.func @transform_6(%arg0: i32, %arg1: i32) -> (i32, i32) {
    %c0_i32 = arith.constant 0 : i32
    %c0_i32_0 = arith.constant 0 : i32
    %c0_i32_1 = arith.constant 0 : i32
    return %c0_i32, %c0_i32_0 : i32, i32
  }
  func.func @transform_7(%arg0: i32, %arg1: i32) -> (i32, i32) {
    %c0_i32 = arith.constant 0 : i32
    %c0_i32_0 = arith.constant 0 : i32
    %c0_i32_1 = arith.constant 0 : i32
    return %c0_i32, %c0_i32_0 : i32, i32
  }
  func.func @transform_8(%arg0: i32, %arg1: i32) -> (i32, i32, i32) {
    %c0_i32 = arith.constant 0 : i32
    %c0_i32_0 = arith.constant 0 : i32
    %c0_i32_1 = arith.constant 0 : i32
    return %arg0, %c0_i32, %c0_i32_0 : i32, i32, i32
  }
}

module attributes {stable_mosaic.version = 11 : i64} {
  func.func @_cross_attn_kernel(%arg0: i32, %arg1: i32, %arg2: memref<1x8x32xf32, #tpu.memory_space<vmem>>, %arg3: memref<1x4x128x8xbf16, #tpu.memory_space<vmem>>, %arg4: memref<1x4x128x8xbf16, #tpu.memory_space<vmem>>, %arg5: memref<1x1x128xf32, #tpu.memory_space<vmem>>, %arg6: memref<32x32xbf16, #tpu.memory_space<vmem>>, %arg7: memref<1x32xf32, #tpu.memory_space<vmem>>, %arg8: memref<32x32xbf16, #tpu.memory_space<vmem>>, %arg9: memref<1x32xf32, #tpu.memory_space<vmem>>, %arg10: memref<1x8x32xf32, #tpu.memory_space<vmem>>, %arg11: memref<4x8x8xbf16, #tpu.memory_space<vmem>>, %arg12: memref<4x8x1xf32, #tpu.memory_space<vmem>>, %arg13: memref<4x8x1xf32, #tpu.memory_space<vmem>>, %arg14: memref<4x8x8xf32, #tpu.memory_space<vmem>>, %arg15: memref<8x32xbf16, #tpu.memory_space<vmem>>) attributes {dimension_semantics = [#tpu.dimension_semantics<parallel>, #tpu.dimension_semantics<arbitrary>], iteration_bounds = array<i64: 2, 2>, scalar_prefetch = 0 : i64, scratch_operands = 5 : i64, tpu.core_type = #tpu.core_type<tc>, window_params = [{transform_indices = @transform_0, window_bounds = array<i64: 1, 8, 32>}, {transform_indices = @transform_1, window_bounds = array<i64: 1, 4, 128, 8>}, {transform_indices = @transform_2, window_bounds = array<i64: 1, 4, 128, 8>}, {transform_indices = @transform_3, window_bounds = array<i64: 1, 1, 128>}, {pipeline_mode = #tpu.pipeline_mode<synchronous>, transform_indices = @transform_4, window_bounds = array<i64: 32, 32>}, {pipeline_mode = #tpu.pipeline_mode<synchronous>, transform_indices = @transform_5, window_bounds = array<i64: 1, 32>}, {pipeline_mode = #tpu.pipeline_mode<synchronous>, transform_indices = @transform_6, window_bounds = array<i64: 32, 32>}, {pipeline_mode = #tpu.pipeline_mode<synchronous>, transform_indices = @transform_7, window_bounds = array<i64: 1, 32>}, {transform_indices = @transform_8, window_bounds = array<i64: 1, 8, 32>}]} {
    %c0_i32 = arith.constant 0 : i32
    %0 = arith.cmpi eq, %arg1, %c0_i32 : i32
    %1 = arith.extui %0 : i1 to i32
    %c0_i32_0 = arith.constant 0 : i32
    %2 = arith.cmpi ne, %1, %c0_i32_0 : i32
    scf.if %2 {
      %c0_36 = arith.constant 0 : index
      %c0_37 = arith.constant 0 : index
      %c0_38 = arith.constant 0 : index
      %40 = vector.load %arg2[%c0_36, %c0_37, %c0_38] : memref<1x8x32xf32, #tpu.memory_space<vmem>>, vector<1x8x32xf32>
      %41 = vector.shape_cast %40 : vector<1x8x32xf32> to vector<8x32xf32>
      %42 = arith.truncf %41 : vector<8x32xf32> to vector<8x32xbf16>
      %c0_39 = arith.constant 0 : index
      %c0_40 = arith.constant 0 : index
      %43 = vector.load %arg6[%c0_39, %c0_40] : memref<32x32xbf16, #tpu.memory_space<vmem>>, vector<32x32xbf16>
      %cst_41 = arith.constant dense<0.000000e+00> : vector<8x32xf32>
      %44 = tpu.matmul %42, %43, %cst_41 {dimension_numbers = #tpu.dot_dimension_numbers<[1], [0], [0], [1], [0, 0, 1, 1], [], []>} : vector<8x32xbf16>, vector<32x32xbf16>, vector<8x32xf32> -> vector<8x32xf32>
      %c0_42 = arith.constant 0 : index
      %c0_43 = arith.constant 0 : index
      %45 = vector.load %arg7[%c0_42, %c0_43] : memref<1x32xf32, #tpu.memory_space<vmem>>, vector<1x32xf32>
      %46 = vector.broadcast %45 : vector<1x32xf32> to vector<8x32xf32>
      %47 = arith.addf %44, %46 : vector<8x32xf32>
      %cst_44 = arith.constant 0.353553385 : f32
      %48 = vector.broadcast %cst_44 : f32 to vector<8x32xf32>
      %49 = arith.mulf %47, %48 : vector<8x32xf32>
      %50 = vector.extract_strided_slice %49 {offsets = [0, 0], sizes = [8, 8], strides = [1, 1]} : vector<8x32xf32> to vector<8x8xf32>
      %51 = arith.truncf %50 : vector<8x8xf32> to vector<8x8xbf16>
      %c0_45 = arith.constant 0 : index
      %c0_46 = arith.constant 0 : index
      %c0_47 = arith.constant 0 : index
      %52 = vector.load %arg11[%c0_45, %c0_46, %c0_47] : memref<4x8x8xbf16, #tpu.memory_space<vmem>>, vector<1x8x8xbf16>
      %53 = vector.shape_cast %52 : vector<1x8x8xbf16> to vector<8x8xbf16>
      %54 = vector.shape_cast %51 : vector<8x8xbf16> to vector<1x8x8xbf16>
      tpu.vector_store %arg11[%c0_45, %c0_46, %c0_47], %54 {strides = array<i32>} : memref<4x8x8xbf16, #tpu.memory_space<vmem>>, vector<1x8x8xbf16>,
      %55 = vector.extract_strided_slice %49 {offsets = [0, 8], sizes = [8, 8], strides = [1, 1]} : vector<8x32xf32> to vector<8x8xf32>
      %56 = arith.truncf %55 : vector<8x8xf32> to vector<8x8xbf16>
      %c1 = arith.constant 1 : index
      %c0_48 = arith.constant 0 : index
      %c0_49 = arith.constant 0 : index
      %57 = vector.load %arg11[%c1, %c0_48, %c0_49] : memref<4x8x8xbf16, #tpu.memory_space<vmem>>, vector<1x8x8xbf16>
      %58 = vector.shape_cast %57 : vector<1x8x8xbf16> to vector<8x8xbf16>
      %59 = vector.shape_cast %56 : vector<8x8xbf16> to vector<1x8x8xbf16>
      tpu.vector_store %arg11[%c1, %c0_48, %c0_49], %59 {strides = array<i32>} : memref<4x8x8xbf16, #tpu.memory_space<vmem>>, vector<1x8x8xbf16>,
      %60 = vector.extract_strided_slice %49 {offsets = [0, 16], sizes = [8, 8], strides = [1, 1]} : vector<8x32xf32> to vector<8x8xf32>
      %61 = arith.truncf %60 : vector<8x8xf32> to vector<8x8xbf16>
      %c2 = arith.constant 2 : index
      %c0_50 = arith.constant 0 : index
      %c0_51 = arith.constant 0 : index
      %62 = vector.load %arg11[%c2, %c0_50, %c0_51] : memref<4x8x8xbf16, #tpu.memory_space<vmem>>, vector<1x8x8xbf16>
      %63 = vector.shape_cast %62 : vector<1x8x8xbf16> to vector<8x8xbf16>
      %64 = vector.shape_cast %61 : vector<8x8xbf16> to vector<1x8x8xbf16>
      tpu.vector_store %arg11[%c2, %c0_50, %c0_51], %64 {strides = array<i32>} : memref<4x8x8xbf16, #tpu.memory_space<vmem>>, vector<1x8x8xbf16>,
      %65 = vector.extract_strided_slice %49 {offsets = [0, 24], sizes = [8, 8], strides = [1, 1]} : vector<8x32xf32> to vector<8x8xf32>
      %66 = arith.truncf %65 : vector<8x8xf32> to vector<8x8xbf16>
      %c3 = arith.constant 3 : index
      %c0_52 = arith.constant 0 : index
      %c0_53 = arith.constant 0 : index
      %67 = vector.load %arg11[%c3, %c0_52, %c0_53] : memref<4x8x8xbf16, #tpu.memory_space<vmem>>, vector<1x8x8xbf16>
      %68 = vector.shape_cast %67 : vector<1x8x8xbf16> to vector<8x8xbf16>
      %69 = vector.shape_cast %66 : vector<8x8xbf16> to vector<1x8x8xbf16>
      tpu.vector_store %arg11[%c3, %c0_52, %c0_53], %69 {strides = array<i32>} : memref<4x8x8xbf16, #tpu.memory_space<vmem>>, vector<1x8x8xbf16>,
      %cst_54 = arith.constant 0xFF800000 : f32
      %70 = vector.broadcast %cst_54 : f32 to vector<4x8x1xf32>
      %c0_55 = arith.constant 0 : index
      %c0_56 = arith.constant 0 : index
      %c0_57 = arith.constant 0 : index
      %71 = vector.load %arg12[%c0_55, %c0_56, %c0_57] : memref<4x8x1xf32, #tpu.memory_space<vmem>>, vector<4x8x1xf32>
      tpu.vector_store %arg12[%c0_55, %c0_56, %c0_57], %70 {strides = array<i32>} : memref<4x8x1xf32, #tpu.memory_space<vmem>>, vector<4x8x1xf32>,
      %cst_58 = arith.constant 0.000000e+00 : f32
      %72 = vector.broadcast %cst_58 : f32 to vector<4x8x1xf32>
      %c0_59 = arith.constant 0 : index
      %c0_60 = arith.constant 0 : index
      %c0_61 = arith.constant 0 : index
      %73 = vector.load %arg13[%c0_59, %c0_60, %c0_61] : memref<4x8x1xf32, #tpu.memory_space<vmem>>, vector<4x8x1xf32>
      tpu.vector_store %arg13[%c0_59, %c0_60, %c0_61], %72 {strides = array<i32>} : memref<4x8x1xf32, #tpu.memory_space<vmem>>, vector<4x8x1xf32>,
      %cst_62 = arith.constant 0.000000e+00 : f32
      %74 = vector.broadcast %cst_62 : f32 to vector<4x8x8xf32>
      %c0_63 = arith.constant 0 : index
      %c0_64 = arith.constant 0 : index
      %c0_65 = arith.constant 0 : index
      %75 = vector.load %arg14[%c0_63, %c0_64, %c0_65] : memref<4x8x8xf32, #tpu.memory_space<vmem>>, vector<4x8x8xf32>
      tpu.vector_store %arg14[%c0_63, %c0_64, %c0_65], %74 {strides = array<i32>} : memref<4x8x8xf32, #tpu.memory_space<vmem>>, vector<4x8x8xf32>,
    } else {
    }
    %c0 = arith.constant 0 : index
    %c0_1 = arith.constant 0 : index
    %c0_2 = arith.constant 0 : index
    %3 = vector.load %arg11[%c0, %c0_1, %c0_2] : memref<4x8x8xbf16, #tpu.memory_space<vmem>>, vector<4x8x8xbf16>
    %c0_3 = arith.constant 0 : index
    %c0_4 = arith.constant 0 : index
    %c0_5 = arith.constant 0 : index
    %c0_6 = arith.constant 0 : index
    %4 = vector.load %arg3[%c0_3, %c0_4, %c0_5, %c0_6] : memref<1x4x128x8xbf16, #tpu.memory_space<vmem>>, vector<1x4x128x8xbf16>
    %5 = vector.shape_cast %4 : vector<1x4x128x8xbf16> to vector<4x128x8xbf16>
    %c0_7 = arith.constant 0 : index
    %c0_8 = arith.constant 0 : index
    %c0_9 = arith.constant 0 : index
    %c0_10 = arith.constant 0 : index
    %6 = vector.load %arg4[%c0_7, %c0_8, %c0_9, %c0_10] : memref<1x4x128x8xbf16, #tpu.memory_space<vmem>>, vector<1x4x128x8xbf16>
    %7 = vector.shape_cast %6 : vector<1x4x128x8xbf16> to vector<4x128x8xbf16>
    %cst = arith.constant dense<0.000000e+00> : vector<4x8x128xf32>
    %8 = tpu.matmul %3, %5, %cst {dimension_numbers = #tpu.dot_dimension_numbers<[2], [2], [1], [1], [0, 0, 0, 1, 1, 1], [0], [0]>} : vector<4x8x8xbf16>, vector<4x128x8xbf16>, vector<4x8x128xf32> -> vector<4x8x128xf32>
    %c0_11 = arith.constant 0 : index
    %c0_12 = arith.constant 0 : index
    %c0_13 = arith.constant 0 : index
    %9 = vector.load %arg5[%c0_11, %c0_12, %c0_13] : memref<1x1x128xf32, #tpu.memory_space<vmem>>, vector<1x1x128xf32>
    %10 = vector.shape_cast %9 : vector<1x1x128xf32> to vector<1x128xf32>
    %11 = vector.shape_cast %10 : vector<1x128xf32> to vector<1x1x128xf32>
    %12 = vector.broadcast %11 : vector<1x1x128xf32> to vector<4x8x128xf32>
    %13 = arith.addf %8, %12 : vector<4x8x128xf32>
    %c0_14 = arith.constant 0 : index
    %c0_15 = arith.constant 0 : index
    %c0_16 = arith.constant 0 : index
    %14 = vector.load %arg12[%c0_14, %c0_15, %c0_16] : memref<4x8x1xf32, #tpu.memory_space<vmem>>, vector<4x8x1xf32>
    %cst_17 = arith.constant dense<0xFF800000> : vector<4x8xf32>
    %15 = vector.multi_reduction <maximumf>, %13, %cst_17 [2] : vector<4x8x128xf32> to vector<4x8xf32>
    %16 = vector.shape_cast %15 : vector<4x8xf32> to vector<4x8x1xf32>
    %17 = arith.maximumf %14, %16 : vector<4x8x1xf32>
    %18 = arith.subf %14, %17 : vector<4x8x1xf32>
    %19 = math.exp %18 : vector<4x8x1xf32>
    %20 = vector.broadcast %17 : vector<4x8x1xf32> to vector<4x8x128xf32>
    %21 = arith.subf %13, %20 : vector<4x8x128xf32>
    %22 = math.exp %21 : vector<4x8x128xf32>
    %c0_18 = arith.constant 0 : index
    %c0_19 = arith.constant 0 : index
    %c0_20 = arith.constant 0 : index
    %23 = vector.load %arg13[%c0_18, %c0_19, %c0_20] : memref<4x8x1xf32, #tpu.memory_space<vmem>>, vector<4x8x1xf32>
    %24 = arith.mulf %19, %23 : vector<4x8x1xf32>
    %cst_21 = arith.constant dense<0.000000e+00> : vector<4x8xf32>
    %25 = vector.multi_reduction <add>, %22, %cst_21 [2] : vector<4x8x128xf32> to vector<4x8xf32>
    %26 = vector.shape_cast %25 : vector<4x8xf32> to vector<4x8x1xf32>
    %27 = arith.addf %24, %26 : vector<4x8x1xf32>
    %c0_22 = arith.constant 0 : index
    %c0_23 = arith.constant 0 : index
    %c0_24 = arith.constant 0 : index
    %28 = vector.load %arg13[%c0_22, %c0_23, %c0_24] : memref<4x8x1xf32, #tpu.memory_space<vmem>>, vector<4x8x1xf32>
    tpu.vector_store %arg13[%c0_22, %c0_23, %c0_24], %27 {strides = array<i32>} : memref<4x8x1xf32, #tpu.memory_space<vmem>>, vector<4x8x1xf32>,
    %c0_25 = arith.constant 0 : index
    %c0_26 = arith.constant 0 : index
    %c0_27 = arith.constant 0 : index
    %29 = vector.load %arg14[%c0_25, %c0_26, %c0_27] : memref<4x8x8xf32, #tpu.memory_space<vmem>>, vector<4x8x8xf32>
    %30 = vector.broadcast %19 : vector<4x8x1xf32> to vector<4x8x8xf32>
    %31 = arith.mulf %30, %29 : vector<4x8x8xf32>
    %32 = arith.truncf %22 : vector<4x8x128xf32> to vector<4x8x128xbf16>
    %cst_28 = arith.constant dense<0.000000e+00> : vector<4x8x8xf32>
    %33 = tpu.matmul %32, %7, %cst_28 {dimension_numbers = #tpu.dot_dimension_numbers<[2], [1], [1], [2], [0, 0, 0, 1, 1, 2], [0], [0]>} : vector<4x8x128xbf16>, vector<4x128x8xbf16>, vector<4x8x8xf32> -> vector<4x8x8xf32>
    %34 = arith.addf %31, %33 : vector<4x8x8xf32>
    %c0_29 = arith.constant 0 : index
    %c0_30 = arith.constant 0 : index
    %c0_31 = arith.constant 0 : index
    %35 = vector.load %arg14[%c0_29, %c0_30, %c0_31] : memref<4x8x8xf32, #tpu.memory_space<vmem>>, vector<4x8x8xf32>
    tpu.vector_store %arg14[%c0_29, %c0_30, %c0_31], %34 {strides = array<i32>} : memref<4x8x8xf32, #tpu.memory_space<vmem>>, vector<4x8x8xf32>,
    %c0_32 = arith.constant 0 : index
    %c0_33 = arith.constant 0 : index
    %c0_34 = arith.constant 0 : index
    %36 = vector.load %arg12[%c0_32, %c0_33, %c0_34] : memref<4x8x1xf32, #tpu.memory_space<vmem>>, vector<4x8x1xf32>
    tpu.vector_store %arg12[%c0_32, %c0_33, %c0_34], %17 {strides = array<i32>} : memref<4x8x1xf32, #tpu.memory_space<vmem>>, vector<4x8x1xf32>,
    %c1_i32 = arith.constant 1 : i32
    %37 = arith.cmpi eq, %arg1, %c1_i32 : i32
    %38 = arith.extui %37 : i1 to i32
    %c0_i32_35 = arith.constant 0 : i32
    %39 = arith.cmpi ne, %38, %c0_i32_35 : i32
    scf.if %39 {
      %c0_36 = arith.constant 0 : index
      %c0_37 = arith.constant 0 : index
      %c0_38 = arith.constant 0 : index
      %40 = vector.load %arg13[%c0_36, %c0_37, %c0_38] : memref<4x8x1xf32, #tpu.memory_space<vmem>>, vector<4x8x1xf32>
      %41 = tpu.reciprocal %40 {approx = true} : vector<4x8x1xf32> -> vector<4x8x1xf32>
      %c0_39 = arith.constant 0 : index
      %c0_40 = arith.constant 0 : index
      %c0_41 = arith.constant 0 : index
      %42 = vector.load %arg14[%c0_39, %c0_40, %c0_41] : memref<4x8x8xf32, #tpu.memory_space<vmem>>, vector<4x8x8xf32>
      %43 = vector.broadcast %41 : vector<4x8x1xf32> to vector<4x8x8xf32>
      %44 = arith.mulf %42, %43 : vector<4x8x8xf32>
      %45 = vector.extract_strided_slice %44 {offsets = [0, 0, 0], sizes = [1, 8, 8], strides = [1, 1, 1]} : vector<4x8x8xf32> to vector<1x8x8xf32>
      %46 = vector.shape_cast %45 : vector<1x8x8xf32> to vector<8x8xf32>
      %47 = arith.truncf %46 : vector<8x8xf32> to vector<8x8xbf16>
      %c0_42 = arith.constant 0 : index
      %c0_43 = arith.constant 0 : index
      %48 = vector.load %arg15[%c0_42, %c0_43] : memref<8x32xbf16, #tpu.memory_space<vmem>>, vector<8x8xbf16>
      tpu.vector_store %arg15[%c0_42, %c0_43], %47 {strides = array<i32>} : memref<8x32xbf16, #tpu.memory_space<vmem>>, vector<8x8xbf16>,
      %49 = vector.extract_strided_slice %44 {offsets = [1, 0, 0], sizes = [1, 8, 8], strides = [1, 1, 1]} : vector<4x8x8xf32> to vector<1x8x8xf32>
      %50 = vector.shape_cast %49 : vector<1x8x8xf32> to vector<8x8xf32>
      %51 = arith.truncf %50 : vector<8x8xf32> to vector<8x8xbf16>
      %c0_44 = arith.constant 0 : index
      %c8 = arith.constant 8 : index
      %52 = vector.load %arg15[%c0_44, %c8] : memref<8x32xbf16, #tpu.memory_space<vmem>>, vector<8x8xbf16>
      tpu.vector_store %arg15[%c0_44, %c8], %51 {strides = array<i32>} : memref<8x32xbf16, #tpu.memory_space<vmem>>, vector<8x8xbf16>,
      %53 = vector.extract_strided_slice %44 {offsets = [2, 0, 0], sizes = [1, 8, 8], strides = [1, 1, 1]} : vector<4x8x8xf32> to vector<1x8x8xf32>
      %54 = vector.shape_cast %53 : vector<1x8x8xf32> to vector<8x8xf32>
      %55 = arith.truncf %54 : vector<8x8xf32> to vector<8x8xbf16>
      %c0_45 = arith.constant 0 : index
      %c16 = arith.constant 16 : index
      %56 = vector.load %arg15[%c0_45, %c16] : memref<8x32xbf16, #tpu.memory_space<vmem>>, vector<8x8xbf16>
      tpu.vector_store %arg15[%c0_45, %c16], %55 {strides = array<i32>} : memref<8x32xbf16, #tpu.memory_space<vmem>>, vector<8x8xbf16>,
      %57 = vector.extract_strided_slice %44 {offsets = [3, 0, 0], sizes = [1, 8, 8], strides = [1, 1, 1]} : vector<4x8x8xf32> to vector<1x8x8xf32>
      %58 = vector.shape_cast %57 : vector<1x8x8xf32> to vector<8x8xf32>
      %59 = arith.truncf %58 : vector<8x8xf32> to vector<8x8xbf16>
      %c0_46 = arith.constant 0 : index
      %c24 = arith.constant 24 : index
      %60 = vector.load %arg15[%c0_46, %c24] : memref<8x32xbf16, #tpu.memory_space<vmem>>, vector<8x8xbf16>
      tpu.vector_store %arg15[%c0_46, %c24], %59 {strides = array<i32>} : memref<8x32xbf16, #tpu.memory_space<vmem>>, vector<8x8xbf16>,
      %c0_47 = arith.constant 0 : index
      %c0_48 = arith.constant 0 : index
      %61 = vector.load %arg15[%c0_47, %c0_48] : memref<8x32xbf16, #tpu.memory_space<vmem>>, vector<8x32xbf16>
      %c0_49 = arith.constant 0 : index
      %c0_50 = arith.constant 0 : index
      %62 = vector.load %arg8[%c0_49, %c0_50] : memref<32x32xbf16, #tpu.memory_space<vmem>>, vector<32x32xbf16>
      %cst_51 = arith.constant dense<0.000000e+00> : vector<8x32xf32>
      %63 = tpu.matmul %61, %62, %cst_51 {dimension_numbers = #tpu.dot_dimension_numbers<[1], [0], [0], [1], [0, 0, 1, 1], [], []>} : vector<8x32xbf16>, vector<32x32xbf16>, vector<8x32xf32> -> vector<8x32xf32>
      %c0_52 = arith.constant 0 : index
      %c0_53 = arith.constant 0 : index
      %64 = vector.load %arg9[%c0_52, %c0_53] : memref<1x32xf32, #tpu.memory_space<vmem>>, vector<1x32xf32>
      %65 = vector.broadcast %64 : vector<1x32xf32> to vector<8x32xf32>
      %66 = arith.addf %63, %65 : vector<8x32xf32>
      %67 = vector.shape_cast %66 : vector<8x32xf32> to vector<1x8x32xf32>
      %c0_54 = arith.constant 0 : index
      %c0_55 = arith.constant 0 : index
      %c0_56 = arith.constant 0 : index
      %68 = vector.load %arg10[%c0_54, %c0_55, %c0_56] : memref<1x8x32xf32, #tpu.memory_space<vmem>>, vector<1x8x32xf32>
      tpu.vector_store %arg10[%c0_54, %c0_55, %c0_56], %67 {strides = array<i32>} : memref<1x8x32xf32, #tpu.memory_space<vmem>>, vector<1x8x32xf32>,
    } else {
    }
    return
  }
  func.func @transform_0(%arg0: i32, %arg1: i32) -> (i32, i32, i32) {
    %c0_i32 = arith.constant 0 : i32
    %c0_i32_0 = arith.constant 0 : i32
    %c0_i32_1 = arith.constant 0 : i32
    return %arg0, %c0_i32, %c0_i32_0 : i32, i32, i32
  }
  func.func @transform_1(%arg0: i32, %arg1: i32) -> (i32, i32, i32, i32) {
    %c0_i32 = arith.constant 0 : i32
    %c0_i32_0 = arith.constant 0 : i32
    %c0_i32_1 = arith.constant 0 : i32
    return %arg0, %c0_i32, %arg1, %c0_i32_0 : i32, i32, i32, i32
  }
  func.func @transform_2(%arg0: i32, %arg1: i32) -> (i32, i32, i32, i32) {
    %c0_i32 = arith.constant 0 : i32
    %c0_i32_0 = arith.constant 0 : i32
    %c0_i32_1 = arith.constant 0 : i32
    return %arg0, %c0_i32, %arg1, %c0_i32_0 : i32, i32, i32, i32
  }
  func.func @transform_3(%arg0: i32, %arg1: i32) -> (i32, i32, i32) {
    %c0_i32 = arith.constant 0 : i32
    %c0_i32_0 = arith.constant 0 : i32
    return %arg0, %c0_i32, %arg1 : i32, i32, i32
  }
  func.func @transform_4(%arg0: i32, %arg1: i32) -> (i32, i32) {
    %c0_i32 = arith.constant 0 : i32
    %c0_i32_0 = arith.constant 0 : i32
    %c0_i32_1 = arith.constant 0 : i32
    return %c0_i32, %c0_i32_0 : i32, i32
  }
  func.func @transform_5(%arg0: i32, %arg1: i32) -> (i32, i32) {
    %c0_i32 = arith.constant 0 : i32
    %c0_i32_0 = arith.constant 0 : i32
    %c0_i32_1 = arith.constant 0 : i32
    return %c0_i32, %c0_i32_0 : i32, i32
  }
  func.func @transform_6(%arg0: i32, %arg1: i32) -> (i32, i32) {
    %c0_i32 = arith.constant 0 : i32
    %c0_i32_0 = arith.constant 0 : i32
    %c0_i32_1 = arith.constant 0 : i32
    return %c0_i32, %c0_i32_0 : i32, i32
  }
  func.func @transform_7(%arg0: i32, %arg1: i32) -> (i32, i32) {
    %c0_i32 = arith.constant 0 : i32
    %c0_i32_0 = arith.constant 0 : i32
    %c0_i32_1 = arith.constant 0 : i32
    return %c0_i32, %c0_i32_0 : i32, i32
  }
  func.func @transform_8(%arg0: i32, %arg1: i32) -> (i32, i32, i32) {
    %c0_i32 = arith.constant 0 : i32
    %c0_i32_0 = arith.constant 0 : i32
    %c0_i32_1 = arith.constant 0 : i32
    return %arg0, %c0_i32, %c0_i32_0 : i32, i32, i32
  }
}

</mosaic_0001>

<bundles_post_ra>
// kernel: tpu_custom_call.1
= control target key start
LH: loop header
LB: loop body
LE: loop exit
PB: predicated region body
PF: predicated region fallthrough
CT: control target
= control target key end

     0   :  { %s3748_s0 = inlined_call_operand.vmem [shape: f32[2,8,32], index: 0, kind: input, shape index: {}]   ;;  %s3749_s1 = inlined_call_operand.vmem [shape: bf16[2,4,256,8], index: 1, kind: input, shape index: {}]   ;;  %s3750_s2 = inlined_call_operand.vmem [shape: bf16[2,4,256,8], index: 2, kind: input, shape index: {}]   ;;  %s3751_s3 = inlined_call_operand.vmem [shape: f32[2,1,256], index: 3, kind: input, shape index: {}]   ;;  %s3752_s4 = inlined_call_operand.vmem [shape: bf16[32,32], index: 4, kind: input, shape index: {}]   ;;  %s3753_s5 = inlined_call_operand.vmem [shape: f32[1,32], index: 5, kind: input, shape index: {}]   ;;  %s3754_s6 = inlined_call_operand.vmem [shape: bf16[32,32], index: 6, kind: input, shape index: {}]   ;;  %s3755_s7 = inlined_call_operand.vmem [shape: f32[1,32], index: 7, kind: input, shape index: {}]   ;;  %s3756_s8 = inlined_call_operand.hbm [shape: f32[2,8,32], index: 8, kind: output, shape index: {}]  }
   0x1   :  { %3764 = sst [smem:[#allocation19_spill]] %s3749_s1 }
   0x2   :  { %3765 = sst [smem:[#allocation20_spill]] %s3750_s2 }
   0x3   :  { %13 = vsyncpa [#allocation10], 0 }
   0x4   :  { %15 = vsyncpa [#allocation10 + $0x1], 0  ;;  %s3152_s27 = smov 0   ;;  %s3154_s28 = smov 0  }
   0x5   :  { %s3156_s29 = smov 0   ;;  %s3158_s30 = smov 0  }
   0x6   :  { %s3160_s9 = smov 0   ;;  %s3162_s10 = smov 0  }
   0x7   :  { %s3164_s11 = smov 0   ;;  %s3166_s12 = smov 0  }
   0x8   :  { %s3168_s13 = smov 0   ;;  %s3170_s14 = smov 0  }
   0x9 LB: > { %3766 = sst [smem:[#allocation12_spill]] %s3053_s27  ;;  %s2418_s15 = sadd.s32 4294967295, %s3089_s14   ;;  %s3089_s14 = sphi %s3170_s14, %s21_s14   ;;  %s3085_s13 = sphi %s3168_s13, %s3785_s13   ;;  %s3081_s12 = sphi %s3166_s12, %s3784_s12   ;;  %s3077_s11 = sphi %s3164_s11, %s3783_s11   ;;  %s3073_s10 = sphi %s3162_s10, %s3782_s10   ;;  %s3069_s9 = sphi %s3160_s9, %s3790_s9   ;;  %s3065_s30 = sphi %s3158_s30, %s3789_s30   ;;  %s3061_s29 = sphi %s3156_s29, %s3788_s29   ;;  %s3057_s28 = sphi %s3154_s28, %s3787_s28   ;;  %s3053_s27 = sphi %s3152_s27, %s3786_s27  }
   0xa   : > { %3767 = sst [smem:[#allocation13_spill]] %s3081_s12  ;;  %s2419_s16 = sadd.s32 4294967294, %s3089_s14  }
   0xb   : > { %3768 = sst [smem:[#allocation14_spill]] %s3085_s13  ;;  %s30_s17 = sadd.s32 1, %s3081_s12 }
   0xc   : > { %s33_s18 = sadd.s32 1, %s3085_s13  ;;  %p31_p0 = scmp.ge.s32.totalorder %s30_s17, 2 }
   0xd   : > { %s68_s19 = sadd.s32 1, %s3069_s9  ;;  %p75_p1 = scmp.ne.s32.totalorder %s3069_s9, %s3065_s30 }
   0xe   : > { %p76_p2 = scmp.eq.s32.totalorder %s3089_s14, 0  ;;  %s3792_s17 = smov (%p31_p0, %s30_s17), 0 }
   0xf   : > { %3769 = sst [smem:[#allocation15_spill]] %s3792_s17  ;;  %s3794_s18 = smov (!%p31_p0, %s33_s18), %s3085_s13 }
  0x10   : > { %s64_s20 = ssub.s32 %s3081_s12, %s3792_s17  ;;  %p3215_p3 = por %p76_p2, %p75_p1 }
  0x11   : > { %p35_p4 = scmp.ge.s32.totalorder %s3794_s18, 2  ;;  %s234_s22 = sadd.s32 1, %s3061_s29 }
  0x12   : > { %p244_p5 = scmp.ne.s32.totalorder %s3061_s29, %s3057_s28  ;;  %p245_p6 = scmp.eq.s32.totalorder %s2418_s15, 3 }
  0x13   : > { %s3796_s18 = smov (%p35_p4, %s3794_s18), 0  ;;  %p250_p8 = scmp.ne.s32.totalorder %s3057_s28, %s3053_s27 }
  0x14   : > { %3771 = sst [smem:[#allocation16_spill]] %s3796_s18  ;;  %p3224_p7 = por %p245_p6, %p244_p5 }
  0x15   : > { %s63_s24 = ssub.s32 %s3085_s13, %s3796_s18  ;;  %p251_p9 = scmp.eq.s32.totalorder %s2419_s16, 3 }
  0x16   : > { %s65_s25 = sor.u32 %s64_s20, %s63_s24  ;;  %p232_p10 = scmp.eq.s32.totalorder %s63_s24, 0 }
  0x17   : > { %p66_p11 = scmp.eq.s32.totalorder %s65_s25, 0  ;;  %p3232_p12 = por %p251_p9, %p250_p8 }
  0x18   : > { %s3237_s17 = scalar_select %p232_p10, %s3061_s29, %s234_s22  }
  0x19   : > { %s3773_s26 = scalar_select %p3232_p12, 1, 0 }
  0x1a   : > { %s3240_s15 = scalar_select %p66_p11, %s3069_s9, %s68_s19  }
  0x1b   : > { %3774 = sst [smem:[#allocation17_spill]] %s3773_s26  ;;  %p2421_p13 = scmp.ge.s32.totalorder %s3089_s14, 4 }
  0x1c   : > { %3775 = sst [smem:[#allocation18_spill]] %s3240_s15 }
  0x1d   : > { %279 = sbr.rel (%p2421_p13) target bundleno = 88 (0x58), region = 32 }
  0x24   : > { %289 = sbr.rel (!%p3215_p3) target bundleno = 62 (0x3e), region = 40  ;;  %s291_s16 = sand.u32 (%p3215_p3), 1, %s3069_s9  }
  0x25   : > { %s2423_s20 = sshll.u32 (%p3215_p3), %s3081_s12, 4  ;;  %s2422_s24 = sshll.u32 (%p3215_p3), %s291_s16, 8 }
  0x26   : > { %s2424_s25 = sshll.u32 (%p3215_p3), %s3085_s13, 7  ;;  %s3776_s1 = sld [smem:[#allocation19_spill]] (%p3215_p3) }
  0x27   : > { %s296_s18 = sadd.s32 (%p3215_p3), %s2424_s25, %s2423_s20  ;;  %s3256_s16 = scalar_lea.vmem (%p3215_p3), [#allocation7], %s2422_s24 }
  0x28   : > { %s2425_s27 = sshll.u32 (%p3215_p3), %s296_s18, 2 }
  0x2c   : > { %s3251_s19 = scalar_lea.vmem %s3776_s1, %s2425_s27 }
  0x2d   : > { %v314_v0 = vld [vmem:[%s3251_s19] sm:$0xff]   ;;  %v318_v1 = vld [vmem:[%s3251_s19 + $0x8] sm:$0xff]   ;;  %v322_v2 = vld [vmem:[%s3251_s19 + $0x10] sm:$0xff]  }
  0x2e   : > { %315 = vst [vmem:[%s3256_s16] sm:$0xff] %v314_v0   ;;  %319 = vst [vmem:[%s3256_s16 + $0x8] sm:$0xff] %v318_v1   ;;  %v326_v3 = vld [vmem:[%s3251_s19 + $0x18] sm:$0xff]   ;;  %v330_v4 = vld [vmem:[%s3251_s19 + $0x20] sm:$0xff]  }
  0x2f   : > { %323 = vst [vmem:[%s3256_s16 + $0x10] sm:$0xff] %v322_v2   ;;  %v334_v5 = vld [vmem:[%s3251_s19 + $0x28] sm:$0xff]   ;;  %327 = vst [vmem:[%s3256_s16 + $0x18] sm:$0xff] %v326_v3   ;;  %v338_v6 = vld [vmem:[%s3251_s19 + $0x30] sm:$0xff]  }
  0x30   : > { %331 = vst [vmem:[%s3256_s16 + $0x20] sm:$0xff] %v330_v4   ;;  %335 = vst [vmem:[%s3256_s16 + $0x28] sm:$0xff] %v334_v5   ;;  %v342_v7 = vld [vmem:[%s3251_s19 + $0x38] sm:$0xff]   ;;  %v346_v8 = vld [vmem:[%s3251_s19 + $0x80] sm:$0xff]  }
  0x31   : > { %339 = vst [vmem:[%s3256_s16 + $0x30] sm:$0xff] %v338_v6   ;;  %343 = vst [vmem:[%s3256_s16 + $0x38] sm:$0xff] %v342_v7   ;;  %v350_v9 = vld [vmem:[%s3251_s19 + $0x88] sm:$0xff]   ;;  %v354_v10 = vld [vmem:[%s3251_s19 + $0x90] sm:$0xff]  }
  0x32   : > { %347 = vst [vmem:[%s3256_s16 + $0x40] sm:$0xff] %v346_v8   ;;  %v358_v11 = vld [vmem:[%s3251_s19 + $0x98] sm:$0xff]   ;;  %351 = vst [vmem:[%s3256_s16 + $0x48] sm:$0xff] %v350_v9   ;;  %v362_v12 = vld [vmem:[%s3251_s19 + $0xa0] sm:$0xff]  }
  0x33   : > { %355 = vst [vmem:[%s3256_s16 + $0x50] sm:$0xff] %v354_v10   ;;  %359 = vst [vmem:[%s3256_s16 + $0x58] sm:$0xff] %v358_v11   ;;  %v366_v13 = vld [vmem:[%s3251_s19 + $0xa8] sm:$0xff]   ;;  %v370_v14 = vld [vmem:[%s3251_s19 + $0xb0] sm:$0xff]  }
  0x34   : > { %363 = vst [vmem:[%s3256_s16 + $0x60] sm:$0xff] %v362_v12   ;;  %367 = vst [vmem:[%s3256_s16 + $0x68] sm:$0xff] %v366_v13   ;;  %v374_v15 = vld [vmem:[%s3251_s19 + $0xb8] sm:$0xff]   ;;  %v378_v16 = vld [vmem:[%s3251_s19 + $0x100] sm:$0xff]  }
  0x35   : > { %371 = vst [vmem:[%s3256_s16 + $0x70] sm:$0xff] %v370_v14   ;;  %v382_v17 = vld [vmem:[%s3251_s19 + $0x108] sm:$0xff]   ;;  %375 = vst [vmem:[%s3256_s16 + $0x78] sm:$0xff] %v374_v15   ;;  %v386_v18 = vld [vmem:[%s3251_s19 + $0x110] sm:$0xff]  }
  0x36   : > { %379 = vst [vmem:[%s3256_s16 + $0x80] sm:$0xff] %v378_v16   ;;  %383 = vst [vmem:[%s3256_s16 + $0x88] sm:$0xff] %v382_v17   ;;  %v390_v19 = vld [vmem:[%s3251_s19 + $0x118] sm:$0xff]   ;;  %v394_v20 = vld [vmem:[%s3251_s19 + $0x120] sm:$0xff]  }
  0x37   : > { %387 = vst [vmem:[%s3256_s16 + $0x90] sm:$0xff] %v386_v18   ;;  %391 = vst [vmem:[%s3256_s16 + $0x98] sm:$0xff] %v390_v19   ;;  %v398_v21 = vld [vmem:[%s3251_s19 + $0x128] sm:$0xff]   ;;  %v402_v22 = vld [vmem:[%s3251_s19 + $0x130] sm:$0xff]  }
  0x38   : > { %395 = vst [vmem:[%s3256_s16 + $0xa0] sm:$0xff] %v394_v20   ;;  %v406_v23 = vld [vmem:[%s3251_s19 + $0x138] sm:$0xff]   ;;  %399 = vst [vmem:[%s3256_s16 + $0xa8] sm:$0xff] %v398_v21   ;;  %v410_v24 = vld [vmem:[%s3251_s19 + $0x180] sm:$0xff]  }
  0x39   : > { %403 = vst [vmem:[%s3256_s16 + $0xb0] sm:$0xff] %v402_v22   ;;  %407 = vst [vmem:[%s3256_s16 + $0xb8] sm:$0xff] %v406_v23   ;;  %v414_v25 = vld [vmem:[%s3251_s19 + $0x188] sm:$0xff]   ;;  %v418_v26 = vld [vmem:[%s3251_s19 + $0x190] sm:$0xff]  }
  0x3a   : > { %411 = vst [vmem:[%s3256_s16 + $0xc0] sm:$0xff] %v410_v24   ;;  %415 = vst [vmem:[%s3256_s16 + $0xc8] sm:$0xff] %v414_v25   ;;  %v422_v27 = vld [vmem:[%s3251_s19 + $0x198] sm:$0xff]   ;;  %v426_v28 = vld [vmem:[%s3251_s19 + $0x1a0] sm:$0xff]  }
  0x3b   : > { %419 = vst [vmem:[%s3256_s16 + $0xd0] sm:$0xff] %v418_v26   ;;  %v430_v29 = vld [vmem:[%s3251_s19 + $0x1a8] sm:$0xff]   ;;  %423 = vst [vmem:[%s3256_s16 + $0xd8] sm:$0xff] %v422_v27   ;;  %v434_v30 = vld [vmem:[%s3251_s19 + $0x1b0] sm:$0xff]  }
  0x3c   : > { %427 = vst [vmem:[%s3256_s16 + $0xe0] sm:$0xff] %v426_v28   ;;  %431 = vst [vmem:[%s3256_s16 + $0xe8] sm:$0xff] %v430_v29   ;;  %v438_v31 = vld [vmem:[%s3251_s19 + $0x1b8] sm:$0xff]  }
  0x3d   : > { %435 = vst [vmem:[%s3256_s16 + $0xf0] sm:$0xff] %v434_v30   ;;  %439 = vst [vmem:[%s3256_s16 + $0xf8] sm:$0xff] %v438_v31  }
  0x3e PF: > { %592 = sbr.rel (!%p3215_p3) target bundleno = 88 (0x58), region = 81  ;;  %s594_s27 = sand.u32 (%p3215_p3), 1, %s3069_s9  }
  0x3f   : > { %s2427_s18 = sshll.u32 (%p3215_p3), %s3081_s12, 4  ;;  %s2426_s26 = sshll.u32 (%p3215_p3), %s594_s27, 8 }
  0x40   : > { %s2428_s20 = sshll.u32 (%p3215_p3), %s3085_s13, 7  ;;  %s3777_s2 = sld [smem:[#allocation20_spill]] (%p3215_p3) }
  0x41   : > { %s599_s24 = sadd.s32 (%p3215_p3), %s2428_s20, %s2427_s18  ;;  %s3332_s21 = scalar_lea.vmem (%p3215_p3), [#allocation8], %s2426_s26 }
  0x42   : > { %s2429_s25 = sshll.u32 (%p3215_p3), %s599_s24, 2 }
  0x46   : > { %s3327_s15 = scalar_lea.vmem %s3777_s2, %s2429_s25 }
  0x47   : > { %v617_v32 = vld [vmem:[%s3327_s15] sm:$0xff]   ;;  %v621_v33 = vld [vmem:[%s3327_s15 + $0x8] sm:$0xff]   ;;  %v625_v34 = vld [vmem:[%s3327_s15 + $0x10] sm:$0xff]  }
  0x48   : > { %618 = vst [vmem:[%s3332_s21] sm:$0xff] %v617_v32   ;;  %622 = vst [vmem:[%s3332_s21 + $0x8] sm:$0xff] %v621_v33   ;;  %v629_v35 = vld [vmem:[%s3327_s15 + $0x18] sm:$0xff]   ;;  %v633_v36 = vld [vmem:[%s3327_s15 + $0x20] sm:$0xff]  }
  0x49   : > { %626 = vst [vmem:[%s3332_s21 + $0x10] sm:$0xff] %v625_v34   ;;  %v637_v37 = vld [vmem:[%s3327_s15 + $0x28] sm:$0xff]   ;;  %630 = vst [vmem:[%s3332_s21 + $0x18] sm:$0xff] %v629_v35   ;;  %v641_v38 = vld [vmem:[%s3327_s15 + $0x30] sm:$0xff]  }
  0x4a   : > { %634 = vst [vmem:[%s3332_s21 + $0x20] sm:$0xff] %v633_v36   ;;  %638 = vst [vmem:[%s3332_s21 + $0x28] sm:$0xff] %v637_v37   ;;  %v645_v39 = vld [vmem:[%s3327_s15 + $0x38] sm:$0xff]   ;;  %v649_v40 = vld [vmem:[%s3327_s15 + $0x80] sm:$0xff]  }
  0x4b   : > { %642 = vst [vmem:[%s3332_s21 + $0x30] sm:$0xff] %v641_v38   ;;  %646 = vst [vmem:[%s3332_s21 + $0x38] sm:$0xff] %v645_v39   ;;  %v653_v41 = vld [vmem:[%s3327_s15 + $0x88] sm:$0xff]   ;;  %v657_v42 = vld [vmem:[%s3327_s15 + $0x90] sm:$0xff]  }
  0x4c   : > { %650 = vst [vmem:[%s3332_s21 + $0x40] sm:$0xff] %v649_v40   ;;  %v661_v43 = vld [vmem:[%s3327_s15 + $0x98] sm:$0xff]   ;;  %654 = vst [vmem:[%s3332_s21 + $0x48] sm:$0xff] %v653_v41   ;;  %v665_v44 = vld [vmem:[%s3327_s15 + $0xa0] sm:$0xff]  }
  0x4d   : > { %658 = vst [vmem:[%s3332_s21 + $0x50] sm:$0xff] %v657_v42   ;;  %662 = vst [vmem:[%s3332_s21 + $0x58] sm:$0xff] %v661_v43   ;;  %v669_v45 = vld [vmem:[%s3327_s15 + $0xa8] sm:$0xff]   ;;  %v673_v46 = vld [vmem:[%s3327_s15 + $0xb0] sm:$0xff]  }
  0x4e   : > { %666 = vst [vmem:[%s3332_s21 + $0x60] sm:$0xff] %v665_v44   ;;  %670 = vst [vmem:[%s3332_s21 + $0x68] sm:$0xff] %v669_v45   ;;  %v677_v47 = vld [vmem:[%s3327_s15 + $0xb8] sm:$0xff]   ;;  %v681_v48 = vld [vmem:[%s3327_s15 + $0x100] sm:$0xff]  }
  0x4f   : > { %674 = vst [vmem:[%s3332_s21 + $0x70] sm:$0xff] %v673_v46   ;;  %v685_v49 = vld [vmem:[%s3327_s15 + $0x108] sm:$0xff]   ;;  %678 = vst [vmem:[%s3332_s21 + $0x78] sm:$0xff] %v677_v47   ;;  %v689_v50 = vld [vmem:[%s3327_s15 + $0x110] sm:$0xff]  }
  0x50   : > { %682 = vst [vmem:[%s3332_s21 + $0x80] sm:$0xff] %v681_v48   ;;  %686 = vst [vmem:[%s3332_s21 + $0x88] sm:$0xff] %v685_v49   ;;  %v693_v51 = vld [vmem:[%s3327_s15 + $0x118] sm:$0xff]   ;;  %v697_v52 = vld [vmem:[%s3327_s15 + $0x120] sm:$0xff]  }
  0x51   : > { %690 = vst [vmem:[%s3332_s21 + $0x90] sm:$0xff] %v689_v50   ;;  %694 = vst [vmem:[%s3332_s21 + $0x98] sm:$0xff] %v693_v51   ;;  %v701_v53 = vld [vmem:[%s3327_s15 + $0x128] sm:$0xff]   ;;  %v705_v54 = vld [vmem:[%s3327_s15 + $0x130] sm:$0xff]  }
  0x52   : > { %698 = vst [vmem:[%s3332_s21 + $0xa0] sm:$0xff] %v697_v52   ;;  %v709_v55 = vld [vmem:[%s3327_s15 + $0x138] sm:$0xff]   ;;  %702 = vst [vmem:[%s3332_s21 + $0xa8] sm:$0xff] %v701_v53   ;;  %v713_v56 = vld [vmem:[%s3327_s15 + $0x180] sm:$0xff]  }
  0x53   : > { %706 = vst [vmem:[%s3332_s21 + $0xb0] sm:$0xff] %v705_v54   ;;  %710 = vst [vmem:[%s3332_s21 + $0xb8] sm:$0xff] %v709_v55   ;;  %v717_v57 = vld [vmem:[%s3327_s15 + $0x188] sm:$0xff]   ;;  %v721_v58 = vld [vmem:[%s3327_s15 + $0x190] sm:$0xff]  }
  0x54   : > { %714 = vst [vmem:[%s3332_s21 + $0xc0] sm:$0xff] %v713_v56   ;;  %718 = vst [vmem:[%s3332_s21 + $0xc8] sm:$0xff] %v717_v57   ;;  %v725_v59 = vld [vmem:[%s3327_s15 + $0x198] sm:$0xff]   ;;  %v729_v60 = vld [vmem:[%s3327_s15 + $0x1a0] sm:$0xff]  }
  0x55   : > { %722 = vst [vmem:[%s3332_s21 + $0xd0] sm:$0xff] %v721_v58   ;;  %v733_v61 = vld [vmem:[%s3327_s15 + $0x1a8] sm:$0xff]   ;;  %726 = vst [vmem:[%s3332_s21 + $0xd8] sm:$0xff] %v725_v59   ;;  %v737_v62 = vld [vmem:[%s3327_s15 + $0x1b0] sm:$0xff]  }
  0x56   : > { %730 = vst [vmem:[%s3332_s21 + $0xe0] sm:$0xff] %v729_v60   ;;  %734 = vst [vmem:[%s3332_s21 + $0xe8] sm:$0xff] %v733_v61   ;;  %v741_v63 = vld [vmem:[%s3327_s15 + $0x1b8] sm:$0xff]  }
  0x57   : > { %738 = vst [vmem:[%s3332_s21 + $0xf0] sm:$0xff] %v737_v62   ;;  %742 = vst [vmem:[%s3332_s21 + $0xf8] sm:$0xff] %v741_v63  }
  0x58 PF: > { %p2430_p0 = scmp.ge.s32.totalorder %s3089_s14, 1  ;;  %p904_p1 = scmp.lt.s32.totalorder %s3089_s14, 5 }
  0x5a   : > { %p905_p2 = pnand %p2430_p0, %p904_p1 }
  0x5b   : > { %s911_s1 = sand.u32 (!%p905_p2), 1, %s3065_s30   ;;  %s3761_s19 = sand.u32 (!%p905_p2), 1, %s3057_s28  }
  0x5c   : > { %908 = sbr.rel (%p905_p2) target bundleno = 1742 (0x6ce), region = 126  ;;  %s2431_s15 = sshll.u32 (!%p905_p2), %s911_s1, 8 }
  0x5d   : > { %s3401_s16 = sshll.u32 (!%p905_p2), %s3761_s19, 3  ;;  %p966_p3 = scmp.lt.s32.totalorder (!%p905_p2), %s3077_s11, 1 }
  0x5e   : > { %p974_p4 = scmp.lt.s32.totalorder (!%p905_p2), %s3073_s10, 1  ;;  %s3418_s2 = scalar_lea.vmem (!%p905_p2), [#allocation7], %s2431_s15 }
  0x5f   : > { %s3420_s13 = scalar_lea.vmem (!%p905_p2), [#allocation8], %s2431_s15  ;;  %s965_s12 = scalar_lea.vmem (!%p905_p2), [#allocation9], %s3401_s16 }
  0x60   : > { %p2436_p5 = scmp.ne.s32.totalorder (!%p905_p2), %s3073_s10, 0 }
  0x63   : > { %s967_s27 = scalar_select %p966_p3, %s3077_s11, 1 }
  0x64   : > { %s975_s18 = scalar_select %p974_p4, %s3073_s10, 1 }
  0x65   : > { %s2434_s26 = sshll.u32 %s967_s27, 3  ;;  %s2435_s20 = sshll.u32 %s967_s27, 1  ;;  %vm1075_vm0 = vcmask (!%p2436_p5), 7168   ;;  %vm1084_vm1 = vcmask (!%p2436_p5), 64512   ;;  %v3091_v0 = vmov (!%p2436_p5), 0.0   ;;  %v3092_v1 = vmov (!%p2436_p5), -inf  }
  0x66   : > { %s3410_s22 = scalar_lea.vmem %s3748_s0, %s2434_s26  ;;  %s3412_s21 = sadd.s32 %s2435_s20, %s975_s18  ;;  %2605 = vmatprep.subr.bf16.mxu0 (!%p2436_p5), %v3091_v0  ;;  %1076 = vst.msk [vmem:[#allocation3] sm:$0xff] (!%p2436_p5), %vm1075_vm0, %v3092_v1  ;;  %1077 = vst.msk [vmem:[#allocation3 + $0x8] sm:$0xff] (!%p2436_p5), %vm1075_vm0, %v3092_v1  ;;  %v2883_v2 = vld [vmem:[%s3752_s4] sm:$0xff] (!%p2436_p5)   ;;  %vm3093_vm2 = vmmov (!%p2436_p5), 0   ;;  %v2884_v3 = vld [vmem:[%s3752_s4 + $0x8] sm:$0xff] (!%p2436_p5)   ;;  %vm1009_vm3 = vcmask (!%p2436_p5), 261120  }
  0x67   : > { %s978_s19 = scalar_lea.vmem %s3751_s3, %s3412_s21  ;;  %983 = sbr.rel (%p2436_p5) target bundleno = 448 (0x1c0), region = 138  ;;  %1078 = vst.msk [vmem:[#allocation3 + $0x10] sm:$0xff] (!%p2436_p5), %vm1075_vm0, %v3092_v1  ;;  %1079 = vst.msk [vmem:[#allocation3 + $0x18] sm:$0xff] (!%p2436_p5), %vm1075_vm0, %v3092_v1  ;;  %2609 = vmatprep.mubr.msk.bf16.mxu0 (!%p2436_p5), %vm3093_vm2, %v3091_v0  ;;  %2606 = vmatpush3.bf16.msra.mxu0 (!%p2436_p5), %v2883_v2  ;;  %v984_v4 = vld [vmem:[%s3410_s22] sm:$0xff] (!%p2436_p5)  ;;  %vm1055_vm4 = vcmask (!%p2436_p5), 60416  }
  0x68   : > { %1080 = vst.msk [vmem:[#allocation4] sm:$0xff] (!%p2436_p5), %vm1075_vm0, %v3091_v0  ;;  %1081 = vst.msk [vmem:[#allocation4 + $0x8] sm:$0xff] (!%p2436_p5), %vm1075_vm0, %v3091_v0  ;;  %2607 = vmatprep.subr.bf16.mxu0 (!%p2436_p5), %v3091_v0  ;;  %v985_v5 = vpack.c.bf16 (!%p2436_p5), %v984_v4, %v984_v4  ;;  %v2437_v6 = vld [vmem:[%s3753_s5] ss:$0 sm:$0xff] (!%p2436_p5)  ;;  %s3094_s25 = smov (!%p2436_p5), 104   ;;  %s3095_s22 = smov (!%p2436_p5), 120  }
  0x69   : > { %1082 = vst.msk [vmem:[#allocation4 + $0x10] sm:$0xff] (!%p2436_p5), %vm1075_vm0, %v3091_v0  ;;  %1083 = vst.msk [vmem:[#allocation4 + $0x18] sm:$0xff] (!%p2436_p5), %vm1075_vm0, %v3091_v0  ;;  %s3096_s30 = smov (!%p2436_p5), 112  }
  0x6a   : > { %1085 = vst.msk [vmem:[#allocation5] sm:$0xff] (!%p2436_p5), %vm1084_vm1, %v3091_v0  ;;  %1086 = vst.msk [vmem:[#allocation5 + $0x8] sm:$0xff] (!%p2436_p5), %vm1084_vm1, %v3091_v0 }
  0x6b   : > { %1087 = vst.msk [vmem:[#allocation5 + $0x10] sm:$0xff] (!%p2436_p5), %vm1084_vm1, %v3091_v0  ;;  %1088 = vst.msk [vmem:[#allocation5 + $0x18] sm:$0xff] (!%p2436_p5), %vm1084_vm1, %v3091_v0  ;;  %2608 = vmatpush3.bf16.msra.mxu0 (!%p2436_p5), %v2884_v3 }
  0x6e   : > { %2610 = vmatmul.mubr.msk.bf16.vlgmr.msra.gmra.mrb[0].mxu0 %vm1009_vm3, %v985_v5 }
 0x141   : > { %v1047_v7 = vpop.f32.mrb[0].mxu0 }
 0x142   : > { %v1048_v8 = vadd.f32 %v2437_v6, %v1047_v7  ;;  %v2611_v9 = vpop.f32.mrb[1].mxu0 }
 0x143   : > { %v1050_v10 = vpop.f32.mrb[2].mxu0 }
 0x144   : > { %v1053_v11 = vmul.f32 0.35355338, %v1048_v8  ;;  %v2612_v12 = vpop.f32.mrb[3].mxu0 }
 0x146   : > { %v1054_v13 = vpack.c.bf16 %v1053_v11, %v1053_v11 }
 0x148   : > { %1070 = vrot.lane.b32.xlu1 %v1054_v13, %s3094_s25  ;;  %1060 = vrot.lane.b32.xlu0 %v1054_v13, %s3095_s22  ;;  %1056 = vst.msk [vmem:[#allocation2] sm:$0xf] %vm1055_vm4, %v1054_v13 }
 0x14c   : > { %1065 = vrot.lane.b32.xlu0 %v1054_v13, %s3096_s30 }
 0x1ba   : > { %v1071_v14 = vpop.permute.xlu1 %1070  ;;  %v1061_v15 = vpop.permute.xlu0 %1060 }
 0x1bb   : > { %1074 = vst.msk [vmem:[#allocation2 + $0xc] sm:$0xf] %vm1055_vm4, %v1071_v14  ;;  %1064 = vst.msk [vmem:[#allocation2 + $0x4] sm:$0xf] %vm1055_vm4, %v1061_v15 }
 0x1be   : > { %v1066_v16 = vpop.permute.xlu0 %1065 }
 0x1bf   : > { %1069 = vst.msk [vmem:[#allocation2 + $0x8] sm:$0xf] %vm1055_vm4, %v1066_v16 }
 0x1c0 PF: > { %v2887_v17 = vld [vmem:[%s3418_s2] sm:$0xff]   ;;  %v3097_v18 = vmov 0.0   ;;  %vm1268_vm5 = vcmask 64512   ;;  %v2889_v22 = vld [vmem:[%s3418_s2 + $0x8] sm:$0xff]   ;;  %v2891_v26 = vld [vmem:[%s3418_s2 + $0x10] sm:$0xff]   ;;  %vm3098_vm6 = vmmov 0  }
 0x1c1   : > { %2613 = vmatprep.subr.bf16.mxu0 %v3097_v18  ;;  %2633 = vmatprep.subr.bf16.mxu1 %v3097_v18  ;;  %v2888_v19 = vld [vmem:[%s3418_s2 + $0x40] sm:$0xff]   ;;  %v1273_v20 = vsel %vm1268_vm5, %v2887_v17, 0  ;;  %v2890_v23 = vld [vmem:[%s3418_s2 + $0x48] sm:$0xff]   ;;  %v1276_v24 = vsel %vm1268_vm5, %v2889_v22, 0  ;;  %v2892_v27 = vld [vmem:[%s3418_s2 + $0x50] sm:$0xff]   ;;  %v1279_v28 = vsel %vm1268_vm5, %v2891_v26, 0 }
 0x1c2   : > { %2614 = vmatpush3.bf16.xpose.msra.mxu0 %v1273_v20  ;;  %v1380_v21 = vsel %vm1268_vm5, %v2888_v19, 0  ;;  %v1383_v25 = vsel %vm1268_vm5, %v2890_v23, 0  ;;  %v1386_v29 = vsel %vm1268_vm5, %v2892_v27, 0  ;;  %2629 = vmatprep.mubr.msk.bf16.mxu0 %vm3098_vm6, %v3097_v18  ;;  %v2893_v30 = vld [vmem:[%s3418_s2 + $0x18] sm:$0xff]   ;;  %v2895_v34 = vld [vmem:[%s3418_s2 + $0x20] sm:$0xff]   ;;  %v2897_v36 = vld [vmem:[%s3418_s2 + $0x28] sm:$0xff]  }
 0x1c3   : > { %2634 = vmatpush3.bf16.xpose.msra.mxu1 %v1380_v21  ;;  %2615 = vmatprep.subr.bf16.mxu0 %v3097_v18  ;;  %v2894_v31 = vld [vmem:[%s3418_s2 + $0x58] sm:$0xff]   ;;  %v1282_v32 = vsel %vm1268_vm5, %v2893_v30, 0  ;;  %v2896_v35 = vld [vmem:[%s3418_s2 + $0x60] sm:$0xff]   ;;  %v2898_v37 = vld [vmem:[%s3418_s2 + $0x68] sm:$0xff]   ;;  %v1285_v40 = vsel %vm1268_vm5, %v2895_v34, 0  ;;  %v1288_v42 = vsel %vm1268_vm5, %v2897_v36, 0 }
 0x1c4   : > { %2635 = vmatprep.subr.bf16.mxu1 %v3097_v18  ;;  %2649 = vmatprep.mubr.msk.bf16.mxu1 %vm3098_vm6, %v3097_v18  ;;  %v1389_v33 = vsel %vm1268_vm5, %v2894_v31, 0  ;;  %v2899_v38 = vld [vmem:[%s3418_s2 + $0x30] sm:$0xff]   ;;  %v1392_v41 = vsel %vm1268_vm5, %v2896_v35, 0  ;;  %v1395_v43 = vsel %vm1268_vm5, %v2898_v37, 0  ;;  %v2901_v46 = vld [vmem:[%s3418_s2 + $0x38] sm:$0xff]   ;;  %v2903_v50 = vld [vmem:[%s3418_s2 + $0x80] sm:$0xff]  }
 0x1c5   : > { %v2900_v39 = vld [vmem:[%s3418_s2 + $0x70] sm:$0xff]   ;;  %v1291_v44 = vsel %vm1268_vm5, %v2899_v38, 0  ;;  %v2902_v47 = vld [vmem:[%s3418_s2 + $0x78] sm:$0xff]   ;;  %v1294_v48 = vsel %vm1268_vm5, %v2901_v46, 0  ;;  %v2904_v51 = vld [vmem:[%s3418_s2 + $0xc0] sm:$0xff]   ;;  %v1487_v53 = vsel %vm1268_vm5, %v2903_v50, 0 }
 0x1c6   : > { %v1398_v45 = vsel %vm1268_vm5, %v2900_v39, 0  ;;  %v1401_v49 = vsel %vm1268_vm5, %v2902_v47, 0  ;;  %v1089_v52 = vld [vmem:[#allocation2] sm:$0xf]  ;;  %v1090_v54 = vld [vmem:[#allocation2 + $0x4] sm:$0xf] }
 0x1c7   : > { %v1594_v55 = vsel %vm1268_vm5, %v2904_v51, 0  ;;  %v2905_v56 = vld [vmem:[%s3418_s2 + $0x88] sm:$0xff]   ;;  %v2907_v60 = vld [vmem:[%s3418_s2 + $0x90] sm:$0xff]   ;;  %v2909_v0 = vld [vmem:[%s3418_s2 + $0x98] sm:$0xff]   ;;  %v3099_v34 = vmov 0   ;;  %vm1737_vm7 = vcmask 7168  }
 0x1c8   : > { %v2906_v57 = vld [vmem:[%s3418_s2 + $0xc8] sm:$0xff]   ;;  %v1490_v58 = vsel %vm1268_vm5, %v2905_v56, 0  ;;  %v2908_v61 = vld [vmem:[%s3418_s2 + $0xd0] sm:$0xff]   ;;  %v1493_v62 = vsel %vm1268_vm5, %v2907_v60, 0  ;;  %v2910_v1 = vld [vmem:[%s3418_s2 + $0xd8] sm:$0xff]   ;;  %v1496_v2 = vsel %vm1268_vm5, %v2909_v0, 0  ;;  %2885 = vset.pattern.permute.xlu0 %v3099_v34  ;;  %2886 = vset.pattern.permute.xlu1 %v3099_v34 }
 0x1c9   : > { %v1597_v59 = vsel %vm1268_vm5, %v2906_v57, 0  ;;  %v1600_v63 = vsel %vm1268_vm5, %v2908_v61, 0  ;;  %v1603_v3 = vsel %vm1268_vm5, %v2910_v1, 0  ;;  %v2911_v4 = vld [vmem:[%s3418_s2 + $0xa0] sm:$0xff]   ;;  %v2913_v8 = vld [vmem:[%s3418_s2 + $0xa8] sm:$0xff]   ;;  %v2915_v12 = vld [vmem:[%s3418_s2 + $0xb0] sm:$0xff]  }
 0x1ca   : > { %2616 = vmatpush3.bf16.xpose.msra.mxu0 %v1276_v24  ;;  %v2912_v5 = vld [vmem:[%s3418_s2 + $0xe0] sm:$0xff]   ;;  %v1499_v6 = vsel %vm1268_vm5, %v2911_v4, 0  ;;  %v2914_v9 = vld [vmem:[%s3418_s2 + $0xe8] sm:$0xff]   ;;  %v1502_v10 = vsel %vm1268_vm5, %v2913_v8, 0  ;;  %v2916_v13 = vld [vmem:[%s3418_s2 + $0xf0] sm:$0xff]   ;;  %v1505_v14 = vsel %vm1268_vm5, %v2915_v12, 0 }
 0x1cb   : > { %2636 = vmatpush3.bf16.xpose.msra.mxu1 %v1383_v25  ;;  %2617 = vmatprep.subr.bf16.mxu0 %v3097_v18  ;;  %v1606_v7 = vsel %vm1268_vm5, %v2912_v5, 0  ;;  %v1609_v11 = vsel %vm1268_vm5, %v2914_v9, 0  ;;  %v1612_v15 = vsel %vm1268_vm5, %v2916_v13, 0  ;;  %v2917_v16 = vld [vmem:[%s3418_s2 + $0xb8] sm:$0xff]   ;;  %v1091_v21 = vld [vmem:[#allocation2 + $0x8] sm:$0xf] }
 0x1cc   : > { %2637 = vmatprep.subr.bf16.mxu1 %v3097_v18  ;;  %v2918_v17 = vld [vmem:[%s3418_s2 + $0xf8] sm:$0xff]   ;;  %v1508_v19 = vsel %vm1268_vm5, %v2917_v16, 0  ;;  %v2442_v23 = vld [vmem:[%s978_s19] ss:$0 sm:$0xff]  ;;  %v2921_v46 = vld [vmem:[%s3420_s13 + $0x40] sm:$0xff]   ;;  %p2511_p6 = scmp.ne.s32.totalorder %s3073_s10, 1 }
 0x1cd   : > { %v1615_v20 = vsel %vm1268_vm5, %v2918_v17, 0  ;;  %v1092_v22 = vld [vmem:[#allocation2 + $0xc] sm:$0xf]  ;;  %v2920_v47 = vld [vmem:[%s3420_s13 + $0x8] sm:$0xff]   ;;  %v2925_v50 = vld [vmem:[%s3420_s13 + $0x50] sm:$0xff]   ;;  %vm3102_vm8 = vmmov (!%p2511_p6), 0  }
 0x1ce   : > { %v2924_v51 = vld [vmem:[%s3420_s13 + $0x18] sm:$0xff]   ;;  %v2926_v56 = vld [vmem:[%s3420_s13 + $0x20] sm:$0xff]   ;;  %v2928_v61 = vld [vmem:[%s3420_s13 + $0x28] sm:$0xff]   ;;  %s3103_s15 = smov (!%p2511_p6), 8   ;;  %vm2179_vm9 = vcmask (!%p2511_p6), 60416   ;;  %s3104_s27 = smov (!%p2511_p6), 16  }
 0x1cf   : > { %v2927_v57 = vld [vmem:[%s3420_s13 + $0x58] sm:$0xff]   ;;  %v2931_v0 = vld [vmem:[%s3420_s13 + $0x68] sm:$0xff]   ;;  %v2941_v34 = vld [vmem:[%s3420_s13 + $0xd0] sm:$0xff]   ;;  %s3105_s18 = smov (!%p2511_p6), 24   ;;  %vm2188_vm10 = vcmask (!%p2511_p6), 126016   ;;  %vm2197_vm11 = vcmask (!%p2511_p6), 191616  }
 0x1d0   : > { %v2932_v1 = vld [vmem:[%s3420_s13 + $0x38] sm:$0xff]   ;;  %vm2206_vm12 = vcmask (!%p2511_p6), 257216   ;;  %vm2232_vm13 = vcmask (!%p2511_p6), 261120  }
 0x1d1   : > { %v3608_v9 = vld [vmem:[#allocation3 + $0x18] sm:$0xff] }
 0x1d2   : > { %2618 = vmatpush3.bf16.xpose.msra.mxu0 %v1279_v28 }
 0x1d3   : > { %2638 = vmatpush3.bf16.xpose.msra.mxu1 %v1386_v29  ;;  %2619 = vmatprep.subr.bf16.mxu0 %v3097_v18 }
 0x1d4   : > { %2639 = vmatprep.subr.bf16.mxu1 %v3097_v18 }
 0x1da   : > { %2620 = vmatpush3.bf16.xpose.msra.mxu0 %v1282_v32 }
 0x1db   : > { %2640 = vmatpush3.bf16.xpose.msra.mxu1 %v1389_v33  ;;  %2621 = vmatprep.subr.bf16.mxu0 %v3097_v18 }
 0x1dc   : > { %2641 = vmatprep.subr.bf16.mxu1 %v3097_v18 }
 0x1e2   : > { %2622 = vmatpush3.bf16.xpose.msra.mxu0 %v1285_v40 }
 0x1e3   : > { %2642 = vmatpush3.bf16.xpose.msra.mxu1 %v1392_v41  ;;  %2623 = vmatprep.subr.bf16.mxu0 %v3097_v18 }
 0x1e4   : > { %2643 = vmatprep.subr.bf16.mxu1 %v3097_v18 }
 0x1ea   : > { %2624 = vmatpush3.bf16.xpose.msra.mxu0 %v1288_v42 }
 0x1eb   : > { %2644 = vmatpush3.bf16.xpose.msra.mxu1 %v1395_v43  ;;  %2625 = vmatprep.subr.bf16.mxu0 %v3097_v18 }
 0x1ec   : > { %2645 = vmatprep.subr.bf16.mxu1 %v3097_v18 }
 0x1f2   : > { %2626 = vmatpush3.bf16.xpose.msra.mxu0 %v1291_v44 }
 0x1f3   : > { %2646 = vmatpush3.bf16.xpose.msra.mxu1 %v1398_v45  ;;  %2627 = vmatprep.subr.bf16.mxu0 %v3097_v18  ;;  %v2919_v45 = vld [vmem:[%s3420_s13] sm:$0xff]  }
 0x1f4   : > { %2647 = vmatprep.subr.bf16.mxu1 %v3097_v18 }
 0x1fa   : > { %2628 = vmatpush3.bf16.xpose.msra.mxu0 %v1294_v48  ;;  %v2923_v48 = vld [vmem:[%s3420_s13 + $0x48] sm:$0xff]  }
 0x1fb   : > { %2648 = vmatpush3.bf16.xpose.msra.mxu1 %v1401_v49  ;;  %2653 = vmatprep.subr.bf16.mxu0 %v3097_v18  ;;  %v2922_v49 = vld [vmem:[%s3420_s13 + $0x10] sm:$0xff]  }
 0x1fc   : > { %2673 = vmatprep.subr.bf16.mxu1 %v3097_v18 }
 0x201   : > { %2630 = vmatmul.mubr.msk.bf16.vlgmr.msra.gmra.mrb[0].mxu0 %vm1268_vm5, %v1089_v52  ;;  %v1657_v52 = vld [vmem:[#allocation3] sm:$0xff] }
 0x202   : > { %2654 = vmatpush3.bf16.xpose.msra.mxu0 %v1487_v53  ;;  %2650 = vmatmul.mubr.msk.bf16.vlgmr.msra.gmra.mrb[0].mxu1 %vm1268_vm5, %v1090_v54 }
 0x203   : > { %2674 = vmatpush3.bf16.xpose.msra.mxu1 %v1594_v55  ;;  %2655 = vmatprep.subr.bf16.mxu0 %v3097_v18  ;;  %v3579_v55 = vld [vmem:[#allocation3 + $0x8] sm:$0xff] }
 0x204   : > { %2675 = vmatprep.subr.bf16.mxu1 %v3097_v18  ;;  %2669 = vmatprep.mubr.msk.bf16.mxu0 %vm3098_vm6, %v3097_v18 }
 0x205   : > { %2689 = vmatprep.mubr.msk.bf16.mxu1 %vm3098_vm6, %v3097_v18 }
 0x20a   : > { %2656 = vmatpush3.bf16.xpose.msra.mxu0 %v1490_v58 }
 0x20b   : > { %2676 = vmatpush3.bf16.xpose.msra.mxu1 %v1597_v59  ;;  %2657 = vmatprep.subr.bf16.mxu0 %v3097_v18 }
 0x20c   : > { %2677 = vmatprep.subr.bf16.mxu1 %v3097_v18 }
 0x212   : > { %2658 = vmatpush3.bf16.xpose.msra.mxu0 %v1493_v62  ;;  %v2929_v62 = vld [vmem:[%s3420_s13 + $0x60] sm:$0xff]  }
 0x213   : > { %2678 = vmatpush3.bf16.xpose.msra.mxu1 %v1600_v63  ;;  %2659 = vmatprep.subr.bf16.mxu0 %v3097_v18  ;;  %v2930_v63 = vld [vmem:[%s3420_s13 + $0x30] sm:$0xff]  }
 0x214   : > { %2679 = vmatprep.subr.bf16.mxu1 %v3097_v18 }
 0x21a   : > { %2660 = vmatpush3.bf16.xpose.msra.mxu0 %v1496_v2  ;;  %v2933_v2 = vld [vmem:[%s3420_s13 + $0x70] sm:$0xff]  }
 0x21b   : > { %2680 = vmatpush3.bf16.xpose.msra.mxu1 %v1603_v3  ;;  %2661 = vmatprep.subr.bf16.mxu0 %v3097_v18  ;;  %v2934_v3 = vld [vmem:[%s3420_s13 + $0x78] sm:$0xff]  }
 0x21c   : > { %2681 = vmatprep.subr.bf16.mxu1 %v3097_v18 }
 0x222   : > { %2662 = vmatpush3.bf16.xpose.msra.mxu0 %v1499_v6  ;;  %v1659_v6 = vld [vmem:[#allocation3 + $0x10] sm:$0xff] }
 0x223   : > { %2682 = vmatpush3.bf16.xpose.msra.mxu1 %v1606_v7  ;;  %2663 = vmatprep.subr.bf16.mxu0 %v3097_v18 }
 0x224   : > { %2683 = vmatprep.subr.bf16.mxu1 %v3097_v18 }
 0x22a   : > { %2664 = vmatpush3.bf16.xpose.msra.mxu0 %v1502_v10 }
 0x22b   : > { %2684 = vmatpush3.bf16.xpose.msra.mxu1 %v1609_v11  ;;  %2665 = vmatprep.subr.bf16.mxu0 %v3097_v18 }
 0x22c   : > { %2685 = vmatprep.subr.bf16.mxu1 %v3097_v18 }
 0x232   : > { %2666 = vmatpush3.bf16.xpose.msra.mxu0 %v1505_v14 }
 0x233   : > { %2686 = vmatpush3.bf16.xpose.msra.mxu1 %v1612_v15  ;;  %2667 = vmatprep.subr.bf16.mxu0 %v3097_v18 }
 0x234   : > { %2687 = vmatprep.subr.bf16.mxu1 %v3097_v18 }
 0x23a   : > { %2668 = vmatpush3.bf16.xpose.msra.mxu0 %v1508_v19 }
 0x23b   : > { %2688 = vmatpush3.bf16.xpose.msra.mxu1 %v1615_v20  ;;  %2693 = vmatprep.subr.bf16.mxu0 %v3097_v18 }
 0x23c   : > { %2713 = vmatprep.subr.bf16.mxu1 %v3097_v18 }
 0x241   : > { %2670 = vmatmul.mubr.msk.bf16.vlgmr.msra.gmra.mrb[4].mxu0 %vm1268_vm5, %v1091_v21 }
 0x242   : > { %2690 = vmatmul.mubr.msk.bf16.vlgmr.msra.gmra.mrb[4].mxu1 %vm1268_vm5, %v1092_v22  ;;  %2709 = vmatprep.mubr.msk.bf16.mxu0 %vm3098_vm6, %v3097_v18 }
 0x243   : > { %2729 = vmatprep.mubr.msk.bf16.mxu1 %vm3098_vm6, %v3097_v18  ;;  %2694 = vmatpush3.bf16.msra.mxu0 %v2919_v45  ;;  %v2948_v45 = vld [vmem:[%s3420_s13 + $0xb8] sm:$0xff]  }
 0x244   : > { %2714 = vmatpush3.bf16.msra.mxu1 %v2921_v46  ;;  %2695 = vmatprep.subr.bf16.mxu0 %v3097_v18  ;;  %v2949_v46 = vld [vmem:[%s3420_s13 + $0xf0] sm:$0xff]  }
 0x245   : > { %2715 = vmatprep.subr.bf16.mxu1 %v3097_v18 }
 0x247   : > { %2696 = vmatpush3.bf16.msra.mxu0 %v2920_v47  ;;  %v2950_v47 = vld [vmem:[%s3420_s13 + $0xf8] sm:$0xff]  }
 0x248   : > { %2716 = vmatpush3.bf16.msra.mxu1 %v2923_v48  ;;  %2697 = vmatprep.subr.bf16.mxu0 %v3097_v18 }
 0x249   : > { %2717 = vmatprep.subr.bf16.mxu1 %v3097_v18 }
 0x24b   : > { %2698 = vmatpush3.bf16.msra.mxu0 %v2922_v49 }
 0x24c   : > { %2718 = vmatpush3.bf16.msra.mxu1 %v2925_v50  ;;  %2699 = vmatprep.subr.bf16.mxu0 %v3097_v18 }
 0x24d   : > { %2719 = vmatprep.subr.bf16.mxu1 %v3097_v18 }
 0x24f   : > { %2700 = vmatpush3.bf16.msra.mxu0 %v2924_v51 }
 0x250   : > { %2701 = vmatprep.subr.bf16.mxu0 %v3097_v18  ;;  %2720 = vmatpush3.bf16.msra.mxu1 %v2927_v57 }
 0x251   : > { %2721 = vmatprep.subr.bf16.mxu1 %v3097_v18 }
 0x253   : > { %2702 = vmatpush3.bf16.msra.mxu0 %v2926_v56 }
 0x254   : > { %2703 = vmatprep.subr.bf16.mxu0 %v3097_v18  ;;  %2722 = vmatpush3.bf16.msra.mxu1 %v2929_v62 }
 0x255   : > { %2723 = vmatprep.subr.bf16.mxu1 %v3097_v18 }
 0x257   : > { %2704 = vmatpush3.bf16.msra.mxu0 %v2928_v61  ;;  %v1718_v61 = vld [vmem:[#allocation4 + $0x8] sm:$0xff] }
 0x258   : > { %2705 = vmatprep.subr.bf16.mxu0 %v3097_v18  ;;  %2724 = vmatpush3.bf16.msra.mxu1 %v2931_v0 }
 0x259   : > { %2725 = vmatprep.subr.bf16.mxu1 %v3097_v18 }
 0x25b   : > { %2706 = vmatpush3.bf16.msra.mxu0 %v2930_v63 }
 0x25c   : > { %2707 = vmatprep.subr.bf16.mxu0 %v3097_v18  ;;  %2726 = vmatpush3.bf16.msra.mxu1 %v2933_v2 }
 0x25d   : > { %2727 = vmatprep.subr.bf16.mxu1 %v3097_v18 }
 0x25f   : > { %2708 = vmatpush3.bf16.msra.mxu0 %v2932_v1 }
 0x260   : > { %2733 = vmatprep.subr.bf16.mxu0 %v3097_v18  ;;  %2728 = vmatpush3.bf16.msra.mxu1 %v2934_v3  ;;  %v1719_v3 = vld [vmem:[#allocation4 + $0x10] sm:$0xff] }
 0x261   : > { %2753 = vmatprep.subr.bf16.mxu1 %v3097_v18 }
 0x2d4   : > { %v1330_v24 = vpop.f32.mrb[0].mxu0 }
 0x2d5   : > { %v3553_v25 = vadd.f32 %v2442_v23, %v1330_v24  ;;  %v2631_v26 = vpop.f32.mrb[1].mxu0  ;;  %v1437_v27 = vpop.f32.mrb[0].mxu1 }
 0x2d6   : > { %v1333_v28 = vpop.f32.mrb[2].mxu0  ;;  %v2651_v29 = vpop.f32.mrb[1].mxu1  ;;  %v3555_v30 = vadd.f32 %v2442_v23, %v1437_v27 }
 0x2d7   : > { %1661 = vmax.xlane.f32.xlu0 %v3553_v25  ;;  %v2632_v31 = vpop.f32.mrb[3].mxu0  ;;  %v1440_v32 = vpop.f32.mrb[2].mxu1  ;;  %v2936_v28 = vld [vmem:[%s3420_s13 + $0x88] sm:$0xff]  }
 0x2d8   : > { %v2652_v33 = vpop.f32.mrb[3].mxu1  ;;  %v2939_v31 = vld [vmem:[%s3420_s13 + $0xc8] sm:$0xff]  }
 0x2d9   : > { %v2940_v33 = vld [vmem:[%s3420_s13 + $0x98] sm:$0xff]  }
 0x2db   : > { %1663 = vmax.xlane.f32.xlu0 %v3555_v30 }
 0x314   : > { %v1544_v35 = vpop.f32.mrb[4].mxu0 }
 0x315   : > { %v3559_v36 = vadd.f32 %v2442_v23, %v1544_v35  ;;  %v2671_v37 = vpop.f32.mrb[5].mxu0  ;;  %v1651_v38 = vpop.f32.mrb[4].mxu1  ;;  %v2942_v35 = vld [vmem:[%s3420_s13 + $0xa0] sm:$0xff]  }
 0x316   : > { %v1547_v39 = vpop.f32.mrb[6].mxu0  ;;  %v2691_v40 = vpop.f32.mrb[5].mxu1  ;;  %v3561_v41 = vadd.f32 %v2442_v23, %v1651_v38  ;;  %v2935_v23 = vld [vmem:[%s3420_s13 + $0x80] sm:$0xff]   ;;  %v2943_v37 = vld [vmem:[%s3420_s13 + $0xd8] sm:$0xff]  }
 0x317   : > { %v1654_v42 = vpop.f32.mrb[6].mxu1  ;;  %1665 = vmax.xlane.f32.xlu1 %v3559_v36  ;;  %v2672_v43 = vpop.f32.mrb[7].mxu0  ;;  %v2944_v39 = vld [vmem:[%s3420_s13 + $0xa8] sm:$0xff]   ;;  %v2945_v40 = vld [vmem:[%s3420_s13 + $0xe0] sm:$0xff]  }
 0x318   : > { %v2692_v44 = vpop.f32.mrb[7].mxu1  ;;  %v2946_v42 = vld [vmem:[%s3420_s13 + $0xb0] sm:$0xff]   ;;  %v2947_v43 = vld [vmem:[%s3420_s13 + $0xe8] sm:$0xff]  }
 0x31b   : > { %1667 = vmax.xlane.f32.xlu1 %v3561_v41 }
 0x364   : > { %v1662_v53 = vpop.xlane.xlu0 %1661 }
 0x365   : > { %v1669_v54 = vmax.f32 %v1657_v52, %v1662_v53 }
 0x367   : > { %2134 = vst.msk [vmem:[#allocation3] sm:$0xff] %vm1737_vm7, %v1669_v54  ;;  %1687 = vperm.xlu0 %2885, %v1669_v54   ;;  %v1673_v4 = vsub.f32 %v1657_v52, %v1669_v54 }
 0x368   : > { %v1664_v58 = vpop.xlane.xlu0 %1663 }
 0x369   : > { %v3585_v59 = vmax.f32 %v3579_v55, %v1664_v58  ;;  %v1677_v5 = vmul.f32 1.442695, %v1673_v4 }
 0x36b   : > { %v1674_v60 = vsub.f32 %v3579_v55, %v3585_v59  ;;  %2135 = vst.msk [vmem:[#allocation3 + $0x8] sm:$0xff] %vm1737_vm7, %v3585_v59  ;;  %1692 = vperm.xlu1 %2886, %v3585_v59   ;;  %2951 = vpow2.f32 %v1677_v5  ;;  %v1717_v59 = vld [vmem:[#allocation4] sm:$0xff] }
 0x36d   : > { %v1679_v32 = vmul.f32 1.442695, %v1674_v60 }
 0x375   : > { %v3619_v14 = vpop.eup %2951 }
 0x3a4   : > { %v1666_v7 = vpop.xlane.xlu1 %1665 }
 0x3a5   : > { %v1671_v8 = vmax.f32 %v1659_v6, %v1666_v7 }
 0x3a7   : > { %v1675_v10 = vsub.f32 %v1659_v6, %v1671_v8  ;;  %2136 = vst.msk [vmem:[#allocation3 + $0x10] sm:$0xff] %vm1737_vm7, %v1671_v8  ;;  %1697 = vperm.xlu1 %2886, %v1671_v8   ;;  %v1720_v6 = vld [vmem:[#allocation4 + $0x18] sm:$0xff] }
 0x3a8   : > { %v1668_v11 = vpop.xlane.xlu1 %1667 }
 0x3a9   : > { %v3612_v12 = vmax.f32 %v3608_v9, %v1668_v11  ;;  %v1681_v26 = vmul.f32 1.442695, %v1675_v10 }
 0x3ab   : > { %v1676_v13 = vsub.f32 %v3608_v9, %v3612_v12  ;;  %2137 = vst.msk [vmem:[#allocation3 + $0x18] sm:$0xff] %vm1737_vm7, %v3612_v12  ;;  %1702 = vperm.xlu1 %2886, %v3612_v12   ;;  %v1742_v9 = vld [vmem:[#allocation5] sm:$0xff] }
 0x3af   : > { %1748 = vperm.xlu1 %2886, %v3619_v14  }
 0x3e6   : > { %v1688_v15 = vpop.permute.xlu0 %1687 }
 0x3e7   : > { %v1705_v16 = vsub.f32 %v3553_v25, %v1688_v15  ;;  %v2937_v25 = vld [vmem:[%s3420_s13 + $0xc0] sm:$0xff]  }
 0x3e9   : > { %v1709_v17 = vmul.f32 1.442695, %v1705_v16 }
 0x3ea   : > { %v1693_v19 = vpop.permute.xlu1 %1692 }
 0x3eb   : > { %2953 = vpow2.f32 %v1709_v17  ;;  %v1706_v20 = vsub.f32 %v3555_v30, %v1693_v19  ;;  %v2938_v30 = vld [vmem:[%s3420_s13 + $0x90] sm:$0xff]  }
 0x3ed   : > { %v1711_v21 = vmul.f32 1.442695, %v1706_v20 }
 0x3ef   : > { %2955 = vpow2.f32 %v1711_v21 }
 0x3f0   : > { %2957 = vpow2.f32 %v1681_v26 }
 0x3f1   : > { %2959 = vpow2.f32 %v1679_v32 }
 0x3f5   : > { %v2954_v22 = vpop.eup %2953 }
 0x3f6   : > { %1725 = vadd.xlane.f32.xlu1 %v2954_v22  ;;  %v1770_v24 = vpack.c.bf16 %v2954_v22, %v2954_v22 }
 0x3f8   : > { %2710 = vmatmul.mubr.bf16.vlgmr.msra.gmra.mrb[8].mxu0 %v1770_v24 }
 0x3f9   : > { %v2956_v27 = vpop.eup %2955  ;;  %2734 = vmatpush3.bf16.msra.mxu0 %v2935_v23  ;;  %2749 = vmatprep.mubr.msk.bf16.mxu0 %vm3098_vm6, %v3097_v18 }
 0x3fa   : > { %1727 = vadd.xlane.f32.xlu0 %v2956_v27  ;;  %v1771_v29 = vpack.c.bf16 %v2956_v27, %v2956_v27  ;;  %2735 = vmatprep.subr.bf16.mxu0 %v3097_v18  ;;  %v2958_v38 = vpop.eup %2957 }
 0x3fb   : > { %v2960_v44 = vpop.eup %2959  ;;  %v1723_v4 = vmul.f32 %v2958_v38, %v1719_v3 }
 0x3fc   : > { %2730 = vmatmul.mubr.bf16.vlgmr.msra.gmra.mrb[8].mxu1 %v1771_v29  ;;  %v1722_v63 = vmul.f32 %v2960_v44, %v1718_v61  ;;  %v1745_v29 = vld [vmem:[#allocation5 + $0x18] sm:$0xff] }
 0x3fd   : > { %2736 = vmatpush3.bf16.msra.mxu0 %v2936_v28  ;;  %2754 = vmatpush3.bf16.msra.mxu1 %v2937_v25  ;;  %v1744_v28 = vld [vmem:[#allocation5 + $0x10] sm:$0xff] }
 0x3fe   : > { %2737 = vmatprep.subr.bf16.mxu0 %v3097_v18  ;;  %2755 = vmatprep.subr.bf16.mxu1 %v3097_v18 }
 0x3ff   : > { %2769 = vmatprep.mubr.msk.bf16.mxu1 %vm3098_vm6, %v3097_v18 }
 0x401   : > { %2738 = vmatpush3.bf16.msra.mxu0 %v2938_v30  ;;  %2756 = vmatpush3.bf16.msra.mxu1 %v2939_v31 }
 0x402   : > { %2739 = vmatprep.subr.bf16.mxu0 %v3097_v18  ;;  %2757 = vmatprep.subr.bf16.mxu1 %v3097_v18 }
 0x405   : > { %2740 = vmatpush3.bf16.msra.mxu0 %v2940_v33  ;;  %2758 = vmatpush3.bf16.msra.mxu1 %v2941_v34 }
 0x406   : > { %2741 = vmatprep.subr.bf16.mxu0 %v3097_v18  ;;  %2759 = vmatprep.subr.bf16.mxu1 %v3097_v18 }
 0x407   : > { %1758 = vperm.xlu1 %2886, %v2958_v38  }
 0x409   : > { %2742 = vmatpush3.bf16.msra.mxu0 %v2942_v35  ;;  %2760 = vmatpush3.bf16.msra.mxu1 %v2943_v37 }
 0x40a   : > { %2743 = vmatprep.subr.bf16.mxu0 %v3097_v18  ;;  %2761 = vmatprep.subr.bf16.mxu1 %v3097_v18 }
 0x40d   : > { %2744 = vmatpush3.bf16.msra.mxu0 %v2944_v39  ;;  %2762 = vmatpush3.bf16.msra.mxu1 %v2945_v40 }
 0x40e   : > { %2745 = vmatprep.subr.bf16.mxu0 %v3097_v18  ;;  %2763 = vmatprep.subr.bf16.mxu1 %v3097_v18 }
 0x410   : > { %1753 = vperm.xlu0 %2885, %v2960_v44  }
 0x411   : > { %2746 = vmatpush3.bf16.msra.mxu0 %v2946_v42  ;;  %2764 = vmatpush3.bf16.msra.mxu1 %v2947_v43 }
 0x412   : > { %2747 = vmatprep.subr.bf16.mxu0 %v3097_v18  ;;  %2765 = vmatprep.subr.bf16.mxu1 %v3097_v18 }
 0x415   : > { %2748 = vmatpush3.bf16.msra.mxu0 %v2948_v45  ;;  %2766 = vmatpush3.bf16.msra.mxu1 %v2949_v46 }
 0x416   : > { %2767 = vmatprep.subr.bf16.mxu1 %v3097_v18  ;;  %v1683_v18 = vmul.f32 1.442695, %v1676_v13  ;;  %v1743_v13 = vld [vmem:[#allocation5 + $0x8] sm:$0xff] }
 0x419   : > { %2768 = vmatpush3.bf16.msra.mxu1 %v2950_v47  ;;  %v3100_v47 = vmov (!%p2511_p6), 0  }
 0x41a   : > { %2967 = vset.pattern.permute.xlu0 (!%p2511_p6), %v3100_v47 }
 0x426   : > { %v1698_v48 = vpop.permute.xlu1 %1697 }
 0x427   : > { %v1707_v49 = vsub.f32 %v3559_v36, %v1698_v48 }
 0x429   : > { %v1713_v50 = vmul.f32 1.442695, %v1707_v49 }
 0x42a   : > { %v1703_v51 = vpop.permute.xlu1 %1702 }
 0x42b   : > { %2961 = vpow2.f32 %v1713_v50  ;;  %v1708_v52 = vsub.f32 %v3561_v41, %v1703_v51  ;;  %v1721_v41 = vmul.f32 %v3619_v14, %v1717_v59 }
 0x42d   : > { %v1715_v53 = vmul.f32 1.442695, %v1708_v52 }
 0x42e   : > { %v1749_v58 = vpop.permute.xlu1 %1748 }
 0x42f   : > { %2963 = vpow2.f32 %v1715_v53  ;;  %v1766_v12 = vmul.f32 %v1749_v58, %v1742_v9  ;;  %v2969_v53 = vld [vmem:[%s3754_s6] sm:$0xff] (!%p2511_p6)  }
 0x430   : > { %2965 = vpow2.f32 %v1683_v18  ;;  %v2515_v9 = vld [vmem:[%s3755_s7] ss:$0 sm:$0xff] (!%p2511_p6) }
 0x435   : > { %v2962_v54 = vpop.eup %2961 }
 0x436   : > { %1729 = vadd.xlane.f32.xlu1 %v2962_v54  ;;  %v1772_v55 = vpack.c.bf16 %v2962_v54, %v2962_v54  ;;  %v3101_v54 = vmov (!%p2511_p6), 0.0  }
 0x437   : > { %2773 = vmatprep.subr.bf16.mxu0 (!%p2511_p6), %v3101_v54 }
 0x438   : > { %2750 = vmatmul.mubr.bf16.vlgmr.msra.gmra.mrb[12].mxu0 %v1772_v55 }
 0x439   : > { %v2964_v56 = vpop.eup %2963  ;;  %2774 = vmatpush3.bf16.msra.mxu0 (!%p2511_p6), %v2969_v53  ;;  %2777 = vmatprep.mubr.msk.bf16.mxu0 (!%p2511_p6), %vm3102_vm8, %v3101_v54 }
 0x43a   : > { %1731 = vadd.xlane.f32.xlu1 %v2964_v56  ;;  %v1773_v57 = vpack.c.bf16 %v2964_v56, %v2964_v56  ;;  %v2966_v36 = vpop.eup %2965  ;;  %v2970_v56 = vld [vmem:[%s3754_s6 + $0x8] sm:$0xff] (!%p2511_p6)   ;;  %2775 = vmatprep.subr.bf16.mxu0 (!%p2511_p6), %v3101_v54 }
 0x43b   : > { %v1724_v8 = vmul.f32 %v2966_v36, %v1720_v6 }
 0x43c   : > { %2770 = vmatmul.mubr.bf16.vlgmr.msra.gmra.mrb[12].mxu1 %v1773_v57 }
 0x43d   : > { %2776 = vmatpush3.bf16.msra.mxu0 (!%p2511_p6), %v2970_v56 }
 0x44b   : > { %1763 = vperm.xlu1 %2886, %v2966_v36  }
 0x44f   : > { %2968 = vset.pattern.permute.xlu1 (!%p2511_p6), %v3100_v47 }
 0x483   : > { %v1726_v60 = vpop.xlane.xlu1 %1725 }
 0x484   : > { %v1733_v62 = vadd.f32 %v1726_v60, %v1721_v41 }
 0x486   : > { %1738 = vst.msk [vmem:[#allocation4] sm:$0xff] %vm1737_vm7, %v1733_v62 }
 0x487   : > { %v1728_v0 = vpop.xlane.xlu0 %1727  ;;  %v1759_v2 = vpop.permute.xlu1 %1758 }
 0x488   : > { %v1734_v1 = vadd.f32 %v1728_v0, %v1722_v63  ;;  %v1768_v25 = vmul.f32 %v1759_v2, %v1744_v28 }
 0x48a   : > { %1739 = vst.msk [vmem:[#allocation4 + $0x8] sm:$0xff] %vm1737_vm7, %v1734_v1 }
 0x48d   : > { %v2142_v48 = vld [vmem:[#allocation4] sm:$0xff] (!%p2511_p6) }
 0x48f   : > { %v1754_v14 = vpop.permute.xlu0 %1753 }
 0x490   : > { %v1767_v20 = vmul.f32 %v1754_v14, %v1743_v13 }
 0x491   : > { %v2143_v44 = vld [vmem:[#allocation4 + $0x8] sm:$0xff] (!%p2511_p6) }
 0x492   : > { %2971 = vrcp.f32 (!%p2511_p6), %v2143_v44 }
 0x49c   : > { %v2972_v49 = vpop.eup (!%p2511_p6), %2971 }
 0x49d   : > { %2161 = vperm.xlu0 (!%p2511_p6), %2967, %v2972_v49  }
 0x4c3   : > { %v1730_v5 = vpop.xlane.xlu1 %1729 }
 0x4c4   : > { %v1735_v7 = vadd.f32 %v1730_v5, %v1723_v4 }
 0x4c6   : > { %1740 = vst.msk [vmem:[#allocation4 + $0x10] sm:$0xff] %vm1737_vm7, %v1735_v7 }
 0x4c7   : > { %v1732_v10 = vpop.xlane.xlu1 %1731 }
 0x4c8   : > { %v1736_v11 = vadd.f32 %v1732_v10, %v1724_v8 }
 0x4ca   : > { %1741 = vst.msk [vmem:[#allocation4 + $0x18] sm:$0xff] %vm1737_vm7, %v1736_v11 }
 0x4cb   : > { %v1856_v15 = vpop.f32.mrb[8].mxu0  ;;  %v1764_v30 = vpop.permute.xlu1 %1763 }
 0x4cc   : > { %v2126_v16 = vadd.f32 %v1856_v15, %v1766_v12  ;;  %v2711_v17 = vpop.f32.mrb[9].mxu0  ;;  %v1769_v35 = vmul.f32 %v1764_v30, %v1745_v29 }
 0x4cd   : > { %v1859_v19 = vpop.f32.mrb[10].mxu0  ;;  %v2144_v46 = vld [vmem:[#allocation4 + $0x10] sm:$0xff] (!%p2511_p6) }
 0x4ce   : > { %2130 = vst.msk [vmem:[#allocation5] sm:$0xff] %vm1268_vm5, %v2126_v16  ;;  %v2712_v21 = vpop.f32.mrb[11].mxu0 }
 0x4cf   : > { %v1944_v22 = vpop.f32.mrb[8].mxu1 }
 0x4d0   : > { %v2127_v23 = vadd.f32 %v1944_v22, %v1767_v20  ;;  %v2731_v24 = vpop.f32.mrb[9].mxu1 }
 0x4d1   : > { %v1947_v26 = vpop.f32.mrb[10].mxu1  ;;  %v2145_v45 = vld [vmem:[#allocation4 + $0x18] sm:$0xff] (!%p2511_p6) }
 0x4d2   : > { %2131 = vst.msk [vmem:[#allocation5 + $0x8] sm:$0xff] %vm1268_vm5, %v2127_v23  ;;  %v2732_v27 = vpop.f32.mrb[11].mxu1  ;;  %2973 = vrcp.f32 (!%p2511_p6), %v2145_v45 }
 0x4d3   : > { %2975 = vrcp.f32 (!%p2511_p6), %v2144_v46 }
 0x4d4   : > { %2977 = vrcp.f32 (!%p2511_p6), %v2142_v48 }
 0x4d5   : > { %v2150_v61 = vld [vmem:[#allocation5] sm:$0xff] (!%p2511_p6) }
 0x4d9   : > { %v2151_v55 = vld [vmem:[#allocation5 + $0x8] sm:$0xff] (!%p2511_p6) }
 0x4dc   : > { %v2974_v50 = vpop.eup (!%p2511_p6), %2973 }
 0x4dd   : > { %v2976_v51 = vpop.eup (!%p2511_p6), %2975  ;;  %2171 = vperm.xlu1 (!%p2511_p6), %2968, %v2974_v50  }
 0x4de   : > { %v2978_v52 = vpop.eup (!%p2511_p6), %2977  ;;  %2166 = vperm.xlu0 (!%p2511_p6), %2967, %v2976_v51  }
 0x4e1   : > { %2156 = vperm.xlu1 (!%p2511_p6), %2968, %v2978_v52  }
 0x50b   : > { %v2032_v31 = vpop.f32.mrb[12].mxu0 }
 0x50c   : > { %v2128_v32 = vadd.f32 %v2032_v31, %v1768_v25  ;;  %v2751_v33 = vpop.f32.mrb[13].mxu0  ;;  %2141 = sbr.rel (%p2511_p6) target bundleno = 1717 (0x6b5), region = 142 }
 0x50d   : > { %v2035_v34 = vpop.f32.mrb[14].mxu0 }
 0x50e   : > { %2132 = vst.msk [vmem:[#allocation5 + $0x10] sm:$0xff] %vm1268_vm5, %v2128_v32  ;;  %v2752_v37 = vpop.f32.mrb[15].mxu0 }
 0x50f   : > { %v2120_v38 = vpop.f32.mrb[12].mxu1 }
 0x510   : > { %v2129_v39 = vadd.f32 %v2120_v38, %v1769_v35  ;;  %v2771_v40 = vpop.f32.mrb[13].mxu1 }
 0x511   : > { %v2123_v42 = vpop.f32.mrb[14].mxu1 }
 0x512   : > { %2133 = vst.msk [vmem:[#allocation5 + $0x18] sm:$0xff] %vm1268_vm5, %v2129_v39  ;;  %v2772_v43 = vpop.f32.mrb[15].mxu1 }
 0x515   : > { %v2152_v41 = vld [vmem:[#allocation5 + $0x10] sm:$0xff] }
 0x519   : > { %v2153_v57 = vld [vmem:[#allocation5 + $0x18] sm:$0xff] }
 0x51c   : > { %v2162_v18 = vpop.permute.xlu0 %2161 }
 0x51d   : > { %v2175_v36 = vmul.f32 %v2162_v18, %v2151_v55 }
 0x51f   : > { %v2524_v60 = vpack.c.bf16 %v2175_v36, %v2175_v36 }
 0x521   : > { %2185 = vrot.lane.b32.xlu0 %v2524_v60, %s3103_s15 }
 0x55c   : > { %v2172_v58 = vpop.permute.xlu1 %2171 }
 0x55d   : > { %v2177_v59 = vmul.f32 %v2172_v58, %v2153_v57  ;;  %v2167_v62 = vpop.permute.xlu0 %2166 }
 0x55e   : > { %v2176_v0 = vmul.f32 %v2167_v62, %v2152_v41 }
 0x55f   : > { %v2526_v63 = vpack.c.bf16 %v2177_v59, %v2177_v59 }
 0x560   : > { %v2157_v1 = vpop.permute.xlu1 %2156  ;;  %v2525_v3 = vpack.c.bf16 %v2176_v0, %v2176_v0 }
 0x561   : > { %v2174_v2 = vmul.f32 %v2157_v1, %v2150_v61  ;;  %2203 = vrot.lane.b32.xlu0 %v2526_v63, %s3105_s18 }
 0x562   : > { %2194 = vrot.lane.b32.xlu1 %v2525_v3, %s3104_s27 }
 0x563   : > { %v2178_v4 = vpack.c.bf16 %v2174_v2, %v2174_v2 }
 0x565   : > { %2180 = vst.msk [vmem:[#allocation6] sm:$0xf] %vm2179_vm9, %v2178_v4 }
 0x593   : > { %v2186_v5 = vpop.permute.xlu0 %2185 }
 0x594   : > { %2189 = vst.msk [vmem:[#allocation6] sm:$0xf] %vm2188_vm10, %v2186_v5 }
 0x5d3   : > { %v2204_v7 = vpop.permute.xlu0 %2203 }
 0x5d4   : > { %v2195_v6 = vpop.permute.xlu1 %2194 }
 0x5d5   : > { %2198 = vst.msk [vmem:[#allocation6] sm:$0xf] %vm2197_vm11, %v2195_v6 }
 0x5d6   : > { %2207 = vst.msk [vmem:[#allocation6] sm:$0xf] %vm2206_vm12, %v2204_v7 }
 0x5dd   : > { %v2208_v8 = vld [vmem:[#allocation6] sm:$0xf] }
 0x5de   : > { %2778 = vmatmul.mubr.msk.bf16.vlgmr.msra.gmra.mrb[0].mxu0 %vm2232_vm13, %v2208_v8 }
 0x6b1   : > { %v2270_v10 = vpop.f32.mrb[0].mxu0 }
 0x6b2   : > { %v2271_v11 = vadd.f32 %v2515_v9, %v2270_v10  ;;  %v2779_v12 = vpop.f32.mrb[1].mxu0 }
 0x6b3   : > { %v2273_v13 = vpop.f32.mrb[2].mxu0 }
 0x6b4   : > { %2276 = vst.msk [vmem:[%s965_s12] sm:$0xff] %vm2232_vm13, %v2271_v11  ;;  %v2780_v14 = vpop.f32.mrb[3].mxu0 }
 0x6b5 PF: > { %s2520_s24 = sshll.u32 %s3077_s11, 7  ;;  %s2291_s2 = sshll.u32 %s965_s12, 4  ;;  %s2292_s2 = int_to_ptr.vmem [resolvable:$true] %s2291_s2 }
 0x6b6   : > { %s3691_s30 = scalar_lea.hbm %s3756_s8, %s2520_s24  ;;  %s3778_s1 = sand.u32 1, %s3057_s28  }
 0x6b7   : > { %s2278_s10 = scalar_lea.sflag [#allocation10], %s3778_s1  ;;  %s2979_s13 = scalar_lea.vmem %s2292_s2, 128 }
 0x6b8   : > { %p2980_p8 = scmp.ne.s32.totalorder %s2292_s2, %s2979_s13  ;;  %s3106_s19 = smov [#allocation9]  }
 0x6b9   : > { %s2983_s21 = sshll.u32 %s3106_s19, 4  ;;  %s2984_s21 = int_to_ptr.vmem [resolvable:$false] %s2983_s21 }
 0x6ba   : > { %p2981_p9 = pnand %p2980_p8, %p3224_p7  ;;  %s2985_s15 = scalar_lea.vmem %s2984_s21, 256 }
 0x6bb   : > { %p2986_p11 = scmp.lt.s32.totalorder %s2292_s2, %s2984_s21  ;;  %p2987_p13 = scmp.lt.s32.totalorder %s2985_s15, %s2979_s13 }
 0x6bc   : > { %p2982_p10 = pneg %p2981_p9 }
 0x6bd   : > { %p2988_p0 = por %p2987_p13, %p2986_p11 }
 0x6bf   : > { %p2989_p1 = pnand %p2988_p0, %p2982_p10 }
 0x6c1   : > { %2992 = shalt.err (!%p2989_p1)
}
 0x6c2   : > { %s2993_s11 = scalar_lea.hbm %s3691_s30, 128  ;;  %s2997_s27 = scalar_lea.hbm %s3756_s8, 256 }
 0x6c3   : > { %p2994_p2 = scmp.ne.s32.totalorder %s3691_s30, %s2993_s11  ;;  %p2998_p5 = scmp.lt.u32.totalorder %s3691_s30, %s3756_s8 }
 0x6c4   : > { %p2999_p6 = scmp.lt.u32.totalorder %s2997_s27, %s2993_s11  ;;  %p3001_p9 = scmp.lt.u32.totalorder %s2993_s11, %s3691_s30 }
 0x6c5   : > { %p2995_p3 = pnand %p2994_p2, %p3224_p7 }
 0x6c6   : > { %p3000_p8 = por %p2999_p6, %p2998_p5 }
 0x6c7   : > { %p2996_p4 = pneg %p2995_p3 }
 0x6c8   : > { %p3002_p10 = por %p3001_p9, %p3000_p8 }
 0x6ca   : > { %p3003_p11 = pnand %p3002_p10, %p2996_p4 }
 0x6cc   : > { %3006 = shalt.err (!%p3003_p11)
}
 0x6cd   : > { %2781 = dma.vmem_to_hbm [thread:$0]  (%p3224_p7), %s2292_s2, 128, %s3691_s30, %s2278_s10  }
 0x6ce PF: > { %s3779_s20 = sld [smem:[#allocation12_spill]]  ;;  %p2787_p13 = scmp.ge.s32.totalorder %s3089_s14, 2 }
 0x6d0   : > { %p2784_p0 = pnand %p2787_p13, %p3232_p12 }
 0x6d4   : > { %s2303_s25 = sand.u32 1, %s3779_s20  }
 0x6d5   : > { %s2304_s22 = scalar_lea.sflag [#allocation10], %s2303_s25 }
 0x6d6   : > { %3048 = dma.done.wait (!%p2784_p0), %s2304_s22, 128  }
 0x6d7   : > { %3050 = vsyncadd (!%p2784_p0), %s2304_s22, 4294967168  ;;  %s21_s14 = sadd.s32 1, %s3089_s14   ;;  %s3781_s23 = sld [smem:[#allocation18_spill]] }
 0x6d8   : > { %p18_p1 = scmp.ge.s32.totalorder %s21_s14, 6   ;;  %s3782_s10 = sld [smem:[#allocation13_spill]] }
 0x6d9   : > { %s3783_s11 = sld [smem:[#allocation14_spill]]  ;;  %s3784_s12 = sld [smem:[#allocation15_spill]] }
 0x6da   : > { %s3785_s13 = sld [smem:[#allocation16_spill]]  ;;  %s3786_s27 = smov %s3057_s28 }
 0x6db   : > { %s3787_s28 = smov %s3061_s29  ;;  %s3788_s29 = smov %s3237_s17 }
 0x6dc   : > { %s3789_s30 = smov %s3069_s9  ;;  %20 = sbr.rel (!%p18_p1) target bundleno = 9 (0x9), region = 199 }
 0x6dd   : > { %s3790_s9 = smov %s3781_s23 }
 0x6e3   :  { %2309 = vsyncpa [#allocation10], 1 }
 0x6e4   :  { %2311 = vsyncpa [#allocation10 + $0x1], 1 }

// kernel: tpu_custom_call.1
= control target key start
LH: loop header
LB: loop body
LE: loop exit
PB: predicated region body
PF: predicated region fallthrough
CT: control target
= control target key end

     0   :  { %s3748_s0 = inlined_call_operand.vmem [shape: f32[2,8,32], index: 0, kind: input, shape index: {}]   ;;  %s3749_s1 = inlined_call_operand.vmem [shape: bf16[2,4,256,8], index: 1, kind: input, shape index: {}]   ;;  %s3750_s2 = inlined_call_operand.vmem [shape: bf16[2,4,256,8], index: 2, kind: input, shape index: {}]   ;;  %s3751_s3 = inlined_call_operand.vmem [shape: f32[2,1,256], index: 3, kind: input, shape index: {}]   ;;  %s3752_s4 = inlined_call_operand.vmem [shape: bf16[32,32], index: 4, kind: input, shape index: {}]   ;;  %s3753_s5 = inlined_call_operand.vmem [shape: f32[1,32], index: 5, kind: input, shape index: {}]   ;;  %s3754_s6 = inlined_call_operand.vmem [shape: bf16[32,32], index: 6, kind: input, shape index: {}]   ;;  %s3755_s7 = inlined_call_operand.vmem [shape: f32[1,32], index: 7, kind: input, shape index: {}]   ;;  %s3756_s8 = inlined_call_operand.hbm [shape: f32[2,8,32], index: 8, kind: output, shape index: {}]  }
   0x1   :  { %3764 = sst [smem:[#allocation19_spill]] %s3749_s1 }
   0x2   :  { %3765 = sst [smem:[#allocation20_spill]] %s3750_s2 }
   0x3   :  { %13 = vsyncpa [#allocation10], 0 }
   0x4   :  { %15 = vsyncpa [#allocation10 + $0x1], 0  ;;  %s3152_s27 = smov 0   ;;  %s3154_s28 = smov 0  }
   0x5   :  { %s3156_s29 = smov 0   ;;  %s3158_s30 = smov 0  }
   0x6   :  { %s3160_s9 = smov 0   ;;  %s3162_s10 = smov 0  }
   0x7   :  { %s3164_s11 = smov 0   ;;  %s3166_s12 = smov 0  }
   0x8   :  { %s3168_s13 = smov 0   ;;  %s3170_s14 = smov 0  }
   0x9 LB: > { %3766 = sst [smem:[#allocation12_spill]] %s3053_s27  ;;  %s2418_s15 = sadd.s32 4294967295, %s3089_s14   ;;  %s3089_s14 = sphi %s3170_s14, %s21_s14   ;;  %s3085_s13 = sphi %s3168_s13, %s3785_s13   ;;  %s3081_s12 = sphi %s3166_s12, %s3784_s12   ;;  %s3077_s11 = sphi %s3164_s11, %s3783_s11   ;;  %s3073_s10 = sphi %s3162_s10, %s3782_s10   ;;  %s3069_s9 = sphi %s3160_s9, %s3790_s9   ;;  %s3065_s30 = sphi %s3158_s30, %s3789_s30   ;;  %s3061_s29 = sphi %s3156_s29, %s3788_s29   ;;  %s3057_s28 = sphi %s3154_s28, %s3787_s28   ;;  %s3053_s27 = sphi %s3152_s27, %s3786_s27  }
   0xa   : > { %3767 = sst [smem:[#allocation13_spill]] %s3081_s12  ;;  %s2419_s16 = sadd.s32 4294967294, %s3089_s14  }
   0xb   : > { %3768 = sst [smem:[#allocation14_spill]] %s3085_s13  ;;  %s30_s17 = sadd.s32 1, %s3081_s12 }
   0xc   : > { %s33_s18 = sadd.s32 1, %s3085_s13  ;;  %p31_p0 = scmp.ge.s32.totalorder %s30_s17, 2 }
   0xd   : > { %s68_s19 = sadd.s32 1, %s3069_s9  ;;  %p75_p1 = scmp.ne.s32.totalorder %s3069_s9, %s3065_s30 }
   0xe   : > { %p76_p2 = scmp.eq.s32.totalorder %s3089_s14, 0  ;;  %s3792_s17 = smov (%p31_p0, %s30_s17), 0 }
   0xf   : > { %3769 = sst [smem:[#allocation15_spill]] %s3792_s17  ;;  %s3794_s18 = smov (!%p31_p0, %s33_s18), %s3085_s13 }
  0x10   : > { %s64_s20 = ssub.s32 %s3081_s12, %s3792_s17  ;;  %p3215_p3 = por %p76_p2, %p75_p1 }
  0x11   : > { %p35_p4 = scmp.ge.s32.totalorder %s3794_s18, 2  ;;  %s234_s22 = sadd.s32 1, %s3061_s29 }
  0x12   : > { %p244_p5 = scmp.ne.s32.totalorder %s3061_s29, %s3057_s28  ;;  %p245_p6 = scmp.eq.s32.totalorder %s2418_s15, 3 }
  0x13   : > { %s3796_s18 = smov (%p35_p4, %s3794_s18), 0  ;;  %p250_p8 = scmp.ne.s32.totalorder %s3057_s28, %s3053_s27 }
  0x14   : > { %3771 = sst [smem:[#allocation16_spill]] %s3796_s18  ;;  %p3224_p7 = por %p245_p6, %p244_p5 }
  0x15   : > { %s63_s24 = ssub.s32 %s3085_s13, %s3796_s18  ;;  %p251_p9 = scmp.eq.s32.totalorder %s2419_s16, 3 }
  0x16   : > { %s65_s25 = sor.u32 %s64_s20, %s63_s24  ;;  %p232_p10 = scmp.eq.s32.totalorder %s63_s24, 0 }
  0x17   : > { %p66_p11 = scmp.eq.s32.totalorder %s65_s25, 0  ;;  %p3232_p12 = por %p251_p9, %p250_p8 }
  0x18   : > { %s3237_s17 = scalar_select %p232_p10, %s3061_s29, %s234_s22  }
  0x19   : > { %s3773_s26 = scalar_select %p3232_p12, 1, 0 }
  0x1a   : > { %s3240_s15 = scalar_select %p66_p11, %s3069_s9, %s68_s19  }
  0x1b   : > { %3774 = sst [smem:[#allocation17_spill]] %s3773_s26  ;;  %p2421_p13 = scmp.ge.s32.totalorder %s3089_s14, 4 }
  0x1c   : > { %3775 = sst [smem:[#allocation18_spill]] %s3240_s15 }
  0x1d   : > { %279 = sbr.rel (%p2421_p13) target bundleno = 88 (0x58), region = 32 }
  0x24   : > { %289 = sbr.rel (!%p3215_p3) target bundleno = 62 (0x3e), region = 40  ;;  %s291_s16 = sand.u32 (%p3215_p3), 1, %s3069_s9  }
  0x25   : > { %s2423_s20 = sshll.u32 (%p3215_p3), %s3081_s12, 4  ;;  %s2422_s24 = sshll.u32 (%p3215_p3), %s291_s16, 8 }
  0x26   : > { %s2424_s25 = sshll.u32 (%p3215_p3), %s3085_s13, 7  ;;  %s3776_s1 = sld [smem:[#allocation19_spill]] (%p3215_p3) }
  0x27   : > { %s296_s18 = sadd.s32 (%p3215_p3), %s2424_s25, %s2423_s20  ;;  %s3256_s16 = scalar_lea.vmem (%p3215_p3), [#allocation7], %s2422_s24 }
  0x28   : > { %s2425_s27 = sshll.u32 (%p3215_p3), %s296_s18, 2 }
  0x2c   : > { %s3251_s19 = scalar_lea.vmem %s3776_s1, %s2425_s27 }
  0x2d   : > { %v314_v0 = vld [vmem:[%s3251_s19] sm:$0xff]   ;;  %v318_v1 = vld [vmem:[%s3251_s19 + $0x8] sm:$0xff]   ;;  %v322_v2 = vld [vmem:[%s3251_s19 + $0x10] sm:$0xff]  }
  0x2e   : > { %315 = vst [vmem:[%s3256_s16] sm:$0xff] %v314_v0   ;;  %319 = vst [vmem:[%s3256_s16 + $0x8] sm:$0xff] %v318_v1   ;;  %v326_v3 = vld [vmem:[%s3251_s19 + $0x18] sm:$0xff]   ;;  %v330_v4 = vld [vmem:[%s3251_s19 + $0x20] sm:$0xff]  }
  0x2f   : > { %323 = vst [vmem:[%s3256_s16 + $0x10] sm:$0xff] %v322_v2   ;;  %v334_v5 = vld [vmem:[%s3251_s19 + $0x28] sm:$0xff]   ;;  %327 = vst [vmem:[%s3256_s16 + $0x18] sm:$0xff] %v326_v3   ;;  %v338_v6 = vld [vmem:[%s3251_s19 + $0x30] sm:$0xff]  }
  0x30   : > { %331 = vst [vmem:[%s3256_s16 + $0x20] sm:$0xff] %v330_v4   ;;  %335 = vst [vmem:[%s3256_s16 + $0x28] sm:$0xff] %v334_v5   ;;  %v342_v7 = vld [vmem:[%s3251_s19 + $0x38] sm:$0xff]   ;;  %v346_v8 = vld [vmem:[%s3251_s19 + $0x80] sm:$0xff]  }
  0x31   : > { %339 = vst [vmem:[%s3256_s16 + $0x30] sm:$0xff] %v338_v6   ;;  %343 = vst [vmem:[%s3256_s16 + $0x38] sm:$0xff] %v342_v7   ;;  %v350_v9 = vld [vmem:[%s3251_s19 + $0x88] sm:$0xff]   ;;  %v354_v10 = vld [vmem:[%s3251_s19 + $0x90] sm:$0xff]  }
  0x32   : > { %347 = vst [vmem:[%s3256_s16 + $0x40] sm:$0xff] %v346_v8   ;;  %v358_v11 = vld [vmem:[%s3251_s19 + $0x98] sm:$0xff]   ;;  %351 = vst [vmem:[%s3256_s16 + $0x48] sm:$0xff] %v350_v9   ;;  %v362_v12 = vld [vmem:[%s3251_s19 + $0xa0] sm:$0xff]  }
  0x33   : > { %355 = vst [vmem:[%s3256_s16 + $0x50] sm:$0xff] %v354_v10   ;;  %359 = vst [vmem:[%s3256_s16 + $0x58] sm:$0xff] %v358_v11   ;;  %v366_v13 = vld [vmem:[%s3251_s19 + $0xa8] sm:$0xff]   ;;  %v370_v14 = vld [vmem:[%s3251_s19 + $0xb0] sm:$0xff]  }
  0x34   : > { %363 = vst [vmem:[%s3256_s16 + $0x60] sm:$0xff] %v362_v12   ;;  %367 = vst [vmem:[%s3256_s16 + $0x68] sm:$0xff] %v366_v13   ;;  %v374_v15 = vld [vmem:[%s3251_s19 + $0xb8] sm:$0xff]   ;;  %v378_v16 = vld [vmem:[%s3251_s19 + $0x100] sm:$0xff]  }
  0x35   : > { %371 = vst [vmem:[%s3256_s16 + $0x70] sm:$0xff] %v370_v14   ;;  %v382_v17 = vld [vmem:[%s3251_s19 + $0x108] sm:$0xff]   ;;  %375 = vst [vmem:[%s3256_s16 + $0x78] sm:$0xff] %v374_v15   ;;  %v386_v18 = vld [vmem:[%s3251_s19 + $0x110] sm:$0xff]  }
  0x36   : > { %379 = vst [vmem:[%s3256_s16 + $0x80] sm:$0xff] %v378_v16   ;;  %383 = vst [vmem:[%s3256_s16 + $0x88] sm:$0xff] %v382_v17   ;;  %v390_v19 = vld [vmem:[%s3251_s19 + $0x118] sm:$0xff]   ;;  %v394_v20 = vld [vmem:[%s3251_s19 + $0x120] sm:$0xff]  }
  0x37   : > { %387 = vst [vmem:[%s3256_s16 + $0x90] sm:$0xff] %v386_v18   ;;  %391 = vst [vmem:[%s3256_s16 + $0x98] sm:$0xff] %v390_v19   ;;  %v398_v21 = vld [vmem:[%s3251_s19 + $0x128] sm:$0xff]   ;;  %v402_v22 = vld [vmem:[%s3251_s19 + $0x130] sm:$0xff]  }
  0x38   : > { %395 = vst [vmem:[%s3256_s16 + $0xa0] sm:$0xff] %v394_v20   ;;  %v406_v23 = vld [vmem:[%s3251_s19 + $0x138] sm:$0xff]   ;;  %399 = vst [vmem:[%s3256_s16 + $0xa8] sm:$0xff] %v398_v21   ;;  %v410_v24 = vld [vmem:[%s3251_s19 + $0x180] sm:$0xff]  }
  0x39   : > { %403 = vst [vmem:[%s3256_s16 + $0xb0] sm:$0xff] %v402_v22   ;;  %407 = vst [vmem:[%s3256_s16 + $0xb8] sm:$0xff] %v406_v23   ;;  %v414_v25 = vld [vmem:[%s3251_s19 + $0x188] sm:$0xff]   ;;  %v418_v26 = vld [vmem:[%s3251_s19 + $0x190] sm:$0xff]  }
  0x3a   : > { %411 = vst [vmem:[%s3256_s16 + $0xc0] sm:$0xff] %v410_v24   ;;  %415 = vst [vmem:[%s3256_s16 + $0xc8] sm:$0xff] %v414_v25   ;;  %v422_v27 = vld [vmem:[%s3251_s19 + $0x198] sm:$0xff]   ;;  %v426_v28 = vld [vmem:[%s3251_s19 + $0x1a0] sm:$0xff]  }
  0x3b   : > { %419 = vst [vmem:[%s3256_s16 + $0xd0] sm:$0xff] %v418_v26   ;;  %v430_v29 = vld [vmem:[%s3251_s19 + $0x1a8] sm:$0xff]   ;;  %423 = vst [vmem:[%s3256_s16 + $0xd8] sm:$0xff] %v422_v27   ;;  %v434_v30 = vld [vmem:[%s3251_s19 + $0x1b0] sm:$0xff]  }
  0x3c   : > { %427 = vst [vmem:[%s3256_s16 + $0xe0] sm:$0xff] %v426_v28   ;;  %431 = vst [vmem:[%s3256_s16 + $0xe8] sm:$0xff] %v430_v29   ;;  %v438_v31 = vld [vmem:[%s3251_s19 + $0x1b8] sm:$0xff]  }
  0x3d   : > { %435 = vst [vmem:[%s3256_s16 + $0xf0] sm:$0xff] %v434_v30   ;;  %439 = vst [vmem:[%s3256_s16 + $0xf8] sm:$0xff] %v438_v31  }
  0x3e PF: > { %592 = sbr.rel (!%p3215_p3) target bundleno = 88 (0x58), region = 81  ;;  %s594_s27 = sand.u32 (%p3215_p3), 1, %s3069_s9  }
  0x3f   : > { %s2427_s18 = sshll.u32 (%p3215_p3), %s3081_s12, 4  ;;  %s2426_s26 = sshll.u32 (%p3215_p3), %s594_s27, 8 }
  0x40   : > { %s2428_s20 = sshll.u32 (%p3215_p3), %s3085_s13, 7  ;;  %s3777_s2 = sld [smem:[#allocation20_spill]] (%p3215_p3) }
  0x41   : > { %s599_s24 = sadd.s32 (%p3215_p3), %s2428_s20, %s2427_s18  ;;  %s3332_s21 = scalar_lea.vmem (%p3215_p3), [#allocation8], %s2426_s26 }
  0x42   : > { %s2429_s25 = sshll.u32 (%p3215_p3), %s599_s24, 2 }
  0x46   : > { %s3327_s15 = scalar_lea.vmem %s3777_s2, %s2429_s25 }
  0x47   : > { %v617_v32 = vld [vmem:[%s3327_s15] sm:$0xff]   ;;  %v621_v33 = vld [vmem:[%s3327_s15 + $0x8] sm:$0xff]   ;;  %v625_v34 = vld [vmem:[%s3327_s15 + $0x10] sm:$0xff]  }
  0x48   : > { %618 = vst [vmem:[%s3332_s21] sm:$0xff] %v617_v32   ;;  %622 = vst [vmem:[%s3332_s21 + $0x8] sm:$0xff] %v621_v33   ;;  %v629_v35 = vld [vmem:[%s3327_s15 + $0x18] sm:$0xff]   ;;  %v633_v36 = vld [vmem:[%s3327_s15 + $0x20] sm:$0xff]  }
  0x49   : > { %626 = vst [vmem:[%s3332_s21 + $0x10] sm:$0xff] %v625_v34   ;;  %v637_v37 = vld [vmem:[%s3327_s15 + $0x28] sm:$0xff]   ;;  %630 = vst [vmem:[%s3332_s21 + $0x18] sm:$0xff] %v629_v35   ;;  %v641_v38 = vld [vmem:[%s3327_s15 + $0x30] sm:$0xff]  }
  0x4a   : > { %634 = vst [vmem:[%s3332_s21 + $0x20] sm:$0xff] %v633_v36   ;;  %638 = vst [vmem:[%s3332_s21 + $0x28] sm:$0xff] %v637_v37   ;;  %v645_v39 = vld [vmem:[%s3327_s15 + $0x38] sm:$0xff]   ;;  %v649_v40 = vld [vmem:[%s3327_s15 + $0x80] sm:$0xff]  }
  0x4b   : > { %642 = vst [vmem:[%s3332_s21 + $0x30] sm:$0xff] %v641_v38   ;;  %646 = vst [vmem:[%s3332_s21 + $0x38] sm:$0xff] %v645_v39   ;;  %v653_v41 = vld [vmem:[%s3327_s15 + $0x88] sm:$0xff]   ;;  %v657_v42 = vld [vmem:[%s3327_s15 + $0x90] sm:$0xff]  }
  0x4c   : > { %650 = vst [vmem:[%s3332_s21 + $0x40] sm:$0xff] %v649_v40   ;;  %v661_v43 = vld [vmem:[%s3327_s15 + $0x98] sm:$0xff]   ;;  %654 = vst [vmem:[%s3332_s21 + $0x48] sm:$0xff] %v653_v41   ;;  %v665_v44 = vld [vmem:[%s3327_s15 + $0xa0] sm:$0xff]  }
  0x4d   : > { %658 = vst [vmem:[%s3332_s21 + $0x50] sm:$0xff] %v657_v42   ;;  %662 = vst [vmem:[%s3332_s21 + $0x58] sm:$0xff] %v661_v43   ;;  %v669_v45 = vld [vmem:[%s3327_s15 + $0xa8] sm:$0xff]   ;;  %v673_v46 = vld [vmem:[%s3327_s15 + $0xb0] sm:$0xff]  }
  0x4e   : > { %666 = vst [vmem:[%s3332_s21 + $0x60] sm:$0xff] %v665_v44   ;;  %670 = vst [vmem:[%s3332_s21 + $0x68] sm:$0xff] %v669_v45   ;;  %v677_v47 = vld [vmem:[%s3327_s15 + $0xb8] sm:$0xff]   ;;  %v681_v48 = vld [vmem:[%s3327_s15 + $0x100] sm:$0xff]  }
  0x4f   : > { %674 = vst [vmem:[%s3332_s21 + $0x70] sm:$0xff] %v673_v46   ;;  %v685_v49 = vld [vmem:[%s3327_s15 + $0x108] sm:$0xff]   ;;  %678 = vst [vmem:[%s3332_s21 + $0x78] sm:$0xff] %v677_v47   ;;  %v689_v50 = vld [vmem:[%s3327_s15 + $0x110] sm:$0xff]  }
  0x50   : > { %682 = vst [vmem:[%s3332_s21 + $0x80] sm:$0xff] %v681_v48   ;;  %686 = vst [vmem:[%s3332_s21 + $0x88] sm:$0xff] %v685_v49   ;;  %v693_v51 = vld [vmem:[%s3327_s15 + $0x118] sm:$0xff]   ;;  %v697_v52 = vld [vmem:[%s3327_s15 + $0x120] sm:$0xff]  }
  0x51   : > { %690 = vst [vmem:[%s3332_s21 + $0x90] sm:$0xff] %v689_v50   ;;  %694 = vst [vmem:[%s3332_s21 + $0x98] sm:$0xff] %v693_v51   ;;  %v701_v53 = vld [vmem:[%s3327_s15 + $0x128] sm:$0xff]   ;;  %v705_v54 = vld [vmem:[%s3327_s15 + $0x130] sm:$0xff]  }
  0x52   : > { %698 = vst [vmem:[%s3332_s21 + $0xa0] sm:$0xff] %v697_v52   ;;  %v709_v55 = vld [vmem:[%s3327_s15 + $0x138] sm:$0xff]   ;;  %702 = vst [vmem:[%s3332_s21 + $0xa8] sm:$0xff] %v701_v53   ;;  %v713_v56 = vld [vmem:[%s3327_s15 + $0x180] sm:$0xff]  }
  0x53   : > { %706 = vst [vmem:[%s3332_s21 + $0xb0] sm:$0xff] %v705_v54   ;;  %710 = vst [vmem:[%s3332_s21 + $0xb8] sm:$0xff] %v709_v55   ;;  %v717_v57 = vld [vmem:[%s3327_s15 + $0x188] sm:$0xff]   ;;  %v721_v58 = vld [vmem:[%s3327_s15 + $0x190] sm:$0xff]  }
  0x54   : > { %714 = vst [vmem:[%s3332_s21 + $0xc0] sm:$0xff] %v713_v56   ;;  %718 = vst [vmem:[%s3332_s21 + $0xc8] sm:$0xff] %v717_v57   ;;  %v725_v59 = vld [vmem:[%s3327_s15 + $0x198] sm:$0xff]   ;;  %v729_v60 = vld [vmem:[%s3327_s15 + $0x1a0] sm:$0xff]  }
  0x55   : > { %722 = vst [vmem:[%s3332_s21 + $0xd0] sm:$0xff] %v721_v58   ;;  %v733_v61 = vld [vmem:[%s3327_s15 + $0x1a8] sm:$0xff]   ;;  %726 = vst [vmem:[%s3332_s21 + $0xd8] sm:$0xff] %v725_v59   ;;  %v737_v62 = vld [vmem:[%s3327_s15 + $0x1b0] sm:$0xff]  }
  0x56   : > { %730 = vst [vmem:[%s3332_s21 + $0xe0] sm:$0xff] %v729_v60   ;;  %734 = vst [vmem:[%s3332_s21 + $0xe8] sm:$0xff] %v733_v61   ;;  %v741_v63 = vld [vmem:[%s3327_s15 + $0x1b8] sm:$0xff]  }
  0x57   : > { %738 = vst [vmem:[%s3332_s21 + $0xf0] sm:$0xff] %v737_v62   ;;  %742 = vst [vmem:[%s3332_s21 + $0xf8] sm:$0xff] %v741_v63  }
  0x58 PF: > { %p2430_p0 = scmp.ge.s32.totalorder %s3089_s14, 1  ;;  %p904_p1 = scmp.lt.s32.totalorder %s3089_s14, 5 }
  0x5a   : > { %p905_p2 = pnand %p2430_p0, %p904_p1 }
  0x5b   : > { %s911_s1 = sand.u32 (!%p905_p2), 1, %s3065_s30   ;;  %s3761_s19 = sand.u32 (!%p905_p2), 1, %s3057_s28  }
  0x5c   : > { %908 = sbr.rel (%p905_p2) target bundleno = 1742 (0x6ce), region = 126  ;;  %s2431_s15 = sshll.u32 (!%p905_p2), %s911_s1, 8 }
  0x5d   : > { %s3401_s16 = sshll.u32 (!%p905_p2), %s3761_s19, 3  ;;  %p966_p3 = scmp.lt.s32.totalorder (!%p905_p2), %s3077_s11, 1 }
  0x5e   : > { %p974_p4 = scmp.lt.s32.totalorder (!%p905_p2), %s3073_s10, 1  ;;  %s3418_s2 = scalar_lea.vmem (!%p905_p2), [#allocation7], %s2431_s15 }
  0x5f   : > { %s3420_s13 = scalar_lea.vmem (!%p905_p2), [#allocation8], %s2431_s15  ;;  %s965_s12 = scalar_lea.vmem (!%p905_p2), [#allocation9], %s3401_s16 }
  0x60   : > { %p2436_p5 = scmp.ne.s32.totalorder (!%p905_p2), %s3073_s10, 0 }
  0x63   : > { %s967_s27 = scalar_select %p966_p3, %s3077_s11, 1 }
  0x64   : > { %s975_s18 = scalar_select %p974_p4, %s3073_s10, 1 }
  0x65   : > { %s2434_s26 = sshll.u32 %s967_s27, 3  ;;  %s2435_s20 = sshll.u32 %s967_s27, 1  ;;  %vm1075_vm0 = vcmask (!%p2436_p5), 7168   ;;  %vm1084_vm1 = vcmask (!%p2436_p5), 64512   ;;  %v3091_v0 = vmov (!%p2436_p5), 0.0   ;;  %v3092_v1 = vmov (!%p2436_p5), -inf  }
  0x66   : > { %s3410_s22 = scalar_lea.vmem %s3748_s0, %s2434_s26  ;;  %s3412_s21 = sadd.s32 %s2435_s20, %s975_s18  ;;  %2605 = vmatprep.subr.bf16.mxu0 (!%p2436_p5), %v3091_v0  ;;  %1076 = vst.msk [vmem:[#allocation3] sm:$0xff] (!%p2436_p5), %vm1075_vm0, %v3092_v1  ;;  %1077 = vst.msk [vmem:[#allocation3 + $0x8] sm:$0xff] (!%p2436_p5), %vm1075_vm0, %v3092_v1  ;;  %v2883_v2 = vld [vmem:[%s3752_s4] sm:$0xff] (!%p2436_p5)   ;;  %vm3093_vm2 = vmmov (!%p2436_p5), 0   ;;  %v2884_v3 = vld [vmem:[%s3752_s4 + $0x8] sm:$0xff] (!%p2436_p5)   ;;  %vm1009_vm3 = vcmask (!%p2436_p5), 261120  }
  0x67   : > { %s978_s19 = scalar_lea.vmem %s3751_s3, %s3412_s21  ;;  %983 = sbr.rel (%p2436_p5) target bundleno = 448 (0x1c0), region = 138  ;;  %1078 = vst.msk [vmem:[#allocation3 + $0x10] sm:$0xff] (!%p2436_p5), %vm1075_vm0, %v3092_v1  ;;  %1079 = vst.msk [vmem:[#allocation3 + $0x18] sm:$0xff] (!%p2436_p5), %vm1075_vm0, %v3092_v1  ;;  %2609 = vmatprep.mubr.msk.bf16.mxu0 (!%p2436_p5), %vm3093_vm2, %v3091_v0  ;;  %2606 = vmatpush3.bf16.msra.mxu0 (!%p2436_p5), %v2883_v2  ;;  %v984_v4 = vld [vmem:[%s3410_s22] sm:$0xff] (!%p2436_p5)  ;;  %vm1055_vm4 = vcmask (!%p2436_p5), 60416  }
  0x68   : > { %1080 = vst.msk [vmem:[#allocation4] sm:$0xff] (!%p2436_p5), %vm1075_vm0, %v3091_v0  ;;  %1081 = vst.msk [vmem:[#allocation4 + $0x8] sm:$0xff] (!%p2436_p5), %vm1075_vm0, %v3091_v0  ;;  %2607 = vmatprep.subr.bf16.mxu0 (!%p2436_p5), %v3091_v0  ;;  %v985_v5 = vpack.c.bf16 (!%p2436_p5), %v984_v4, %v984_v4  ;;  %v2437_v6 = vld [vmem:[%s3753_s5] ss:$0 sm:$0xff] (!%p2436_p5)  ;;  %s3094_s25 = smov (!%p2436_p5), 104   ;;  %s3095_s22 = smov (!%p2436_p5), 120  }
  0x69   : > { %1082 = vst.msk [vmem:[#allocation4 + $0x10] sm:$0xff] (!%p2436_p5), %vm1075_vm0, %v3091_v0  ;;  %1083 = vst.msk [vmem:[#allocation4 + $0x18] sm:$0xff] (!%p2436_p5), %vm1075_vm0, %v3091_v0  ;;  %s3096_s30 = smov (!%p2436_p5), 112  }
  0x6a   : > { %1085 = vst.msk [vmem:[#allocation5] sm:$0xff] (!%p2436_p5), %vm1084_vm1, %v3091_v0  ;;  %1086 = vst.msk [vmem:[#allocation5 + $0x8] sm:$0xff] (!%p2436_p5), %vm1084_vm1, %v3091_v0 }
  0x6b   : > { %1087 = vst.msk [vmem:[#allocation5 + $0x10] sm:$0xff] (!%p2436_p5), %vm1084_vm1, %v3091_v0  ;;  %1088 = vst.msk [vmem:[#allocation5 + $0x18] sm:$0xff] (!%p2436_p5), %vm1084_vm1, %v3091_v0  ;;  %2608 = vmatpush3.bf16.msra.mxu0 (!%p2436_p5), %v2884_v3 }
  0x6e   : > { %2610 = vmatmul.mubr.msk.bf16.vlgmr.msra.gmra.mrb[0].mxu0 %vm1009_vm3, %v985_v5 }
 0x141   : > { %v1047_v7 = vpop.f32.mrb[0].mxu0 }
 0x142   : > { %v1048_v8 = vadd.f32 %v2437_v6, %v1047_v7  ;;  %v2611_v9 = vpop.f32.mrb[1].mxu0 }
 0x143   : > { %v1050_v10 = vpop.f32.mrb[2].mxu0 }
 0x144   : > { %v1053_v11 = vmul.f32 0.35355338, %v1048_v8  ;;  %v2612_v12 = vpop.f32.mrb[3].mxu0 }
 0x146   : > { %v1054_v13 = vpack.c.bf16 %v1053_v11, %v1053_v11 }
 0x148   : > { %1070 = vrot.lane.b32.xlu1 %v1054_v13, %s3094_s25  ;;  %1060 = vrot.lane.b32.xlu0 %v1054_v13, %s3095_s22  ;;  %1056 = vst.msk [vmem:[#allocation2] sm:$0xf] %vm1055_vm4, %v1054_v13 }
 0x14c   : > { %1065 = vrot.lane.b32.xlu0 %v1054_v13, %s3096_s30 }
 0x1ba   : > { %v1071_v14 = vpop.permute.xlu1 %1070  ;;  %v1061_v15 = vpop.permute.xlu0 %1060 }
 0x1bb   : > { %1074 = vst.msk [vmem:[#allocation2 + $0xc] sm:$0xf] %vm1055_vm4, %v1071_v14  ;;  %1064 = vst.msk [vmem:[#allocation2 + $0x4] sm:$0xf] %vm1055_vm4, %v1061_v15 }
 0x1be   : > { %v1066_v16 = vpop.permute.xlu0 %1065 }
 0x1bf   : > { %1069 = vst.msk [vmem:[#allocation2 + $0x8] sm:$0xf] %vm1055_vm4, %v1066_v16 }
 0x1c0 PF: > { %v2887_v17 = vld [vmem:[%s3418_s2] sm:$0xff]   ;;  %v3097_v18 = vmov 0.0   ;;  %vm1268_vm5 = vcmask 64512   ;;  %v2889_v22 = vld [vmem:[%s3418_s2 + $0x8] sm:$0xff]   ;;  %v2891_v26 = vld [vmem:[%s3418_s2 + $0x10] sm:$0xff]   ;;  %vm3098_vm6 = vmmov 0  }
 0x1c1   : > { %2613 = vmatprep.subr.bf16.mxu0 %v3097_v18  ;;  %2633 = vmatprep.subr.bf16.mxu1 %v3097_v18  ;;  %v2888_v19 = vld [vmem:[%s3418_s2 + $0x40] sm:$0xff]   ;;  %v1273_v20 = vsel %vm1268_vm5, %v2887_v17, 0  ;;  %v2890_v23 = vld [vmem:[%s3418_s2 + $0x48] sm:$0xff]   ;;  %v1276_v24 = vsel %vm1268_vm5, %v2889_v22, 0  ;;  %v2892_v27 = vld [vmem:[%s3418_s2 + $0x50] sm:$0xff]   ;;  %v1279_v28 = vsel %vm1268_vm5, %v2891_v26, 0 }
 0x1c2   : > { %2614 = vmatpush3.bf16.xpose.msra.mxu0 %v1273_v20  ;;  %v1380_v21 = vsel %vm1268_vm5, %v2888_v19, 0  ;;  %v1383_v25 = vsel %vm1268_vm5, %v2890_v23, 0  ;;  %v1386_v29 = vsel %vm1268_vm5, %v2892_v27, 0  ;;  %2629 = vmatprep.mubr.msk.bf16.mxu0 %vm3098_vm6, %v3097_v18  ;;  %v2893_v30 = vld [vmem:[%s3418_s2 + $0x18] sm:$0xff]   ;;  %v2895_v34 = vld [vmem:[%s3418_s2 + $0x20] sm:$0xff]   ;;  %v2897_v36 = vld [vmem:[%s3418_s2 + $0x28] sm:$0xff]  }
 0x1c3   : > { %2634 = vmatpush3.bf16.xpose.msra.mxu1 %v1380_v21  ;;  %2615 = vmatprep.subr.bf16.mxu0 %v3097_v18  ;;  %v2894_v31 = vld [vmem:[%s3418_s2 + $0x58] sm:$0xff]   ;;  %v1282_v32 = vsel %vm1268_vm5, %v2893_v30, 0  ;;  %v2896_v35 = vld [vmem:[%s3418_s2 + $0x60] sm:$0xff]   ;;  %v2898_v37 = vld [vmem:[%s3418_s2 + $0x68] sm:$0xff]   ;;  %v1285_v40 = vsel %vm1268_vm5, %v2895_v34, 0  ;;  %v1288_v42 = vsel %vm1268_vm5, %v2897_v36, 0 }
 0x1c4   : > { %2635 = vmatprep.subr.bf16.mxu1 %v3097_v18  ;;  %2649 = vmatprep.mubr.msk.bf16.mxu1 %vm3098_vm6, %v3097_v18  ;;  %v1389_v33 = vsel %vm1268_vm5, %v2894_v31, 0  ;;  %v2899_v38 = vld [vmem:[%s3418_s2 + $0x30] sm:$0xff]   ;;  %v1392_v41 = vsel %vm1268_vm5, %v2896_v35, 0  ;;  %v1395_v43 = vsel %vm1268_vm5, %v2898_v37, 0  ;;  %v2901_v46 = vld [vmem:[%s3418_s2 + $0x38] sm:$0xff]   ;;  %v2903_v50 = vld [vmem:[%s3418_s2 + $0x80] sm:$0xff]  }
 0x1c5   : > { %v2900_v39 = vld [vmem:[%s3418_s2 + $0x70] sm:$0xff]   ;;  %v1291_v44 = vsel %vm1268_vm5, %v2899_v38, 0  ;;  %v2902_v47 = vld [vmem:[%s3418_s2 + $0x78] sm:$0xff]   ;;  %v1294_v48 = vsel %vm1268_vm5, %v2901_v46, 0  ;;  %v2904_v51 = vld [vmem:[%s3418_s2 + $0xc0] sm:$0xff]   ;;  %v1487_v53 = vsel %vm1268_vm5, %v2903_v50, 0 }
 0x1c6   : > { %v1398_v45 = vsel %vm1268_vm5, %v2900_v39, 0  ;;  %v1401_v49 = vsel %vm1268_vm5, %v2902_v47, 0  ;;  %v1089_v52 = vld [vmem:[#allocation2] sm:$0xf]  ;;  %v1090_v54 = vld [vmem:[#allocation2 + $0x4] sm:$0xf] }
 0x1c7   : > { %v1594_v55 = vsel %vm1268_vm5, %v2904_v51, 0  ;;  %v2905_v56 = vld [vmem:[%s3418_s2 + $0x88] sm:$0xff]   ;;  %v2907_v60 = vld [vmem:[%s3418_s2 + $0x90] sm:$0xff]   ;;  %v2909_v0 = vld [vmem:[%s3418_s2 + $0x98] sm:$0xff]   ;;  %v3099_v34 = vmov 0   ;;  %vm1737_vm7 = vcmask 7168  }
 0x1c8   : > { %v2906_v57 = vld [vmem:[%s3418_s2 + $0xc8] sm:$0xff]   ;;  %v1490_v58 = vsel %vm1268_vm5, %v2905_v56, 0  ;;  %v2908_v61 = vld [vmem:[%s3418_s2 + $0xd0] sm:$0xff]   ;;  %v1493_v62 = vsel %vm1268_vm5, %v2907_v60, 0  ;;  %v2910_v1 = vld [vmem:[%s3418_s2 + $0xd8] sm:$0xff]   ;;  %v1496_v2 = vsel %vm1268_vm5, %v2909_v0, 0  ;;  %2885 = vset.pattern.permute.xlu0 %v3099_v34  ;;  %2886 = vset.pattern.permute.xlu1 %v3099_v34 }
 0x1c9   : > { %v1597_v59 = vsel %vm1268_vm5, %v2906_v57, 0  ;;  %v1600_v63 = vsel %vm1268_vm5, %v2908_v61, 0  ;;  %v1603_v3 = vsel %vm1268_vm5, %v2910_v1, 0  ;;  %v2911_v4 = vld [vmem:[%s3418_s2 + $0xa0] sm:$0xff]   ;;  %v2913_v8 = vld [vmem:[%s3418_s2 + $0xa8] sm:$0xff]   ;;  %v2915_v12 = vld [vmem:[%s3418_s2 + $0xb0] sm:$0xff]  }
 0x1ca   : > { %2616 = vmatpush3.bf16.xpose.msra.mxu0 %v1276_v24  ;;  %v2912_v5 = vld [vmem:[%s3418_s2 + $0xe0] sm:$0xff]   ;;  %v1499_v6 = vsel %vm1268_vm5, %v2911_v4, 0  ;;  %v2914_v9 = vld [vmem:[%s3418_s2 + $0xe8] sm:$0xff]   ;;  %v1502_v10 = vsel %vm1268_vm5, %v2913_v8, 0  ;;  %v2916_v13 = vld [vmem:[%s3418_s2 + $0xf0] sm:$0xff]   ;;  %v1505_v14 = vsel %vm1268_vm5, %v2915_v12, 0 }
 0x1cb   : > { %2636 = vmatpush3.bf16.xpose.msra.mxu1 %v1383_v25  ;;  %2617 = vmatprep.subr.bf16.mxu0 %v3097_v18  ;;  %v1606_v7 = vsel %vm1268_vm5, %v2912_v5, 0  ;;  %v1609_v11 = vsel %vm1268_vm5, %v2914_v9, 0  ;;  %v1612_v15 = vsel %vm1268_vm5, %v2916_v13, 0  ;;  %v2917_v16 = vld [vmem:[%s3418_s2 + $0xb8] sm:$0xff]   ;;  %v1091_v21 = vld [vmem:[#allocation2 + $0x8] sm:$0xf] }
 0x1cc   : > { %2637 = vmatprep.subr.bf16.mxu1 %v3097_v18  ;;  %v2918_v17 = vld [vmem:[%s3418_s2 + $0xf8] sm:$0xff]   ;;  %v1508_v19 = vsel %vm1268_vm5, %v2917_v16, 0  ;;  %v2442_v23 = vld [vmem:[%s978_s19] ss:$0 sm:$0xff]  ;;  %v2921_v46 = vld [vmem:[%s3420_s13 + $0x40] sm:$0xff]   ;;  %p2511_p6 = scmp.ne.s32.totalorder %s3073_s10, 1 }
 0x1cd   : > { %v1615_v20 = vsel %vm1268_vm5, %v2918_v17, 0  ;;  %v1092_v22 = vld [vmem:[#allocation2 + $0xc] sm:$0xf]  ;;  %v2920_v47 = vld [vmem:[%s3420_s13 + $0x8] sm:$0xff]   ;;  %v2925_v50 = vld [vmem:[%s3420_s13 + $0x50] sm:$0xff]   ;;  %vm3102_vm8 = vmmov (!%p2511_p6), 0  }
 0x1ce   : > { %v2924_v51 = vld [vmem:[%s3420_s13 + $0x18] sm:$0xff]   ;;  %v2926_v56 = vld [vmem:[%s3420_s13 + $0x20] sm:$0xff]   ;;  %v2928_v61 = vld [vmem:[%s3420_s13 + $0x28] sm:$0xff]   ;;  %s3103_s15 = smov (!%p2511_p6), 8   ;;  %vm2179_vm9 = vcmask (!%p2511_p6), 60416   ;;  %s3104_s27 = smov (!%p2511_p6), 16  }
 0x1cf   : > { %v2927_v57 = vld [vmem:[%s3420_s13 + $0x58] sm:$0xff]   ;;  %v2931_v0 = vld [vmem:[%s3420_s13 + $0x68] sm:$0xff]   ;;  %v2941_v34 = vld [vmem:[%s3420_s13 + $0xd0] sm:$0xff]   ;;  %s3105_s18 = smov (!%p2511_p6), 24   ;;  %vm2188_vm10 = vcmask (!%p2511_p6), 126016   ;;  %vm2197_vm11 = vcmask (!%p2511_p6), 191616  }
 0x1d0   : > { %v2932_v1 = vld [vmem:[%s3420_s13 + $0x38] sm:$0xff]   ;;  %vm2206_vm12 = vcmask (!%p2511_p6), 257216   ;;  %vm2232_vm13 = vcmask (!%p2511_p6), 261120  }
 0x1d1   : > { %v3608_v9 = vld [vmem:[#allocation3 + $0x18] sm:$0xff] }
 0x1d2   : > { %2618 = vmatpush3.bf16.xpose.msra.mxu0 %v1279_v28 }
 0x1d3   : > { %2638 = vmatpush3.bf16.xpose.msra.mxu1 %v1386_v29  ;;  %2619 = vmatprep.subr.bf16.mxu0 %v3097_v18 }
 0x1d4   : > { %2639 = vmatprep.subr.bf16.mxu1 %v3097_v18 }
 0x1da   : > { %2620 = vmatpush3.bf16.xpose.msra.mxu0 %v1282_v32 }
 0x1db   : > { %2640 = vmatpush3.bf16.xpose.msra.mxu1 %v1389_v33  ;;  %2621 = vmatprep.subr.bf16.mxu0 %v3097_v18 }
 0x1dc   : > { %2641 = vmatprep.subr.bf16.mxu1 %v3097_v18 }
 0x1e2   : > { %2622 = vmatpush3.bf16.xpose.msra.mxu0 %v1285_v40 }
 0x1e3   : > { %2642 = vmatpush3.bf16.xpose.msra.mxu1 %v1392_v41  ;;  %2623 = vmatprep.subr.bf16.mxu0 %v3097_v18 }
 0x1e4   : > { %2643 = vmatprep.subr.bf16.mxu1 %v3097_v18 }
 0x1ea   : > { %2624 = vmatpush3.bf16.xpose.msra.mxu0 %v1288_v42 }
 0x1eb   : > { %2644 = vmatpush3.bf16.xpose.msra.mxu1 %v1395_v43  ;;  %2625 = vmatprep.subr.bf16.mxu0 %v3097_v18 }
 0x1ec   : > { %2645 = vmatprep.subr.bf16.mxu1 %v3097_v18 }
 0x1f2   : > { %2626 = vmatpush3.bf16.xpose.msra.mxu0 %v1291_v44 }
 0x1f3   : > { %2646 = vmatpush3.bf16.xpose.msra.mxu1 %v1398_v45  ;;  %2627 = vmatprep.subr.bf16.mxu0 %v3097_v18  ;;  %v2919_v45 = vld [vmem:[%s3420_s13] sm:$0xff]  }
 0x1f4   : > { %2647 = vmatprep.subr.bf16.mxu1 %v3097_v18 }
 0x1fa   : > { %2628 = vmatpush3.bf16.xpose.msra.mxu0 %v1294_v48  ;;  %v2923_v48 = vld [vmem:[%s3420_s13 + $0x48] sm:$0xff]  }
 0x1fb   : > { %2648 = vmatpush3.bf16.xpose.msra.mxu1 %v1401_v49  ;;  %2653 = vmatprep.subr.bf16.mxu0 %v3097_v18  ;;  %v2922_v49 = vld [vmem:[%s3420_s13 + $0x10] sm:$0xff]  }
 0x1fc   : > { %2673 = vmatprep.subr.bf16.mxu1 %v3097_v18 }
 0x201   : > { %2630 = vmatmul.mubr.msk.bf16.vlgmr.msra.gmra.mrb[0].mxu0 %vm1268_vm5, %v1089_v52  ;;  %v1657_v52 = vld [vmem:[#allocation3] sm:$0xff] }
 0x202   : > { %2654 = vmatpush3.bf16.xpose.msra.mxu0 %v1487_v53  ;;  %2650 = vmatmul.mubr.msk.bf16.vlgmr.msra.gmra.mrb[0].mxu1 %vm1268_vm5, %v1090_v54 }
 0x203   : > { %2674 = vmatpush3.bf16.xpose.msra.mxu1 %v1594_v55  ;;  %2655 = vmatprep.subr.bf16.mxu0 %v3097_v18  ;;  %v3579_v55 = vld [vmem:[#allocation3 + $0x8] sm:$0xff] }
 0x204   : > { %2675 = vmatprep.subr.bf16.mxu1 %v3097_v18  ;;  %2669 = vmatprep.mubr.msk.bf16.mxu0 %vm3098_vm6, %v3097_v18 }
 0x205   : > { %2689 = vmatprep.mubr.msk.bf16.mxu1 %vm3098_vm6, %v3097_v18 }
 0x20a   : > { %2656 = vmatpush3.bf16.xpose.msra.mxu0 %v1490_v58 }
 0x20b   : > { %2676 = vmatpush3.bf16.xpose.msra.mxu1 %v1597_v59  ;;  %2657 = vmatprep.subr.bf16.mxu0 %v3097_v18 }
 0x20c   : > { %2677 = vmatprep.subr.bf16.mxu1 %v3097_v18 }
 0x212   : > { %2658 = vmatpush3.bf16.xpose.msra.mxu0 %v1493_v62  ;;  %v2929_v62 = vld [vmem:[%s3420_s13 + $0x60] sm:$0xff]  }
 0x213   : > { %2678 = vmatpush3.bf16.xpose.msra.mxu1 %v1600_v63  ;;  %2659 = vmatprep.subr.bf16.mxu0 %v3097_v18  ;;  %v2930_v63 = vld [vmem:[%s3420_s13 + $0x30] sm:$0xff]  }
 0x214   : > { %2679 = vmatprep.subr.bf16.mxu1 %v3097_v18 }
 0x21a   : > { %2660 = vmatpush3.bf16.xpose.msra.mxu0 %v1496_v2  ;;  %v2933_v2 = vld [vmem:[%s3420_s13 + $0x70] sm:$0xff]  }
 0x21b   : > { %2680 = vmatpush3.bf16.xpose.msra.mxu1 %v1603_v3  ;;  %2661 = vmatprep.subr.bf16.mxu0 %v3097_v18  ;;  %v2934_v3 = vld [vmem:[%s3420_s13 + $0x78] sm:$0xff]  }
 0x21c   : > { %2681 = vmatprep.subr.bf16.mxu1 %v3097_v18 }
 0x222   : > { %2662 = vmatpush3.bf16.xpose.msra.mxu0 %v1499_v6  ;;  %v1659_v6 = vld [vmem:[#allocation3 + $0x10] sm:$0xff] }
 0x223   : > { %2682 = vmatpush3.bf16.xpose.msra.mxu1 %v1606_v7  ;;  %2663 = vmatprep.subr.bf16.mxu0 %v3097_v18 }
 0x224   : > { %2683 = vmatprep.subr.bf16.mxu1 %v3097_v18 }
 0x22a   : > { %2664 = vmatpush3.bf16.xpose.msra.mxu0 %v1502_v10 }
 0x22b   : > { %2684 = vmatpush3.bf16.xpose.msra.mxu1 %v1609_v11  ;;  %2665 = vmatprep.subr.bf16.mxu0 %v3097_v18 }
 0x22c   : > { %2685 = vmatprep.subr.bf16.mxu1 %v3097_v18 }
 0x232   : > { %2666 = vmatpush3.bf16.xpose.msra.mxu0 %v1505_v14 }
 0x233   : > { %2686 = vmatpush3.bf16.xpose.msra.mxu1 %v1612_v15  ;;  %2667 = vmatprep.subr.bf16.mxu0 %v3097_v18 }
 0x234   : > { %2687 = vmatprep.subr.bf16.mxu1 %v3097_v18 }
 0x23a   : > { %2668 = vmatpush3.bf16.xpose.msra.mxu0 %v1508_v19 }
 0x23b   : > { %2688 = vmatpush3.bf16.xpose.msra.mxu1 %v1615_v20  ;;  %2693 = vmatprep.subr.bf16.mxu0 %v3097_v18 }
 0x23c   : > { %2713 = vmatprep.subr.bf16.mxu1 %v3097_v18 }
 0x241   : > { %2670 = vmatmul.mubr.msk.bf16.vlgmr.msra.gmra.mrb[4].mxu0 %vm1268_vm5, %v1091_v21 }
 0x242   : > { %2690 = vmatmul.mubr.msk.bf16.vlgmr.msra.gmra.mrb[4].mxu1 %vm1268_vm5, %v1092_v22  ;;  %2709 = vmatprep.mubr.msk.bf16.mxu0 %vm3098_vm6, %v3097_v18 }
 0x243   : > { %2729 = vmatprep.mubr.msk.bf16.mxu1 %vm3098_vm6, %v3097_v18  ;;  %2694 = vmatpush3.bf16.msra.mxu0 %v2919_v45  ;;  %v2948_v45 = vld [vmem:[%s3420_s13 + $0xb8] sm:$0xff]  }
 0x244   : > { %2714 = vmatpush3.bf16.msra.mxu1 %v2921_v46  ;;  %2695 = vmatprep.subr.bf16.mxu0 %v3097_v18  ;;  %v2949_v46 = vld [vmem:[%s3420_s13 + $0xf0] sm:$0xff]  }
 0x245   : > { %2715 = vmatprep.subr.bf16.mxu1 %v3097_v18 }
 0x247   : > { %2696 = vmatpush3.bf16.msra.mxu0 %v2920_v47  ;;  %v2950_v47 = vld [vmem:[%s3420_s13 + $0xf8] sm:$0xff]  }
 0x248   : > { %2716 = vmatpush3.bf16.msra.mxu1 %v2923_v48  ;;  %2697 = vmatprep.subr.bf16.mxu0 %v3097_v18 }
 0x249   : > { %2717 = vmatprep.subr.bf16.mxu1 %v3097_v18 }
 0x24b   : > { %2698 = vmatpush3.bf16.msra.mxu0 %v2922_v49 }
 0x24c   : > { %2718 = vmatpush3.bf16.msra.mxu1 %v2925_v50  ;;  %2699 = vmatprep.subr.bf16.mxu0 %v3097_v18 }
 0x24d   : > { %2719 = vmatprep.subr.bf16.mxu1 %v3097_v18 }
 0x24f   : > { %2700 = vmatpush3.bf16.msra.mxu0 %v2924_v51 }
 0x250   : > { %2701 = vmatprep.subr.bf16.mxu0 %v3097_v18  ;;  %2720 = vmatpush3.bf16.msra.mxu1 %v2927_v57 }
 0x251   : > { %2721 = vmatprep.subr.bf16.mxu1 %v3097_v18 }
 0x253   : > { %2702 = vmatpush3.bf16.msra.mxu0 %v2926_v56 }
 0x254   : > { %2703 = vmatprep.subr.bf16.mxu0 %v3097_v18  ;;  %2722 = vmatpush3.bf16.msra.mxu1 %v2929_v62 }
 0x255   : > { %2723 = vmatprep.subr.bf16.mxu1 %v3097_v18 }
 0x257   : > { %2704 = vmatpush3.bf16.msra.mxu0 %v2928_v61  ;;  %v1718_v61 = vld [vmem:[#allocation4 + $0x8] sm:$0xff] }
 0x258   : > { %2705 = vmatprep.subr.bf16.mxu0 %v3097_v18  ;;  %2724 = vmatpush3.bf16.msra.mxu1 %v2931_v0 }
 0x259   : > { %2725 = vmatprep.subr.bf16.mxu1 %v3097_v18 }
 0x25b   : > { %2706 = vmatpush3.bf16.msra.mxu0 %v2930_v63 }
 0x25c   : > { %2707 = vmatprep.subr.bf16.mxu0 %v3097_v18  ;;  %2726 = vmatpush3.bf16.msra.mxu1 %v2933_v2 }
 0x25d   : > { %2727 = vmatprep.subr.bf16.mxu1 %v3097_v18 }
 0x25f   : > { %2708 = vmatpush3.bf16.msra.mxu0 %v2932_v1 }
 0x260   : > { %2733 = vmatprep.subr.bf16.mxu0 %v3097_v18  ;;  %2728 = vmatpush3.bf16.msra.mxu1 %v2934_v3  ;;  %v1719_v3 = vld [vmem:[#allocation4 + $0x10] sm:$0xff] }
 0x261   : > { %2753 = vmatprep.subr.bf16.mxu1 %v3097_v18 }
 0x2d4   : > { %v1330_v24 = vpop.f32.mrb[0].mxu0 }
 0x2d5   : > { %v3553_v25 = vadd.f32 %v2442_v23, %v1330_v24  ;;  %v2631_v26 = vpop.f32.mrb[1].mxu0  ;;  %v1437_v27 = vpop.f32.mrb[0].mxu1 }
 0x2d6   : > { %v1333_v28 = vpop.f32.mrb[2].mxu0  ;;  %v2651_v29 = vpop.f32.mrb[1].mxu1  ;;  %v3555_v30 = vadd.f32 %v2442_v23, %v1437_v27 }
 0x2d7   : > { %1661 = vmax.xlane.f32.xlu0 %v3553_v25  ;;  %v2632_v31 = vpop.f32.mrb[3].mxu0  ;;  %v1440_v32 = vpop.f32.mrb[2].mxu1  ;;  %v2936_v28 = vld [vmem:[%s3420_s13 + $0x88] sm:$0xff]  }
 0x2d8   : > { %v2652_v33 = vpop.f32.mrb[3].mxu1  ;;  %v2939_v31 = vld [vmem:[%s3420_s13 + $0xc8] sm:$0xff]  }
 0x2d9   : > { %v2940_v33 = vld [vmem:[%s3420_s13 + $0x98] sm:$0xff]  }
 0x2db   : > { %1663 = vmax.xlane.f32.xlu0 %v3555_v30 }
 0x314   : > { %v1544_v35 = vpop.f32.mrb[4].mxu0 }
 0x315   : > { %v3559_v36 = vadd.f32 %v2442_v23, %v1544_v35  ;;  %v2671_v37 = vpop.f32.mrb[5].mxu0  ;;  %v1651_v38 = vpop.f32.mrb[4].mxu1  ;;  %v2942_v35 = vld [vmem:[%s3420_s13 + $0xa0] sm:$0xff]  }
 0x316   : > { %v1547_v39 = vpop.f32.mrb[6].mxu0  ;;  %v2691_v40 = vpop.f32.mrb[5].mxu1  ;;  %v3561_v41 = vadd.f32 %v2442_v23, %v1651_v38  ;;  %v2935_v23 = vld [vmem:[%s3420_s13 + $0x80] sm:$0xff]   ;;  %v2943_v37 = vld [vmem:[%s3420_s13 + $0xd8] sm:$0xff]  }
 0x317   : > { %v1654_v42 = vpop.f32.mrb[6].mxu1  ;;  %1665 = vmax.xlane.f32.xlu1 %v3559_v36  ;;  %v2672_v43 = vpop.f32.mrb[7].mxu0  ;;  %v2944_v39 = vld [vmem:[%s3420_s13 + $0xa8] sm:$0xff]   ;;  %v2945_v40 = vld [vmem:[%s3420_s13 + $0xe0] sm:$0xff]  }
 0x318   : > { %v2692_v44 = vpop.f32.mrb[7].mxu1  ;;  %v2946_v42 = vld [vmem:[%s3420_s13 + $0xb0] sm:$0xff]   ;;  %v2947_v43 = vld [vmem:[%s3420_s13 + $0xe8] sm:$0xff]  }
 0x31b   : > { %1667 = vmax.xlane.f32.xlu1 %v3561_v41 }
 0x364   : > { %v1662_v53 = vpop.xlane.xlu0 %1661 }
 0x365   : > { %v1669_v54 = vmax.f32 %v1657_v52, %v1662_v53 }
 0x367   : > { %2134 = vst.msk [vmem:[#allocation3] sm:$0xff] %vm1737_vm7, %v1669_v54  ;;  %1687 = vperm.xlu0 %2885, %v1669_v54   ;;  %v1673_v4 = vsub.f32 %v1657_v52, %v1669_v54 }
 0x368   : > { %v1664_v58 = vpop.xlane.xlu0 %1663 }
 0x369   : > { %v3585_v59 = vmax.f32 %v3579_v55, %v1664_v58  ;;  %v1677_v5 = vmul.f32 1.442695, %v1673_v4 }
 0x36b   : > { %v1674_v60 = vsub.f32 %v3579_v55, %v3585_v59  ;;  %2135 = vst.msk [vmem:[#allocation3 + $0x8] sm:$0xff] %vm1737_vm7, %v3585_v59  ;;  %1692 = vperm.xlu1 %2886, %v3585_v59   ;;  %2951 = vpow2.f32 %v1677_v5  ;;  %v1717_v59 = vld [vmem:[#allocation4] sm:$0xff] }
 0x36d   : > { %v1679_v32 = vmul.f32 1.442695, %v1674_v60 }
 0x375   : > { %v3619_v14 = vpop.eup %2951 }
 0x3a4   : > { %v1666_v7 = vpop.xlane.xlu1 %1665 }
 0x3a5   : > { %v1671_v8 = vmax.f32 %v1659_v6, %v1666_v7 }
 0x3a7   : > { %v1675_v10 = vsub.f32 %v1659_v6, %v1671_v8  ;;  %2136 = vst.msk [vmem:[#allocation3 + $0x10] sm:$0xff] %vm1737_vm7, %v1671_v8  ;;  %1697 = vperm.xlu1 %2886, %v1671_v8   ;;  %v1720_v6 = vld [vmem:[#allocation4 + $0x18] sm:$0xff] }
 0x3a8   : > { %v1668_v11 = vpop.xlane.xlu1 %1667 }
 0x3a9   : > { %v3612_v12 = vmax.f32 %v3608_v9, %v1668_v11  ;;  %v1681_v26 = vmul.f32 1.442695, %v1675_v10 }
 0x3ab   : > { %v1676_v13 = vsub.f32 %v3608_v9, %v3612_v12  ;;  %2137 = vst.msk [vmem:[#allocation3 + $0x18] sm:$0xff] %vm1737_vm7, %v3612_v12  ;;  %1702 = vperm.xlu1 %2886, %v3612_v12   ;;  %v1742_v9 = vld [vmem:[#allocation5] sm:$0xff] }
 0x3af   : > { %1748 = vperm.xlu1 %2886, %v3619_v14  }
 0x3e6   : > { %v1688_v15 = vpop.permute.xlu0 %1687 }
 0x3e7   : > { %v1705_v16 = vsub.f32 %v3553_v25, %v1688_v15  ;;  %v2937_v25 = vld [vmem:[%s3420_s13 + $0xc0] sm:$0xff]  }
 0x3e9   : > { %v1709_v17 = vmul.f32 1.442695, %v1705_v16 }
 0x3ea   : > { %v1693_v19 = vpop.permute.xlu1 %1692 }
 0x3eb   : > { %2953 = vpow2.f32 %v1709_v17  ;;  %v1706_v20 = vsub.f32 %v3555_v30, %v1693_v19  ;;  %v2938_v30 = vld [vmem:[%s3420_s13 + $0x90] sm:$0xff]  }
 0x3ed   : > { %v1711_v21 = vmul.f32 1.442695, %v1706_v20 }
 0x3ef   : > { %2955 = vpow2.f32 %v1711_v21 }
 0x3f0   : > { %2957 = vpow2.f32 %v1681_v26 }
 0x3f1   : > { %2959 = vpow2.f32 %v1679_v32 }
 0x3f5   : > { %v2954_v22 = vpop.eup %2953 }
 0x3f6   : > { %1725 = vadd.xlane.f32.xlu1 %v2954_v22  ;;  %v1770_v24 = vpack.c.bf16 %v2954_v22, %v2954_v22 }
 0x3f8   : > { %2710 = vmatmul.mubr.bf16.vlgmr.msra.gmra.mrb[8].mxu0 %v1770_v24 }
 0x3f9   : > { %v2956_v27 = vpop.eup %2955  ;;  %2734 = vmatpush3.bf16.msra.mxu0 %v2935_v23  ;;  %2749 = vmatprep.mubr.msk.bf16.mxu0 %vm3098_vm6, %v3097_v18 }
 0x3fa   : > { %1727 = vadd.xlane.f32.xlu0 %v2956_v27  ;;  %v1771_v29 = vpack.c.bf16 %v2956_v27, %v2956_v27  ;;  %2735 = vmatprep.subr.bf16.mxu0 %v3097_v18  ;;  %v2958_v38 = vpop.eup %2957 }
 0x3fb   : > { %v2960_v44 = vpop.eup %2959  ;;  %v1723_v4 = vmul.f32 %v2958_v38, %v1719_v3 }
 0x3fc   : > { %2730 = vmatmul.mubr.bf16.vlgmr.msra.gmra.mrb[8].mxu1 %v1771_v29  ;;  %v1722_v63 = vmul.f32 %v2960_v44, %v1718_v61  ;;  %v1745_v29 = vld [vmem:[#allocation5 + $0x18] sm:$0xff] }
 0x3fd   : > { %2736 = vmatpush3.bf16.msra.mxu0 %v2936_v28  ;;  %2754 = vmatpush3.bf16.msra.mxu1 %v2937_v25  ;;  %v1744_v28 = vld [vmem:[#allocation5 + $0x10] sm:$0xff] }
 0x3fe   : > { %2737 = vmatprep.subr.bf16.mxu0 %v3097_v18  ;;  %2755 = vmatprep.subr.bf16.mxu1 %v3097_v18 }
 0x3ff   : > { %2769 = vmatprep.mubr.msk.bf16.mxu1 %vm3098_vm6, %v3097_v18 }
 0x401   : > { %2738 = vmatpush3.bf16.msra.mxu0 %v2938_v30  ;;  %2756 = vmatpush3.bf16.msra.mxu1 %v2939_v31 }
 0x402   : > { %2739 = vmatprep.subr.bf16.mxu0 %v3097_v18  ;;  %2757 = vmatprep.subr.bf16.mxu1 %v3097_v18 }
 0x405   : > { %2740 = vmatpush3.bf16.msra.mxu0 %v2940_v33  ;;  %2758 = vmatpush3.bf16.msra.mxu1 %v2941_v34 }
 0x406   : > { %2741 = vmatprep.subr.bf16.mxu0 %v3097_v18  ;;  %2759 = vmatprep.subr.bf16.mxu1 %v3097_v18 }
 0x407   : > { %1758 = vperm.xlu1 %2886, %v2958_v38  }
 0x409   : > { %2742 = vmatpush3.bf16.msra.mxu0 %v2942_v35  ;;  %2760 = vmatpush3.bf16.msra.mxu1 %v2943_v37 }
 0x40a   : > { %2743 = vmatprep.subr.bf16.mxu0 %v3097_v18  ;;  %2761 = vmatprep.subr.bf16.mxu1 %v3097_v18 }
 0x40d   : > { %2744 = vmatpush3.bf16.msra.mxu0 %v2944_v39  ;;  %2762 = vmatpush3.bf16.msra.mxu1 %v2945_v40 }
 0x40e   : > { %2745 = vmatprep.subr.bf16.mxu0 %v3097_v18  ;;  %2763 = vmatprep.subr.bf16.mxu1 %v3097_v18 }
 0x410   : > { %1753 = vperm.xlu0 %2885, %v2960_v44  }
 0x411   : > { %2746 = vmatpush3.bf16.msra.mxu0 %v2946_v42  ;;  %2764 = vmatpush3.bf16.msra.mxu1 %v2947_v43 }
 0x412   : > { %2747 = vmatprep.subr.bf16.mxu0 %v3097_v18  ;;  %2765 = vmatprep.subr.bf16.mxu1 %v3097_v18 }
 0x415   : > { %2748 = vmatpush3.bf16.msra.mxu0 %v2948_v45  ;;  %2766 = vmatpush3.bf16.msra.mxu1 %v2949_v46 }
 0x416   : > { %2767 = vmatprep.subr.bf16.mxu1 %v3097_v18  ;;  %v1683_v18 = vmul.f32 1.442695, %v1676_v13  ;;  %v1743_v13 = vld [vmem:[#allocation5 + $0x8] sm:$0xff] }
 0x419   : > { %2768 = vmatpush3.bf16.msra.mxu1 %v2950_v47  ;;  %v3100_v47 = vmov (!%p2511_p6), 0  }
 0x41a   : > { %2967 = vset.pattern.permute.xlu0 (!%p2511_p6), %v3100_v47 }
 0x426   : > { %v1698_v48 = vpop.permute.xlu1 %1697 }
 0x427   : > { %v1707_v49 = vsub.f32 %v3559_v36, %v1698_v48 }
 0x429   : > { %v1713_v50 = vmul.f32 1.442695, %v1707_v49 }
 0x42a   : > { %v1703_v51 = vpop.permute.xlu1 %1702 }
 0x42b   : > { %2961 = vpow2.f32 %v1713_v50  ;;  %v1708_v52 = vsub.f32 %v3561_v41, %v1703_v51  ;;  %v1721_v41 = vmul.f32 %v3619_v14, %v1717_v59 }
 0x42d   : > { %v1715_v53 = vmul.f32 1.442695, %v1708_v52 }
 0x42e   : > { %v1749_v58 = vpop.permute.xlu1 %1748 }
 0x42f   : > { %2963 = vpow2.f32 %v1715_v53  ;;  %v1766_v12 = vmul.f32 %v1749_v58, %v1742_v9  ;;  %v2969_v53 = vld [vmem:[%s3754_s6] sm:$0xff] (!%p2511_p6)  }
 0x430   : > { %2965 = vpow2.f32 %v1683_v18  ;;  %v2515_v9 = vld [vmem:[%s3755_s7] ss:$0 sm:$0xff] (!%p2511_p6) }
 0x435   : > { %v2962_v54 = vpop.eup %2961 }
 0x436   : > { %1729 = vadd.xlane.f32.xlu1 %v2962_v54  ;;  %v1772_v55 = vpack.c.bf16 %v2962_v54, %v2962_v54  ;;  %v3101_v54 = vmov (!%p2511_p6), 0.0  }
 0x437   : > { %2773 = vmatprep.subr.bf16.mxu0 (!%p2511_p6), %v3101_v54 }
 0x438   : > { %2750 = vmatmul.mubr.bf16.vlgmr.msra.gmra.mrb[12].mxu0 %v1772_v55 }
 0x439   : > { %v2964_v56 = vpop.eup %2963  ;;  %2774 = vmatpush3.bf16.msra.mxu0 (!%p2511_p6), %v2969_v53  ;;  %2777 = vmatprep.mubr.msk.bf16.mxu0 (!%p2511_p6), %vm3102_vm8, %v3101_v54 }
 0x43a   : > { %1731 = vadd.xlane.f32.xlu1 %v2964_v56  ;;  %v1773_v57 = vpack.c.bf16 %v2964_v56, %v2964_v56  ;;  %v2966_v36 = vpop.eup %2965  ;;  %v2970_v56 = vld [vmem:[%s3754_s6 + $0x8] sm:$0xff] (!%p2511_p6)   ;;  %2775 = vmatprep.subr.bf16.mxu0 (!%p2511_p6), %v3101_v54 }
 0x43b   : > { %v1724_v8 = vmul.f32 %v2966_v36, %v1720_v6 }
 0x43c   : > { %2770 = vmatmul.mubr.bf16.vlgmr.msra.gmra.mrb[12].mxu1 %v1773_v57 }
 0x43d   : > { %2776 = vmatpush3.bf16.msra.mxu0 (!%p2511_p6), %v2970_v56 }
 0x44b   : > { %1763 = vperm.xlu1 %2886, %v2966_v36  }
 0x44f   : > { %2968 = vset.pattern.permute.xlu1 (!%p2511_p6), %v3100_v47 }
 0x483   : > { %v1726_v60 = vpop.xlane.xlu1 %1725 }
 0x484   : > { %v1733_v62 = vadd.f32 %v1726_v60, %v1721_v41 }
 0x486   : > { %1738 = vst.msk [vmem:[#allocation4] sm:$0xff] %vm1737_vm7, %v1733_v62 }
 0x487   : > { %v1728_v0 = vpop.xlane.xlu0 %1727  ;;  %v1759_v2 = vpop.permute.xlu1 %1758 }
 0x488   : > { %v1734_v1 = vadd.f32 %v1728_v0, %v1722_v63  ;;  %v1768_v25 = vmul.f32 %v1759_v2, %v1744_v28 }
 0x48a   : > { %1739 = vst.msk [vmem:[#allocation4 + $0x8] sm:$0xff] %vm1737_vm7, %v1734_v1 }
 0x48d   : > { %v2142_v48 = vld [vmem:[#allocation4] sm:$0xff] (!%p2511_p6) }
 0x48f   : > { %v1754_v14 = vpop.permute.xlu0 %1753 }
 0x490   : > { %v1767_v20 = vmul.f32 %v1754_v14, %v1743_v13 }
 0x491   : > { %v2143_v44 = vld [vmem:[#allocation4 + $0x8] sm:$0xff] (!%p2511_p6) }
 0x492   : > { %2971 = vrcp.f32 (!%p2511_p6), %v2143_v44 }
 0x49c   : > { %v2972_v49 = vpop.eup (!%p2511_p6), %2971 }
 0x49d   : > { %2161 = vperm.xlu0 (!%p2511_p6), %2967, %v2972_v49  }
 0x4c3   : > { %v1730_v5 = vpop.xlane.xlu1 %1729 }
 0x4c4   : > { %v1735_v7 = vadd.f32 %v1730_v5, %v1723_v4 }
 0x4c6   : > { %1740 = vst.msk [vmem:[#allocation4 + $0x10] sm:$0xff] %vm1737_vm7, %v1735_v7 }
 0x4c7   : > { %v1732_v10 = vpop.xlane.xlu1 %1731 }
 0x4c8   : > { %v1736_v11 = vadd.f32 %v1732_v10, %v1724_v8 }
 0x4ca   : > { %1741 = vst.msk [vmem:[#allocation4 + $0x18] sm:$0xff] %vm1737_vm7, %v1736_v11 }
 0x4cb   : > { %v1856_v15 = vpop.f32.mrb[8].mxu0  ;;  %v1764_v30 = vpop.permute.xlu1 %1763 }
 0x4cc   : > { %v2126_v16 = vadd.f32 %v1856_v15, %v1766_v12  ;;  %v2711_v17 = vpop.f32.mrb[9].mxu0  ;;  %v1769_v35 = vmul.f32 %v1764_v30, %v1745_v29 }
 0x4cd   : > { %v1859_v19 = vpop.f32.mrb[10].mxu0  ;;  %v2144_v46 = vld [vmem:[#allocation4 + $0x10] sm:$0xff] (!%p2511_p6) }
 0x4ce   : > { %2130 = vst.msk [vmem:[#allocation5] sm:$0xff] %vm1268_vm5, %v2126_v16  ;;  %v2712_v21 = vpop.f32.mrb[11].mxu0 }
 0x4cf   : > { %v1944_v22 = vpop.f32.mrb[8].mxu1 }
 0x4d0   : > { %v2127_v23 = vadd.f32 %v1944_v22, %v1767_v20  ;;  %v2731_v24 = vpop.f32.mrb[9].mxu1 }
 0x4d1   : > { %v1947_v26 = vpop.f32.mrb[10].mxu1  ;;  %v2145_v45 = vld [vmem:[#allocation4 + $0x18] sm:$0xff] (!%p2511_p6) }
 0x4d2   : > { %2131 = vst.msk [vmem:[#allocation5 + $0x8] sm:$0xff] %vm1268_vm5, %v2127_v23  ;;  %v2732_v27 = vpop.f32.mrb[11].mxu1  ;;  %2973 = vrcp.f32 (!%p2511_p6), %v2145_v45 }
 0x4d3   : > { %2975 = vrcp.f32 (!%p2511_p6), %v2144_v46 }
 0x4d4   : > { %2977 = vrcp.f32 (!%p2511_p6), %v2142_v48 }
 0x4d5   : > { %v2150_v61 = vld [vmem:[#allocation5] sm:$0xff] (!%p2511_p6) }
 0x4d9   : > { %v2151_v55 = vld [vmem:[#allocation5 + $0x8] sm:$0xff] (!%p2511_p6) }
 0x4dc   : > { %v2974_v50 = vpop.eup (!%p2511_p6), %2973 }
 0x4dd   : > { %v2976_v51 = vpop.eup (!%p2511_p6), %2975  ;;  %2171 = vperm.xlu1 (!%p2511_p6), %2968, %v2974_v50  }
 0x4de   : > { %v2978_v52 = vpop.eup (!%p2511_p6), %2977  ;;  %2166 = vperm.xlu0 (!%p2511_p6), %2967, %v2976_v51  }
 0x4e1   : > { %2156 = vperm.xlu1 (!%p2511_p6), %2968, %v2978_v52  }
 0x50b   : > { %v2032_v31 = vpop.f32.mrb[12].mxu0 }
 0x50c   : > { %v2128_v32 = vadd.f32 %v2032_v31, %v1768_v25  ;;  %v2751_v33 = vpop.f32.mrb[13].mxu0  ;;  %2141 = sbr.rel (%p2511_p6) target bundleno = 1717 (0x6b5), region = 142 }
 0x50d   : > { %v2035_v34 = vpop.f32.mrb[14].mxu0 }
 0x50e   : > { %2132 = vst.msk [vmem:[#allocation5 + $0x10] sm:$0xff] %vm1268_vm5, %v2128_v32  ;;  %v2752_v37 = vpop.f32.mrb[15].mxu0 }
 0x50f   : > { %v2120_v38 = vpop.f32.mrb[12].mxu1 }
 0x510   : > { %v2129_v39 = vadd.f32 %v2120_v38, %v1769_v35  ;;  %v2771_v40 = vpop.f32.mrb[13].mxu1 }
 0x511   : > { %v2123_v42 = vpop.f32.mrb[14].mxu1 }
 0x512   : > { %2133 = vst.msk [vmem:[#allocation5 + $0x18] sm:$0xff] %vm1268_vm5, %v2129_v39  ;;  %v2772_v43 = vpop.f32.mrb[15].mxu1 }
 0x515   : > { %v2152_v41 = vld [vmem:[#allocation5 + $0x10] sm:$0xff] }
 0x519   : > { %v2153_v57 = vld [vmem:[#allocation5 + $0x18] sm:$0xff] }
 0x51c   : > { %v2162_v18 = vpop.permute.xlu0 %2161 }
 0x51d   : > { %v2175_v36 = vmul.f32 %v2162_v18, %v2151_v55 }
 0x51f   : > { %v2524_v60 = vpack.c.bf16 %v2175_v36, %v2175_v36 }
 0x521   : > { %2185 = vrot.lane.b32.xlu0 %v2524_v60, %s3103_s15 }
 0x55c   : > { %v2172_v58 = vpop.permute.xlu1 %2171 }
 0x55d   : > { %v2177_v59 = vmul.f32 %v2172_v58, %v2153_v57  ;;  %v2167_v62 = vpop.permute.xlu0 %2166 }
 0x55e   : > { %v2176_v0 = vmul.f32 %v2167_v62, %v2152_v41 }
 0x55f   : > { %v2526_v63 = vpack.c.bf16 %v2177_v59, %v2177_v59 }
 0x560   : > { %v2157_v1 = vpop.permute.xlu1 %2156  ;;  %v2525_v3 = vpack.c.bf16 %v2176_v0, %v2176_v0 }
 0x561   : > { %v2174_v2 = vmul.f32 %v2157_v1, %v2150_v61  ;;  %2203 = vrot.lane.b32.xlu0 %v2526_v63, %s3105_s18 }
 0x562   : > { %2194 = vrot.lane.b32.xlu1 %v2525_v3, %s3104_s27 }
 0x563   : > { %v2178_v4 = vpack.c.bf16 %v2174_v2, %v2174_v2 }
 0x565   : > { %2180 = vst.msk [vmem:[#allocation6] sm:$0xf] %vm2179_vm9, %v2178_v4 }
 0x593   : > { %v2186_v5 = vpop.permute.xlu0 %2185 }
 0x594   : > { %2189 = vst.msk [vmem:[#allocation6] sm:$0xf] %vm2188_vm10, %v2186_v5 }
 0x5d3   : > { %v2204_v7 = vpop.permute.xlu0 %2203 }
 0x5d4   : > { %v2195_v6 = vpop.permute.xlu1 %2194 }
 0x5d5   : > { %2198 = vst.msk [vmem:[#allocation6] sm:$0xf] %vm2197_vm11, %v2195_v6 }
 0x5d6   : > { %2207 = vst.msk [vmem:[#allocation6] sm:$0xf] %vm2206_vm12, %v2204_v7 }
 0x5dd   : > { %v2208_v8 = vld [vmem:[#allocation6] sm:$0xf] }
 0x5de   : > { %2778 = vmatmul.mubr.msk.bf16.vlgmr.msra.gmra.mrb[0].mxu0 %vm2232_vm13, %v2208_v8 }
 0x6b1   : > { %v2270_v10 = vpop.f32.mrb[0].mxu0 }
 0x6b2   : > { %v2271_v11 = vadd.f32 %v2515_v9, %v2270_v10  ;;  %v2779_v12 = vpop.f32.mrb[1].mxu0 }
 0x6b3   : > { %v2273_v13 = vpop.f32.mrb[2].mxu0 }
 0x6b4   : > { %2276 = vst.msk [vmem:[%s965_s12] sm:$0xff] %vm2232_vm13, %v2271_v11  ;;  %v2780_v14 = vpop.f32.mrb[3].mxu0 }
 0x6b5 PF: > { %s2520_s24 = sshll.u32 %s3077_s11, 7  ;;  %s2291_s2 = sshll.u32 %s965_s12, 4  ;;  %s2292_s2 = int_to_ptr.vmem [resolvable:$true] %s2291_s2 }
 0x6b6   : > { %s3691_s30 = scalar_lea.hbm %s3756_s8, %s2520_s24  ;;  %s3778_s1 = sand.u32 1, %s3057_s28  }
 0x6b7   : > { %s2278_s10 = scalar_lea.sflag [#allocation10], %s3778_s1  ;;  %s2979_s13 = scalar_lea.vmem %s2292_s2, 128 }
 0x6b8   : > { %p2980_p8 = scmp.ne.s32.totalorder %s2292_s2, %s2979_s13  ;;  %s3106_s19 = smov [#allocation9]  }
 0x6b9   : > { %s2983_s21 = sshll.u32 %s3106_s19, 4  ;;  %s2984_s21 = int_to_ptr.vmem [resolvable:$false] %s2983_s21 }
 0x6ba   : > { %p2981_p9 = pnand %p2980_p8, %p3224_p7  ;;  %s2985_s15 = scalar_lea.vmem %s2984_s21, 256 }
 0x6bb   : > { %p2986_p11 = scmp.lt.s32.totalorder %s2292_s2, %s2984_s21  ;;  %p2987_p13 = scmp.lt.s32.totalorder %s2985_s15, %s2979_s13 }
 0x6bc   : > { %p2982_p10 = pneg %p2981_p9 }
 0x6bd   : > { %p2988_p0 = por %p2987_p13, %p2986_p11 }
 0x6bf   : > { %p2989_p1 = pnand %p2988_p0, %p2982_p10 }
 0x6c1   : > { %2992 = shalt.err (!%p2989_p1)
}
 0x6c2   : > { %s2993_s11 = scalar_lea.hbm %s3691_s30, 128  ;;  %s2997_s27 = scalar_lea.hbm %s3756_s8, 256 }
 0x6c3   : > { %p2994_p2 = scmp.ne.s32.totalorder %s3691_s30, %s2993_s11  ;;  %p2998_p5 = scmp.lt.u32.totalorder %s3691_s30, %s3756_s8 }
 0x6c4   : > { %p2999_p6 = scmp.lt.u32.totalorder %s2997_s27, %s2993_s11  ;;  %p3001_p9 = scmp.lt.u32.totalorder %s2993_s11, %s3691_s30 }
 0x6c5   : > { %p2995_p3 = pnand %p2994_p2, %p3224_p7 }
 0x6c6   : > { %p3000_p8 = por %p2999_p6, %p2998_p5 }
 0x6c7   : > { %p2996_p4 = pneg %p2995_p3 }
 0x6c8   : > { %p3002_p10 = por %p3001_p9, %p3000_p8 }
 0x6ca   : > { %p3003_p11 = pnand %p3002_p10, %p2996_p4 }
 0x6cc   : > { %3006 = shalt.err (!%p3003_p11)
}
 0x6cd   : > { %2781 = dma.vmem_to_hbm [thread:$0]  (%p3224_p7), %s2292_s2, 128, %s3691_s30, %s2278_s10  }
 0x6ce PF: > { %s3779_s20 = sld [smem:[#allocation12_spill]]  ;;  %p2787_p13 = scmp.ge.s32.totalorder %s3089_s14, 2 }
 0x6d0   : > { %p2784_p0 = pnand %p2787_p13, %p3232_p12 }
 0x6d4   : > { %s2303_s25 = sand.u32 1, %s3779_s20  }
 0x6d5   : > { %s2304_s22 = scalar_lea.sflag [#allocation10], %s2303_s25 }
 0x6d6   : > { %3048 = dma.done.wait (!%p2784_p0), %s2304_s22, 128  }
 0x6d7   : > { %3050 = vsyncadd (!%p2784_p0), %s2304_s22, 4294967168  ;;  %s21_s14 = sadd.s32 1, %s3089_s14   ;;  %s3781_s23 = sld [smem:[#allocation18_spill]] }
 0x6d8   : > { %p18_p1 = scmp.ge.s32.totalorder %s21_s14, 6   ;;  %s3782_s10 = sld [smem:[#allocation13_spill]] }
 0x6d9   : > { %s3783_s11 = sld [smem:[#allocation14_spill]]  ;;  %s3784_s12 = sld [smem:[#allocation15_spill]] }
 0x6da   : > { %s3785_s13 = sld [smem:[#allocation16_spill]]  ;;  %s3786_s27 = smov %s3057_s28 }
 0x6db   : > { %s3787_s28 = smov %s3061_s29  ;;  %s3788_s29 = smov %s3237_s17 }
 0x6dc   : > { %s3789_s30 = smov %s3069_s9  ;;  %20 = sbr.rel (!%p18_p1) target bundleno = 9 (0x9), region = 199 }
 0x6dd   : > { %s3790_s9 = smov %s3781_s23 }
 0x6e3   :  { %2309 = vsyncpa [#allocation10], 1 }
 0x6e4   :  { %2311 = vsyncpa [#allocation10 + $0x1], 1 }

</bundles_post_ra>
